<compile_context>
chip_gen: v5e
topology: v5e:2x2
jax: 0.10.0
libtpu: 0.0.40
codegen_flags: <defaults>
</compile_context>

<pallas_src>
import math
from functools import partial

import jax
import jax.numpy as jnp
from jax.experimental import pallas as pl
from jax.experimental.pallas import tpu as pltpu

# Matmul operand dtype.  Keep f32 to match torch numerics exactly; set to
# jnp.bfloat16 on v6e/v7x for ~2x MXU rate (accumulation stays f32, softmax /
# LayerNorm / residual math stays f32 either way).
MATMUL_DTYPE = jnp.float32


def _mm(a, b):
    """a @ b with f32 accumulation (operands optionally cast for the MXU)."""
    return jnp.dot(a.astype(MATMUL_DTYPE), b.astype(MATMUL_DTYPE),
                   preferred_element_type=jnp.float32)


def _mm_t(a, b):
    """a @ b.T (contract last dims) without materializing a transpose."""
    return jax.lax.dot_general(a.astype(MATMUL_DTYPE), b.astype(MATMUL_DTYPE),
                               (((1,), (1,)), ((), ())),
                               preferred_element_type=jnp.float32)


def _row_tile(n_rows, f32_cols, vmem_budget_bytes=24 << 20):
    """Row-tile size: multiple of 8, capped so the double-buffered per-tile
    f32 activations stay within a conservative VMEM budget (fits v7x's 64 MiB
    VMEM / 32 MiB scoped default as well as v5e/v6e)."""
    if n_rows <= 8:
        return n_rows
    bytes_per_row = 4 * 2 * max(f32_cols, 1)       # in + out, double-buffered
    cap = max(8, vmem_budget_bytes // bytes_per_row)
    tile = min(n_rows, 512, cap)
    return max(8, (tile // 8) * 8)


# ----------------------------------------------------------------------------
# Pallas kernels
# ----------------------------------------------------------------------------
def _linear_kernel(x_ref, w_ref, b_ref, o_ref):
    o_ref[...] = _mm(x_ref[...], w_ref[...]) + b_ref[...]


def linear(x2d, w, b):
    """y = x2d @ w + b ; row-tiled, weights resident across the grid."""
    N, Din = x2d.shape
    Dout = w.shape[1]
    tn = _row_tile(N, Din + Dout)
    return pl.pallas_call(
        _linear_kernel,
        out_shape=jax.ShapeDtypeStruct((N, Dout), jnp.float32),
        grid=(pl.cdiv(N, tn),),
        in_specs=[
            pl.BlockSpec((tn, Din), lambda i: (i, 0)),
            pl.BlockSpec((Din, Dout), lambda i: (0, 0)),   # resident
            pl.BlockSpec((1, Dout), lambda i: (0, 0)),     # resident
        ],
        out_specs=pl.BlockSpec((tn, Dout), lambda i: (i, 0)),
        compiler_params=pltpu.CompilerParams(dimension_semantics=("parallel",)),
    )(x2d, w, b.reshape(1, Dout))
    # TODO(synk): for production-size Din (>=512) add a K reduction grid axis
    # with a VMEM accumulator (pl.when init/finalize) to bound weight tiles.


def _proj_add_ln_kernel(a_ref, res_ref, w_ref, b_ref, g_ref, bb_ref, o_ref):
    # attention-output projection + bias + residual + LayerNorm in one pass
    y = _mm(a_ref[...], w_ref[...]) + b_ref[...] + res_ref[...]
    mu = jnp.mean(y, axis=-1, keepdims=True)
    var = jnp.mean(jnp.square(y - mu), axis=-1, keepdims=True)
    o_ref[...] = (y - mu) * jax.lax.rsqrt(var + 1e-5) * g_ref[...] + bb_ref[...]


def proj_add_ln(a2d, res2d, w, b, gamma, beta):
    """LayerNorm(residual + a2d @ w + b) over the last dim (eps = 1e-5)."""
    N, Dk = a2d.shape
    D = res2d.shape[1]
    tn = _row_tile(N, Dk + 2 * D)
    return pl.pallas_call(
        _proj_add_ln_kernel,
        out_shape=jax.ShapeDtypeStruct((N, D), jnp.float32),
        grid=(pl.cdiv(N, tn),),
        in_specs=[
            pl.BlockSpec((tn, Dk), lambda i: (i, 0)),
            pl.BlockSpec((tn, D), lambda i: (i, 0)),
            pl.BlockSpec((Dk, D), lambda i: (0, 0)),
            pl.BlockSpec((1, D), lambda i: (0, 0)),
            pl.BlockSpec((1, D), lambda i: (0, 0)),
            pl.BlockSpec((1, D), lambda i: (0, 0)),
        ],
        out_specs=pl.BlockSpec((tn, D), lambda i: (i, 0)),
        compiler_params=pltpu.CompilerParams(dimension_semantics=("parallel",)),
    )(a2d, res2d, w, b.reshape(1, D), gamma.reshape(1, D), beta.reshape(1, D))


def _ffn_add_ln_kernel(x_ref, w1_ref, b1_ref, w2_ref, b2_ref, g_ref, bb_ref, o_ref):
    x = x_ref[...]
    h = jnp.maximum(_mm(x, w1_ref[...]) + b1_ref[...], 0.0)      # ReLU
    y = _mm(h, w2_ref[...]) + b2_ref[...] + x                    # residual
    mu = jnp.mean(y, axis=-1, keepdims=True)
    var = jnp.mean(jnp.square(y - mu), axis=-1, keepdims=True)
    o_ref[...] = (y - mu) * jax.lax.rsqrt(var + 1e-5) * g_ref[...] + bb_ref[...]


def ffn_add_ln(x2d, w1, b1, w2, b2, gamma, beta):
    """LayerNorm(x + relu(x@w1+b1)@w2+b2), fully fused."""
    N, D = x2d.shape
    Dff = w1.shape[1]
    tn = _row_tile(N, 2 * D + Dff)
    return pl.pallas_call(
        _ffn_add_ln_kernel,
        out_shape=jax.ShapeDtypeStruct((N, D), jnp.float32),
        grid=(pl.cdiv(N, tn),),
        in_specs=[
            pl.BlockSpec((tn, D), lambda i: (i, 0)),
            pl.BlockSpec((D, Dff), lambda i: (0, 0)),
            pl.BlockSpec((1, Dff), lambda i: (0, 0)),
            pl.BlockSpec((Dff, D), lambda i: (0, 0)),
            pl.BlockSpec((1, D), lambda i: (0, 0)),
            pl.BlockSpec((1, D), lambda i: (0, 0)),
            pl.BlockSpec((1, D), lambda i: (0, 0)),
        ],
        out_specs=pl.BlockSpec((tn, D), lambda i: (i, 0)),
        compiler_params=pltpu.CompilerParams(
            dimension_semantics=("parallel",),
            vmem_limit_bytes=32 * 1024 * 1024,
        ),
    )(x2d, w1, b1.reshape(1, Dff), w2, b2.reshape(1, D),
      gamma.reshape(1, D), beta.reshape(1, D))


# --- attention ---------------------------------------------------------------
def _mha_core(q, k, v, mask, n_heads, dh, scale):
    """All heads of one batch element. q:[T,D] k,v:[S,D] (heads packed on lanes)."""
    outs = []
    for h in range(n_heads):                       # static, unrolled
        lo = h * dh
        qh = q[:, lo:lo + dh]
        kh = k[:, lo:lo + dh]
        vh = v[:, lo:lo + dh]
        s = _mm_t(qh, kh) * scale                  # [T, S], no K transpose
        if mask is not None:
            s = s + mask
        s = s - jnp.max(s, axis=-1, keepdims=True)
        p = jnp.exp(s)
        p = p * pl.reciprocal(jnp.sum(p, axis=-1, keepdims=True), approx=True)
        outs.append(_mm(p, vh))
    return jnp.concatenate(outs, axis=-1)          # [T, D] — one lane-dense store


def _make_self_attn_kernel(n_heads, dh, scale, D):
    def kernel(qkv_ref, mask_ref, o_ref):
        qkv = qkv_ref[...]                         # [T, 3D] packed (q|k|v)
        o_ref[...] = _mha_core(qkv[:, 0:D], qkv[:, D:2 * D], qkv[:, 2 * D:3 * D],
                               mask_ref[...], n_heads, dh, scale)
    return kernel


def _make_cross_attn_kernel(n_heads, dh, scale, D):
    def kernel(q_ref, kv_ref, o_ref):
        kv = kv_ref[...]                           # [S, 2D] packed (k|v)
        o_ref[...] = _mha_core(q_ref[...], kv[:, 0:D], kv[:, D:2 * D],
                               None, n_heads, dh, scale)   # no mask, no add
    return kernel


def self_attention(qkv, mask, n_heads, D):
    """qkv: [B, T, 3D] (packed), mask: [T, T] additive -> [B, T, D]."""
    B, T, _ = qkv.shape
    dh = D // n_heads
    scale = 1.0 / math.sqrt(dh)
    return pl.pallas_call(
        _make_self_attn_kernel(n_heads, dh, scale, D),
        out_shape=jax.ShapeDtypeStruct((B, T, D), jnp.float32),
        grid=(B,),
        in_specs=[
            pl.BlockSpec((None, T, 3 * D), lambda b: (b, 0, 0)),
            pl.BlockSpec((T, T), lambda b: (0, 0)),
        ],
        out_specs=pl.BlockSpec((None, T, D), lambda b: (b, 0, 0)),
        compiler_params=pltpu.CompilerParams(dimension_semantics=("parallel",)),
    )(qkv, mask)


def cross_attention(q, kv, n_heads, D):
    """q: [B, T, D], kv: [B, S, 2D] (packed) -> [B, T, D]."""
    B, T, _ = q.shape
    S = kv.shape[1]
    dh = D // n_heads
    scale = 1.0 / math.sqrt(dh)
    return pl.pallas_call(
        _make_cross_attn_kernel(n_heads, dh, scale, D),
        out_shape=jax.ShapeDtypeStruct((B, T, D), jnp.float32),
        grid=(B,),
        in_specs=[
            pl.BlockSpec((None, T, D), lambda b: (b, 0, 0)),
            pl.BlockSpec((None, S, 2 * D), lambda b: (b, 0, 0)),
        ],
        out_specs=pl.BlockSpec((None, T, D), lambda b: (b, 0, 0)),
        compiler_params=pltpu.CompilerParams(dimension_semantics=("parallel",)),
    )(q, kv)


# ----------------------------------------------------------------------------
# Model composition (glue in plain JAX under jit, compute in Pallas)
# ----------------------------------------------------------------------------
def decoder_layer(x, memory, lp, tgt_mask, n_heads):
    """Post-norm TransformerDecoderLayer (relu FFN, dropout=identity)."""
    B, T, D = x.shape
    S = memory.shape[1]
    x2d = x.reshape(B * T, D)

    # self-attention block (fused QKV in-proj; out-proj + residual + LN fused)
    qkv = linear(x2d, lp["sa_w_qkv"], lp["sa_b_qkv"]).reshape(B, T, 3 * D)
    sa = self_attention(qkv, tgt_mask, n_heads, D)
    x2d = proj_add_ln(sa.reshape(B * T, D), x2d,
                      lp["sa_wo"], lp["sa_bo"], lp["ln1_g"], lp["ln1_b"])

    # cross-attention block (fused KV in-proj from memory; no mask)
    q = linear(x2d, lp["ca_wq"], lp["ca_bq"]).reshape(B, T, D)
    kv = linear(memory.reshape(B * S, D),
                lp["ca_w_kv"], lp["ca_b_kv"]).reshape(B, S, 2 * D)
    ca = cross_attention(q, kv, n_heads, D)
    x2d = proj_add_ln(ca.reshape(B * T, D), x2d,
                      lp["ca_wo"], lp["ca_bo"], lp["ln2_g"], lp["ln2_b"])

    # feed-forward block (FFN + residual + LN, one kernel)
    x2d = ffn_add_ln(x2d, lp["w1"], lp["b1"], lp["w2"], lp["b2"],
                     lp["ln3_g"], lp["ln3_b"])
    return x2d.reshape(B, T, D)


def positional_encoding(T, d_model):
    position = jnp.arange(T, dtype=jnp.float32)[:, None]
    div_term = jnp.exp(
        jnp.arange(0, d_model, 2, dtype=jnp.float32) * (-math.log(10000.0) / d_model)
    )
    pe = jnp.zeros((T, d_model), dtype=jnp.float32)
    pe = pe.at[:, 0::2].set(jnp.sin(position * div_term))
    pe = pe.at[:, 1::2].set(jnp.cos(position * div_term))
    return pe  # [T, d_model]


@partial(jax.jit, static_argnames=("n_heads",))
def jammer_transformer_decoder(pos_seq, vis_seq, params, n_heads):
    """
    pos_seq: [B, T, pos_dim]
    vis_seq: [B, M, vis_dim]
    returns (mean [B,T,out], logvar [B,T,out])
    """
    B, T, pos_dim = pos_seq.shape
    _, M, vis_dim = vis_seq.shape
    D = params["pos_proj_w"].shape[1]

    Q = linear(pos_seq.reshape(B * T, pos_dim),
               params["pos_proj_w"], params["pos_proj_b"]).reshape(B, T, D)
    mem = linear(vis_seq.reshape(B * M, vis_dim),
                 params["vis_proj_w"], params["vis_proj_b"]).reshape(B, M, D)

    Q = Q + positional_encoding(T, D)[None, :, :]

    # additive causal mask for self-attention (cross-attention gets no mask)
    causal = jnp.triu(jnp.ones((T, T), dtype=bool), k=1)
    tgt_mask = jnp.where(causal, jnp.float32(-1e30), jnp.float32(0.0))

    x = Q
    for lp in params["layers"]:
        x = decoder_layer(x, mem, lp, tgt_mask, n_heads)

    # fused (mean | logvar) head, lane-padded to 128 for dense stores
    H = x.reshape(B * T, D)
    w_head, b_head = params["head_w"], params["head_b"]
    two_out = w_head.shape[1]
    pad = (-two_out) % 128
    out = linear(H, jnp.pad(w_head, ((0, 0), (0, pad))),
                 jnp.pad(b_head, (0, pad)))[:, :two_out]
    out_dim = two_out // 2
    mean = out[:, :out_dim].reshape(B, T, out_dim)
    logvar = out[:, out_dim:].reshape(B, T, out_dim)
    return mean, logvar


# ----------------------------------------------------------------------------
# Deterministic parameter initialization (fused weight layout)
# ----------------------------------------------------------------------------
def init_params(key, pos_dim, vis_dim, hidden_dim, output_dim, n_layers):
    def dense(k, din, dout, scale=0.05):
        kw, kb = jax.random.split(k)
        return (scale * jax.random.normal(kw, (din, dout), jnp.float32),
                scale * jax.random.normal(kb, (dout,), jnp.float32))

    keys = jax.random.split(key, 4 + n_layers)
    params = {}
    params["pos_proj_w"], params["pos_proj_b"] = dense(keys[0], pos_dim, hidden_dim)
    params["vis_proj_w"], params["vis_proj_b"] = dense(keys[1], vis_dim, hidden_dim)
    wm, bm = dense(keys[2], hidden_dim, output_dim)
    wl, bl = dense(keys[3], hidden_dim, output_dim)
    params["head_w"] = jnp.concatenate([wm, wl], axis=1)       # (mean | logvar)
    params["head_b"] = jnp.concatenate([bm, bl], axis=0)

    layers = []
    for li in range(n_layers):
        lk = jax.random.split(keys[4 + li], 10)
        wq, bq = dense(lk[0], hidden_dim, hidden_dim)
        wk, bk = dense(lk[1], hidden_dim, hidden_dim)
        wv, bv = dense(lk[2], hidden_dim, hidden_dim)
        sa_wo, sa_bo = dense(lk[3], hidden_dim, hidden_dim)
        cwq, cbq = dense(lk[4], hidden_dim, hidden_dim)
        cwk, cbk = dense(lk[5], hidden_dim, hidden_dim)
        cwv, cbv = dense(lk[6], hidden_dim, hidden_dim)
        ca_wo, ca_bo = dense(lk[7], hidden_dim, hidden_dim)
        w1, b1 = dense(lk[8], hidden_dim, 4 * hidden_dim)
        w2, b2 = dense(lk[9], 4 * hidden_dim, hidden_dim)
        lp = {
            # fused in-proj, (q|k|v) column order matches torch in_proj ordering
            "sa_w_qkv": jnp.concatenate([wq, wk, wv], axis=1),
            "sa_b_qkv": jnp.concatenate([bq, bk, bv], axis=0),
            "sa_wo": sa_wo, "sa_bo": sa_bo,
            "ca_wq": cwq, "ca_bq": cbq,
            "ca_w_kv": jnp.concatenate([cwk, cwv], axis=1),
            "ca_b_kv": jnp.concatenate([cbk, cbv], axis=0),
            "ca_wo": ca_wo, "ca_bo": ca_bo,
            "w1": w1, "b1": b1, "w2": w2, "b2": b2,
            "ln1_g": jnp.ones((hidden_dim,), jnp.float32),
            "ln1_b": jnp.zeros((hidden_dim,), jnp.float32),
            "ln2_g": jnp.ones((hidden_dim,), jnp.float32),
            "ln2_b": jnp.zeros((hidden_dim,), jnp.float32),
            "ln3_g": jnp.ones((hidden_dim,), jnp.float32),
            "ln3_b": jnp.zeros((hidden_dim,), jnp.float32),
        }
        layers.append(lp)
    params["layers"] = layers
    return params


# ----------------------------------------------------------------------------
# Main
# ----------------------------------------------------------------------------
if __name__ == "__main__":
    B, T, M = 2, 8, 8
    pos_dim, vis_dim, hidden_dim, output_dim = 6, 16, 32, 3
    n_layers, n_heads = 2, 4

    key = jax.random.PRNGKey(0)
    kp, kx, kv = jax.random.split(key, 3)
    params = init_params(kp, pos_dim, vis_dim, hidden_dim, output_dim, n_layers)

    pos_seq = jax.random.normal(kx, (B, T, pos_dim), jnp.float32)
    vis_seq = jax.random.normal(kv, (B, M, vis_dim), jnp.float32)

    mean, logvar = jammer_transformer_decoder(pos_seq, vis_seq, params, n_heads)
    jax.block_until_ready((mean, logvar))

    assert mean.shape == (B, T, output_dim)
    assert logvar.shape == (B, T, output_dim)
    assert bool(jnp.all(jnp.isfinite(mean))) and bool(jnp.all(jnp.isfinite(logvar)))
    print("KERNEL_OK")
</pallas_src>

<mosaic_0001>
module attributes {stable_mosaic.version = 11 : i64} {
  func.func @_linear_kernel(%arg0: i32, %arg1: memref<16x6xf32, #tpu.memory_space<vmem>>, %arg2: memref<6x32xf32, #tpu.memory_space<vmem>>, %arg3: memref<1x32xf32, #tpu.memory_space<vmem>>, %arg4: memref<16x32xf32, #tpu.memory_space<vmem>>) attributes {dimension_semantics = [#tpu.dimension_semantics<parallel>], iteration_bounds = array<i64: 1>, scalar_prefetch = 0 : i64, scratch_operands = 0 : i64, tpu.core_type = #tpu.core_type<tc>, window_params = [{transform_indices = @transform_0, window_bounds = array<i64: 16, 6>}, {pipeline_mode = #tpu.pipeline_mode<synchronous>, transform_indices = @transform_1, window_bounds = array<i64: 6, 32>}, {pipeline_mode = #tpu.pipeline_mode<synchronous>, transform_indices = @transform_2, window_bounds = array<i64: 1, 32>}, {transform_indices = @transform_3, window_bounds = array<i64: 16, 32>}]} {
    %c0 = arith.constant 0 : index
    %c0_0 = arith.constant 0 : index
    %0 = vector.load %arg1[%c0, %c0_0] : memref<16x6xf32, #tpu.memory_space<vmem>>, vector<16x6xf32>
    %c0_1 = arith.constant 0 : index
    %c0_2 = arith.constant 0 : index
    %1 = vector.load %arg2[%c0_1, %c0_2] : memref<6x32xf32, #tpu.memory_space<vmem>>, vector<6x32xf32>
    %cst = arith.constant dense<0.000000e+00> : vector<16x32xf32>
    %2 = tpu.matmul %0, %1, %cst {dimension_numbers = #tpu.dot_dimension_numbers<[1], [0], [0], [1], [0, 0, 1, 1], [], []>} : vector<16x6xf32>, vector<6x32xf32>, vector<16x32xf32> -> vector<16x32xf32>
    %c0_3 = arith.constant 0 : index
    %c0_4 = arith.constant 0 : index
    %3 = vector.load %arg3[%c0_3, %c0_4] : memref<1x32xf32, #tpu.memory_space<vmem>>, vector<1x32xf32>
    %4 = vector.broadcast %3 : vector<1x32xf32> to vector<16x32xf32>
    %5 = arith.addf %2, %4 : vector<16x32xf32>
    %c0_5 = arith.constant 0 : index
    %c0_6 = arith.constant 0 : index
    %6 = vector.load %arg4[%c0_5, %c0_6] : memref<16x32xf32, #tpu.memory_space<vmem>>, vector<16x32xf32>
    tpu.vector_store %arg4[%c0_5, %c0_6], %5 {strides = array<i32>} : memref<16x32xf32, #tpu.memory_space<vmem>>, vector<16x32xf32>,
    return
  }
  func.func @transform_0(%arg0: i32) -> (i32, i32) {
    %c0_i32 = arith.constant 0 : i32
    %c0_i32_0 = arith.constant 0 : i32
    return %arg0, %c0_i32 : i32, i32
  }
  func.func @transform_1(%arg0: i32) -> (i32, i32) {
    %c0_i32 = arith.constant 0 : i32
    %c0_i32_0 = arith.constant 0 : i32
    %c0_i32_1 = arith.constant 0 : i32
    return %c0_i32, %c0_i32_0 : i32, i32
  }
  func.func @transform_2(%arg0: i32) -> (i32, i32) {
    %c0_i32 = arith.constant 0 : i32
    %c0_i32_0 = arith.constant 0 : i32
    %c0_i32_1 = arith.constant 0 : i32
    return %c0_i32, %c0_i32_0 : i32, i32
  }
  func.func @transform_3(%arg0: i32) -> (i32, i32) {
    %c0_i32 = arith.constant 0 : i32
    %c0_i32_0 = arith.constant 0 : i32
    return %arg0, %c0_i32 : i32, i32
  }
}

module attributes {stable_mosaic.version = 11 : i64} {
  func.func @_linear_kernel(%arg0: i32, %arg1: memref<16x32xf32, #tpu.memory_space<vmem>>, %arg2: memref<32x96xf32, #tpu.memory_space<vmem>>, %arg3: memref<1x96xf32, #tpu.memory_space<vmem>>, %arg4: memref<16x96xf32, #tpu.memory_space<vmem>>) attributes {dimension_semantics = [#tpu.dimension_semantics<parallel>], iteration_bounds = array<i64: 1>, scalar_prefetch = 0 : i64, scratch_operands = 0 : i64, tpu.core_type = #tpu.core_type<tc>, window_params = [{transform_indices = @transform_0, window_bounds = array<i64: 16, 32>}, {pipeline_mode = #tpu.pipeline_mode<synchronous>, transform_indices = @transform_1, window_bounds = array<i64: 32, 96>}, {pipeline_mode = #tpu.pipeline_mode<synchronous>, transform_indices = @transform_2, window_bounds = array<i64: 1, 96>}, {transform_indices = @transform_3, window_bounds = array<i64: 16, 96>}]} {
    %c0 = arith.constant 0 : index
    %c0_0 = arith.constant 0 : index
    %0 = vector.load %arg1[%c0, %c0_0] : memref<16x32xf32, #tpu.memory_space<vmem>>, vector<16x32xf32>
    %c0_1 = arith.constant 0 : index
    %c0_2 = arith.constant 0 : index
    %1 = vector.load %arg2[%c0_1, %c0_2] : memref<32x96xf32, #tpu.memory_space<vmem>>, vector<32x96xf32>
    %cst = arith.constant dense<0.000000e+00> : vector<16x96xf32>
    %2 = tpu.matmul %0, %1, %cst {dimension_numbers = #tpu.dot_dimension_numbers<[1], [0], [0], [1], [0, 0, 1, 1], [], []>} : vector<16x32xf32>, vector<32x96xf32>, vector<16x96xf32> -> vector<16x96xf32>
    %c0_3 = arith.constant 0 : index
    %c0_4 = arith.constant 0 : index
    %3 = vector.load %arg3[%c0_3, %c0_4] : memref<1x96xf32, #tpu.memory_space<vmem>>, vector<1x96xf32>
    %4 = vector.broadcast %3 : vector<1x96xf32> to vector<16x96xf32>
    %5 = arith.addf %2, %4 : vector<16x96xf32>
    %c0_5 = arith.constant 0 : index
    %c0_6 = arith.constant 0 : index
    %6 = vector.load %arg4[%c0_5, %c0_6] : memref<16x96xf32, #tpu.memory_space<vmem>>, vector<16x96xf32>
    tpu.vector_store %arg4[%c0_5, %c0_6], %5 {strides = array<i32>} : memref<16x96xf32, #tpu.memory_space<vmem>>, vector<16x96xf32>,
    return
  }
  func.func @transform_0(%arg0: i32) -> (i32, i32) {
    %c0_i32 = arith.constant 0 : i32
    %c0_i32_0 = arith.constant 0 : i32
    return %arg0, %c0_i32 : i32, i32
  }
  func.func @transform_1(%arg0: i32) -> (i32, i32) {
    %c0_i32 = arith.constant 0 : i32
    %c0_i32_0 = arith.constant 0 : i32
    %c0_i32_1 = arith.constant 0 : i32
    return %c0_i32, %c0_i32_0 : i32, i32
  }
  func.func @transform_2(%arg0: i32) -> (i32, i32) {
    %c0_i32 = arith.constant 0 : i32
    %c0_i32_0 = arith.constant 0 : i32
    %c0_i32_1 = arith.constant 0 : i32
    return %c0_i32, %c0_i32_0 : i32, i32
  }
  func.func @transform_3(%arg0: i32) -> (i32, i32) {
    %c0_i32 = arith.constant 0 : i32
    %c0_i32_0 = arith.constant 0 : i32
    return %arg0, %c0_i32 : i32, i32
  }
}

module attributes {stable_mosaic.version = 11 : i64} {
  func.func @kernel(%arg0: i32, %arg1: memref<1x8x96xf32, #tpu.memory_space<vmem>>, %arg2: memref<8x8xf32, #tpu.memory_space<vmem>>, %arg3: memref<1x8x32xf32, #tpu.memory_space<vmem>>) attributes {dimension_semantics = [#tpu.dimension_semantics<parallel>], iteration_bounds = array<i64: 2>, scalar_prefetch = 0 : i64, scratch_operands = 0 : i64, tpu.core_type = #tpu.core_type<tc>, window_params = [{transform_indices = @transform_0, window_bounds = array<i64: 1, 8, 96>}, {pipeline_mode = #tpu.pipeline_mode<synchronous>, transform_indices = @transform_1, window_bounds = array<i64: 8, 8>}, {transform_indices = @transform_2, window_bounds = array<i64: 1, 8, 32>}]} {
    %c0 = arith.constant 0 : index
    %c0_0 = arith.constant 0 : index
    %c0_1 = arith.constant 0 : index
    %0 = vector.load %arg1[%c0, %c0_0, %c0_1] : memref<1x8x96xf32, #tpu.memory_space<vmem>>, vector<1x8x96xf32>
    %1 = vector.shape_cast %0 : vector<1x8x96xf32> to vector<8x96xf32>
    %2 = vector.extract_strided_slice %1 {offsets = [0, 0], sizes = [8, 32], strides = [1, 1]} : vector<8x96xf32> to vector<8x32xf32>
    %3 = vector.extract_strided_slice %1 {offsets = [0, 32], sizes = [8, 32], strides = [1, 1]} : vector<8x96xf32> to vector<8x32xf32>
    %4 = vector.extract_strided_slice %1 {offsets = [0, 64], sizes = [8, 32], strides = [1, 1]} : vector<8x96xf32> to vector<8x32xf32>
    %c0_2 = arith.constant 0 : index
    %c0_3 = arith.constant 0 : index
    %5 = vector.load %arg2[%c0_2, %c0_3] : memref<8x8xf32, #tpu.memory_space<vmem>>, vector<8x8xf32>
    %6 = vector.extract_strided_slice %2 {offsets = [0, 0], sizes = [8, 8], strides = [1, 1]} : vector<8x32xf32> to vector<8x8xf32>
    %7 = vector.extract_strided_slice %3 {offsets = [0, 0], sizes = [8, 8], strides = [1, 1]} : vector<8x32xf32> to vector<8x8xf32>
    %8 = vector.extract_strided_slice %4 {offsets = [0, 0], sizes = [8, 8], strides = [1, 1]} : vector<8x32xf32> to vector<8x8xf32>
    %cst = arith.constant dense<0.000000e+00> : vector<8x8xf32>
    %9 = tpu.matmul %6, %7, %cst {dimension_numbers = #tpu.dot_dimension_numbers<[1], [1], [0], [0], [0, 0, 1, 0], [], []>} : vector<8x8xf32>, vector<8x8xf32>, vector<8x8xf32> -> vector<8x8xf32>
    %cst_4 = arith.constant 0.353553385 : f32
    %10 = vector.broadcast %cst_4 : f32 to vector<8x8xf32>
    %11 = arith.mulf %9, %10 : vector<8x8xf32>
    %12 = arith.addf %11, %5 : vector<8x8xf32>
    %cst_5 = arith.constant dense<0xFF800000> : vector<8xf32>
    %13 = vector.multi_reduction <maximumf>, %12, %cst_5 [1] : vector<8x8xf32> to vector<8xf32>
    %14 = vector.shape_cast %13 : vector<8xf32> to vector<8x1xf32>
    %15 = vector.broadcast %14 : vector<8x1xf32> to vector<8x8xf32>
    %16 = arith.subf %12, %15 : vector<8x8xf32>
    %17 = math.exp %16 : vector<8x8xf32>
    %cst_6 = arith.constant dense<0.000000e+00> : vector<8xf32>
    %18 = vector.multi_reduction <add>, %17, %cst_6 [1] : vector<8x8xf32> to vector<8xf32>
    %19 = vector.shape_cast %18 : vector<8xf32> to vector<8x1xf32>
    %20 = tpu.reciprocal %19 {approx = true} : vector<8x1xf32> -> vector<8x1xf32>
    %21 = vector.broadcast %20 : vector<8x1xf32> to vector<8x8xf32>
    %22 = arith.mulf %17, %21 : vector<8x8xf32>
    %cst_7 = arith.constant dense<0.000000e+00> : vector<8x8xf32>
    %23 = tpu.matmul %22, %8, %cst_7 {dimension_numbers = #tpu.dot_dimension_numbers<[1], [0], [0], [1], [0, 0, 1, 1], [], []>} : vector<8x8xf32>, vector<8x8xf32>, vector<8x8xf32> -> vector<8x8xf32>
    %24 = vector.extract_strided_slice %2 {offsets = [0, 8], sizes = [8, 8], strides = [1, 1]} : vector<8x32xf32> to vector<8x8xf32>
    %25 = vector.extract_strided_slice %3 {offsets = [0, 8], sizes = [8, 8], strides = [1, 1]} : vector<8x32xf32> to vector<8x8xf32>
    %26 = vector.extract_strided_slice %4 {offsets = [0, 8], sizes = [8, 8], strides = [1, 1]} : vector<8x32xf32> to vector<8x8xf32>
    %cst_8 = arith.constant dense<0.000000e+00> : vector<8x8xf32>
    %27 = tpu.matmul %24, %25, %cst_8 {dimension_numbers = #tpu.dot_dimension_numbers<[1], [1], [0], [0], [0, 0, 1, 0], [], []>} : vector<8x8xf32>, vector<8x8xf32>, vector<8x8xf32> -> vector<8x8xf32>
    %cst_9 = arith.constant 0.353553385 : f32
    %28 = vector.broadcast %cst_9 : f32 to vector<8x8xf32>
    %29 = arith.mulf %27, %28 : vector<8x8xf32>
    %30 = arith.addf %29, %5 : vector<8x8xf32>
    %cst_10 = arith.constant dense<0xFF800000> : vector<8xf32>
    %31 = vector.multi_reduction <maximumf>, %30, %cst_10 [1] : vector<8x8xf32> to vector<8xf32>
    %32 = vector.shape_cast %31 : vector<8xf32> to vector<8x1xf32>
    %33 = vector.broadcast %32 : vector<8x1xf32> to vector<8x8xf32>
    %34 = arith.subf %30, %33 : vector<8x8xf32>
    %35 = math.exp %34 : vector<8x8xf32>
    %cst_11 = arith.constant dense<0.000000e+00> : vector<8xf32>
    %36 = vector.multi_reduction <add>, %35, %cst_11 [1] : vector<8x8xf32> to vector<8xf32>
    %37 = vector.shape_cast %36 : vector<8xf32> to vector<8x1xf32>
    %38 = tpu.reciprocal %37 {approx = true} : vector<8x1xf32> -> vector<8x1xf32>
    %39 = vector.broadcast %38 : vector<8x1xf32> to vector<8x8xf32>
    %40 = arith.mulf %35, %39 : vector<8x8xf32>
    %cst_12 = arith.constant dense<0.000000e+00> : vector<8x8xf32>
    %41 = tpu.matmul %40, %26, %cst_12 {dimension_numbers = #tpu.dot_dimension_numbers<[1], [0], [0], [1], [0, 0, 1, 1], [], []>} : vector<8x8xf32>, vector<8x8xf32>, vector<8x8xf32> -> vector<8x8xf32>
    %42 = vector.extract_strided_slice %2 {offsets = [0, 16], sizes = [8, 8], strides = [1, 1]} : vector<8x32xf32> to vector<8x8xf32>
    %43 = vector.extract_strided_slice %3 {offsets = [0, 16], sizes = [8, 8], strides = [1, 1]} : vector<8x32xf32> to vector<8x8xf32>
    %44 = vector.extract_strided_slice %4 {offsets = [0, 16], sizes = [8, 8], strides = [1, 1]} : vector<8x32xf32> to vector<8x8xf32>
    %cst_13 = arith.constant dense<0.000000e+00> : vector<8x8xf32>
    %45 = tpu.matmul %42, %43, %cst_13 {dimension_numbers = #tpu.dot_dimension_numbers<[1], [1], [0], [0], [0, 0, 1, 0], [], []>} : vector<8x8xf32>, vector<8x8xf32>, vector<8x8xf32> -> vector<8x8xf32>
    %cst_14 = arith.constant 0.353553385 : f32
    %46 = vector.broadcast %cst_14 : f32 to vector<8x8xf32>
    %47 = arith.mulf %45, %46 : vector<8x8xf32>
    %48 = arith.addf %47, %5 : vector<8x8xf32>
    %cst_15 = arith.constant dense<0xFF800000> : vector<8xf32>
    %49 = vector.multi_reduction <maximumf>, %48, %cst_15 [1] : vector<8x8xf32> to vector<8xf32>
    %50 = vector.shape_cast %49 : vector<8xf32> to vector<8x1xf32>
    %51 = vector.broadcast %50 : vector<8x1xf32> to vector<8x8xf32>
    %52 = arith.subf %48, %51 : vector<8x8xf32>
    %53 = math.exp %52 : vector<8x8xf32>
    %cst_16 = arith.constant dense<0.000000e+00> : vector<8xf32>
    %54 = vector.multi_reduction <add>, %53, %cst_16 [1] : vector<8x8xf32> to vector<8xf32>
    %55 = vector.shape_cast %54 : vector<8xf32> to vector<8x1xf32>
    %56 = tpu.reciprocal %55 {approx = true} : vector<8x1xf32> -> vector<8x1xf32>
    %57 = vector.broadcast %56 : vector<8x1xf32> to vector<8x8xf32>
    %58 = arith.mulf %53, %57 : vector<8x8xf32>
    %cst_17 = arith.constant dense<0.000000e+00> : vector<8x8xf32>
    %59 = tpu.matmul %58, %44, %cst_17 {dimension_numbers = #tpu.dot_dimension_numbers<[1], [0], [0], [1], [0, 0, 1, 1], [], []>} : vector<8x8xf32>, vector<8x8xf32>, vector<8x8xf32> -> vector<8x8xf32>
    %60 = vector.extract_strided_slice %2 {offsets = [0, 24], sizes = [8, 8], strides = [1, 1]} : vector<8x32xf32> to vector<8x8xf32>
    %61 = vector.extract_strided_slice %3 {offsets = [0, 24], sizes = [8, 8], strides = [1, 1]} : vector<8x32xf32> to vector<8x8xf32>
    %62 = vector.extract_strided_slice %4 {offsets = [0, 24], sizes = [8, 8], strides = [1, 1]} : vector<8x32xf32> to vector<8x8xf32>
    %cst_18 = arith.constant dense<0.000000e+00> : vector<8x8xf32>
    %63 = tpu.matmul %60, %61, %cst_18 {dimension_numbers = #tpu.dot_dimension_numbers<[1], [1], [0], [0], [0, 0, 1, 0], [], []>} : vector<8x8xf32>, vector<8x8xf32>, vector<8x8xf32> -> vector<8x8xf32>
    %cst_19 = arith.constant 0.353553385 : f32
    %64 = vector.broadcast %cst_19 : f32 to vector<8x8xf32>
    %65 = arith.mulf %63, %64 : vector<8x8xf32>
    %66 = arith.addf %65, %5 : vector<8x8xf32>
    %cst_20 = arith.constant dense<0xFF800000> : vector<8xf32>
    %67 = vector.multi_reduction <maximumf>, %66, %cst_20 [1] : vector<8x8xf32> to vector<8xf32>
    %68 = vector.shape_cast %67 : vector<8xf32> to vector<8x1xf32>
    %69 = vector.broadcast %68 : vector<8x1xf32> to vector<8x8xf32>
    %70 = arith.subf %66, %69 : vector<8x8xf32>
    %71 = math.exp %70 : vector<8x8xf32>
    %cst_21 = arith.constant dense<0.000000e+00> : vector<8xf32>
    %72 = vector.multi_reduction <add>, %71, %cst_21 [1] : vector<8x8xf32> to vector<8xf32>
    %73 = vector.shape_cast %72 : vector<8xf32> to vector<8x1xf32>
    %74 = tpu.reciprocal %73 {approx = true} : vector<8x1xf32> -> vector<8x1xf32>
    %75 = vector.broadcast %74 : vector<8x1xf32> to vector<8x8xf32>
    %76 = arith.mulf %71, %75 : vector<8x8xf32>
    %cst_22 = arith.constant dense<0.000000e+00> : vector<8x8xf32>
    %77 = tpu.matmul %76, %62, %cst_22 {dimension_numbers = #tpu.dot_dimension_numbers<[1], [0], [0], [1], [0, 0, 1, 1], [], []>} : vector<8x8xf32>, vector<8x8xf32>, vector<8x8xf32> -> vector<8x8xf32>
    %78 = tpu.concatenate %23, %41, %59, %77 in 1 : vector<8x8xf32>, vector<8x8xf32>, vector<8x8xf32>, vector<8x8xf32> -> vector<8x32xf32>
    %c0_23 = arith.constant 0 : index
    %c0_24 = arith.constant 0 : index
    %c0_25 = arith.constant 0 : index
    %79 = vector.load %arg3[%c0_23, %c0_24, %c0_25] : memref<1x8x32xf32, #tpu.memory_space<vmem>>, vector<1x8x32xf32>
    %80 = vector.shape_cast %79 : vector<1x8x32xf32> to vector<8x32xf32>
    %81 = vector.shape_cast %78 : vector<8x32xf32> to vector<1x8x32xf32>
    tpu.vector_store %arg3[%c0_23, %c0_24, %c0_25], %81 {strides = array<i32>} : memref<1x8x32xf32, #tpu.memory_space<vmem>>, vector<1x8x32xf32>,
    return
  }
  func.func @transform_0(%arg0: i32) -> (i32, i32, i32) {
    %c0_i32 = arith.constant 0 : i32
    %c0_i32_0 = arith.constant 0 : i32
    %c0_i32_1 = arith.constant 0 : i32
    return %arg0, %c0_i32, %c0_i32_0 : i32, i32, i32
  }
  func.func @transform_1(%arg0: i32) -> (i32, i32) {
    %c0_i32 = arith.constant 0 : i32
    %c0_i32_0 = arith.constant 0 : i32
    %c0_i32_1 = arith.constant 0 : i32
    return %c0_i32, %c0_i32_0 : i32, i32
  }
  func.func @transform_2(%arg0: i32) -> (i32, i32, i32) {
    %c0_i32 = arith.constant 0 : i32
    %c0_i32_0 = arith.constant 0 : i32
    %c0_i32_1 = arith.constant 0 : i32
    return %arg0, %c0_i32, %c0_i32_0 : i32, i32, i32
  }
}

module attributes {stable_mosaic.version = 11 : i64} {
  func.func @_proj_add_ln_kernel(%arg0: i32, %arg1: memref<16x32xf32, #tpu.memory_space<vmem>>, %arg2: memref<16x32xf32, #tpu.memory_space<vmem>>, %arg3: memref<32x32xf32, #tpu.memory_space<vmem>>, %arg4: memref<1x32xf32, #tpu.memory_space<vmem>>, %arg5: memref<1x32xf32, #tpu.memory_space<vmem>>, %arg6: memref<1x32xf32, #tpu.memory_space<vmem>>, %arg7: memref<16x32xf32, #tpu.memory_space<vmem>>) attributes {dimension_semantics = [#tpu.dimension_semantics<parallel>], iteration_bounds = array<i64: 1>, scalar_prefetch = 0 : i64, scratch_operands = 0 : i64, tpu.core_type = #tpu.core_type<tc>, window_params = [{transform_indices = @transform_0, window_bounds = array<i64: 16, 32>}, {transform_indices = @transform_1, window_bounds = array<i64: 16, 32>}, {pipeline_mode = #tpu.pipeline_mode<synchronous>, transform_indices = @transform_2, window_bounds = array<i64: 32, 32>}, {pipeline_mode = #tpu.pipeline_mode<synchronous>, transform_indices = @transform_3, window_bounds = array<i64: 1, 32>}, {pipeline_mode = #tpu.pipeline_mode<synchronous>, transform_indices = @transform_4, window_bounds = array<i64: 1, 32>}, {pipeline_mode = #tpu.pipeline_mode<synchronous>, transform_indices = @transform_5, window_bounds = array<i64: 1, 32>}, {transform_indices = @transform_6, window_bounds = array<i64: 16, 32>}]} {
    %c0 = arith.constant 0 : index
    %c0_0 = arith.constant 0 : index
    %0 = vector.load %arg1[%c0, %c0_0] : memref<16x32xf32, #tpu.memory_space<vmem>>, vector<16x32xf32>
    %c0_1 = arith.constant 0 : index
    %c0_2 = arith.constant 0 : index
    %1 = vector.load %arg3[%c0_1, %c0_2] : memref<32x32xf32, #tpu.memory_space<vmem>>, vector<32x32xf32>
    %cst = arith.constant dense<0.000000e+00> : vector<16x32xf32>
    %2 = tpu.matmul %0, %1, %cst {dimension_numbers = #tpu.dot_dimension_numbers<[1], [0], [0], [1], [0, 0, 1, 1], [], []>} : vector<16x32xf32>, vector<32x32xf32>, vector<16x32xf32> -> vector<16x32xf32>
    %c0_3 = arith.constant 0 : index
    %c0_4 = arith.constant 0 : index
    %3 = vector.load %arg4[%c0_3, %c0_4] : memref<1x32xf32, #tpu.memory_space<vmem>>, vector<1x32xf32>
    %4 = vector.broadcast %3 : vector<1x32xf32> to vector<16x32xf32>
    %5 = arith.addf %2, %4 : vector<16x32xf32>
    %c0_5 = arith.constant 0 : index
    %c0_6 = arith.constant 0 : index
    %6 = vector.load %arg2[%c0_5, %c0_6] : memref<16x32xf32, #tpu.memory_space<vmem>>, vector<16x32xf32>
    %7 = arith.addf %5, %6 : vector<16x32xf32>
    %cst_7 = arith.constant dense<0.000000e+00> : vector<16xf32>
    %8 = vector.multi_reduction <add>, %7, %cst_7 [1] : vector<16x32xf32> to vector<16xf32>
    %9 = vector.shape_cast %8 : vector<16xf32> to vector<16x1xf32>
    %cst_8 = arith.constant 3.200000e+01 : f32
    %10 = vector.broadcast %cst_8 : f32 to vector<16x1xf32>
    %11 = arith.divf %9, %10 : vector<16x1xf32>
    %12 = vector.broadcast %11 : vector<16x1xf32> to vector<16x32xf32>
    %13 = arith.subf %7, %12 : vector<16x32xf32>
    %14 = arith.mulf %13, %13 : vector<16x32xf32>
    %cst_9 = arith.constant dense<0.000000e+00> : vector<16xf32>
    %15 = vector.multi_reduction <add>, %14, %cst_9 [1] : vector<16x32xf32> to vector<16xf32>
    %16 = vector.shape_cast %15 : vector<16xf32> to vector<16x1xf32>
    %cst_10 = arith.constant 3.200000e+01 : f32
    %17 = vector.broadcast %cst_10 : f32 to vector<16x1xf32>
    %18 = arith.divf %16, %17 : vector<16x1xf32>
    %19 = vector.broadcast %11 : vector<16x1xf32> to vector<16x32xf32>
    %20 = arith.subf %7, %19 : vector<16x32xf32>
    %cst_11 = arith.constant 9.99999974E-6 : f32
    %21 = vector.broadcast %cst_11 : f32 to vector<16x1xf32>
    %22 = arith.addf %18, %21 : vector<16x1xf32>
    %23 = math.rsqrt %22 : vector<16x1xf32>
    %24 = vector.broadcast %23 : vector<16x1xf32> to vector<16x32xf32>
    %25 = arith.mulf %20, %24 : vector<16x32xf32>
    %c0_12 = arith.constant 0 : index
    %c0_13 = arith.constant 0 : index
    %26 = vector.load %arg5[%c0_12, %c0_13] : memref<1x32xf32, #tpu.memory_space<vmem>>, vector<1x32xf32>
    %27 = vector.broadcast %26 : vector<1x32xf32> to vector<16x32xf32>
    %28 = arith.mulf %25, %27 : vector<16x32xf32>
    %c0_14 = arith.constant 0 : index
    %c0_15 = arith.constant 0 : index
    %29 = vector.load %arg6[%c0_14, %c0_15] : memref<1x32xf32, #tpu.memory_space<vmem>>, vector<1x32xf32>
    %30 = vector.broadcast %29 : vector<1x32xf32> to vector<16x32xf32>
    %31 = arith.addf %28, %30 : vector<16x32xf32>
    %c0_16 = arith.constant 0 : index
    %c0_17 = arith.constant 0 : index
    %32 = vector.load %arg7[%c0_16, %c0_17] : memref<16x32xf32, #tpu.memory_space<vmem>>, vector<16x32xf32>
    tpu.vector_store %arg7[%c0_16, %c0_17], %31 {strides = array<i32>} : memref<16x32xf32, #tpu.memory_space<vmem>>, vector<16x32xf32>,
    return
  }
  func.func @transform_0(%arg0: i32) -> (i32, i32) {
    %c0_i32 = arith.constant 0 : i32
    %c0_i32_0 = arith.constant 0 : i32
    return %arg0, %c0_i32 : i32, i32
  }
  func.func @transform_1(%arg0: i32) -> (i32, i32) {
    %c0_i32 = arith.constant 0 : i32
    %c0_i32_0 = arith.constant 0 : i32
    return %arg0, %c0_i32 : i32, i32
  }
  func.func @transform_2(%arg0: i32) -> (i32, i32) {
    %c0_i32 = arith.constant 0 : i32
    %c0_i32_0 = arith.constant 0 : i32
    %c0_i32_1 = arith.constant 0 : i32
    return %c0_i32, %c0_i32_0 : i32, i32
  }
  func.func @transform_3(%arg0: i32) -> (i32, i32) {
    %c0_i32 = arith.constant 0 : i32
    %c0_i32_0 = arith.constant 0 : i32
    %c0_i32_1 = arith.constant 0 : i32
    return %c0_i32, %c0_i32_0 : i32, i32
  }
  func.func @transform_4(%arg0: i32) -> (i32, i32) {
    %c0_i32 = arith.constant 0 : i32
    %c0_i32_0 = arith.constant 0 : i32
    %c0_i32_1 = arith.constant 0 : i32
    return %c0_i32, %c0_i32_0 : i32, i32
  }
  func.func @transform_5(%arg0: i32) -> (i32, i32) {
    %c0_i32 = arith.constant 0 : i32
    %c0_i32_0 = arith.constant 0 : i32
    %c0_i32_1 = arith.constant 0 : i32
    return %c0_i32, %c0_i32_0 : i32, i32
  }
  func.func @transform_6(%arg0: i32) -> (i32, i32) {
    %c0_i32 = arith.constant 0 : i32
    %c0_i32_0 = arith.constant 0 : i32
    return %arg0, %c0_i32 : i32, i32
  }
}

module attributes {stable_mosaic.version = 11 : i64} {
  func.func @_linear_kernel(%arg0: i32, %arg1: memref<16x32xf32, #tpu.memory_space<vmem>>, %arg2: memref<32x32xf32, #tpu.memory_space<vmem>>, %arg3: memref<1x32xf32, #tpu.memory_space<vmem>>, %arg4: memref<16x32xf32, #tpu.memory_space<vmem>>) attributes {dimension_semantics = [#tpu.dimension_semantics<parallel>], iteration_bounds = array<i64: 1>, scalar_prefetch = 0 : i64, scratch_operands = 0 : i64, tpu.core_type = #tpu.core_type<tc>, window_params = [{transform_indices = @transform_0, window_bounds = array<i64: 16, 32>}, {pipeline_mode = #tpu.pipeline_mode<synchronous>, transform_indices = @transform_1, window_bounds = array<i64: 32, 32>}, {pipeline_mode = #tpu.pipeline_mode<synchronous>, transform_indices = @transform_2, window_bounds = array<i64: 1, 32>}, {transform_indices = @transform_3, window_bounds = array<i64: 16, 32>}]} {
    %c0 = arith.constant 0 : index
    %c0_0 = arith.constant 0 : index
    %0 = vector.load %arg1[%c0, %c0_0] : memref<16x32xf32, #tpu.memory_space<vmem>>, vector<16x32xf32>
    %c0_1 = arith.constant 0 : index
    %c0_2 = arith.constant 0 : index
    %1 = vector.load %arg2[%c0_1, %c0_2] : memref<32x32xf32, #tpu.memory_space<vmem>>, vector<32x32xf32>
    %cst = arith.constant dense<0.000000e+00> : vector<16x32xf32>
    %2 = tpu.matmul %0, %1, %cst {dimension_numbers = #tpu.dot_dimension_numbers<[1], [0], [0], [1], [0, 0, 1, 1], [], []>} : vector<16x32xf32>, vector<32x32xf32>, vector<16x32xf32> -> vector<16x32xf32>
    %c0_3 = arith.constant 0 : index
    %c0_4 = arith.constant 0 : index
    %3 = vector.load %arg3[%c0_3, %c0_4] : memref<1x32xf32, #tpu.memory_space<vmem>>, vector<1x32xf32>
    %4 = vector.broadcast %3 : vector<1x32xf32> to vector<16x32xf32>
    %5 = arith.addf %2, %4 : vector<16x32xf32>
    %c0_5 = arith.constant 0 : index
    %c0_6 = arith.constant 0 : index
    %6 = vector.load %arg4[%c0_5, %c0_6] : memref<16x32xf32, #tpu.memory_space<vmem>>, vector<16x32xf32>
    tpu.vector_store %arg4[%c0_5, %c0_6], %5 {strides = array<i32>} : memref<16x32xf32, #tpu.memory_space<vmem>>, vector<16x32xf32>,
    return
  }
  func.func @transform_0(%arg0: i32) -> (i32, i32) {
    %c0_i32 = arith.constant 0 : i32
    %c0_i32_0 = arith.constant 0 : i32
    return %arg0, %c0_i32 : i32, i32
  }
  func.func @transform_1(%arg0: i32) -> (i32, i32) {
    %c0_i32 = arith.constant 0 : i32
    %c0_i32_0 = arith.constant 0 : i32
    %c0_i32_1 = arith.constant 0 : i32
    return %c0_i32, %c0_i32_0 : i32, i32
  }
  func.func @transform_2(%arg0: i32) -> (i32, i32) {
    %c0_i32 = arith.constant 0 : i32
    %c0_i32_0 = arith.constant 0 : i32
    %c0_i32_1 = arith.constant 0 : i32
    return %c0_i32, %c0_i32_0 : i32, i32
  }
  func.func @transform_3(%arg0: i32) -> (i32, i32) {
    %c0_i32 = arith.constant 0 : i32
    %c0_i32_0 = arith.constant 0 : i32
    return %arg0, %c0_i32 : i32, i32
  }
}

module attributes {stable_mosaic.version = 11 : i64} {
  func.func @_linear_kernel(%arg0: i32, %arg1: memref<16x32xf32, #tpu.memory_space<vmem>>, %arg2: memref<32x64xf32, #tpu.memory_space<vmem>>, %arg3: memref<1x64xf32, #tpu.memory_space<vmem>>, %arg4: memref<16x64xf32, #tpu.memory_space<vmem>>) attributes {dimension_semantics = [#tpu.dimension_semantics<parallel>], iteration_bounds = array<i64: 1>, scalar_prefetch = 0 : i64, scratch_operands = 0 : i64, tpu.core_type = #tpu.core_type<tc>, window_params = [{transform_indices = @transform_0, window_bounds = array<i64: 16, 32>}, {pipeline_mode = #tpu.pipeline_mode<synchronous>, transform_indices = @transform_1, window_bounds = array<i64: 32, 64>}, {pipeline_mode = #tpu.pipeline_mode<synchronous>, transform_indices = @transform_2, window_bounds = array<i64: 1, 64>}, {transform_indices = @transform_3, window_bounds = array<i64: 16, 64>}]} {
    %c0 = arith.constant 0 : index
    %c0_0 = arith.constant 0 : index
    %0 = vector.load %arg1[%c0, %c0_0] : memref<16x32xf32, #tpu.memory_space<vmem>>, vector<16x32xf32>
    %c0_1 = arith.constant 0 : index
    %c0_2 = arith.constant 0 : index
    %1 = vector.load %arg2[%c0_1, %c0_2] : memref<32x64xf32, #tpu.memory_space<vmem>>, vector<32x64xf32>
    %cst = arith.constant dense<0.000000e+00> : vector<16x64xf32>
    %2 = tpu.matmul %0, %1, %cst {dimension_numbers = #tpu.dot_dimension_numbers<[1], [0], [0], [1], [0, 0, 1, 1], [], []>} : vector<16x32xf32>, vector<32x64xf32>, vector<16x64xf32> -> vector<16x64xf32>
    %c0_3 = arith.constant 0 : index
    %c0_4 = arith.constant 0 : index
    %3 = vector.load %arg3[%c0_3, %c0_4] : memref<1x64xf32, #tpu.memory_space<vmem>>, vector<1x64xf32>
    %4 = vector.broadcast %3 : vector<1x64xf32> to vector<16x64xf32>
    %5 = arith.addf %2, %4 : vector<16x64xf32>
    %c0_5 = arith.constant 0 : index
    %c0_6 = arith.constant 0 : index
    %6 = vector.load %arg4[%c0_5, %c0_6] : memref<16x64xf32, #tpu.memory_space<vmem>>, vector<16x64xf32>
    tpu.vector_store %arg4[%c0_5, %c0_6], %5 {strides = array<i32>} : memref<16x64xf32, #tpu.memory_space<vmem>>, vector<16x64xf32>,
    return
  }
  func.func @transform_0(%arg0: i32) -> (i32, i32) {
    %c0_i32 = arith.constant 0 : i32
    %c0_i32_0 = arith.constant 0 : i32
    return %arg0, %c0_i32 : i32, i32
  }
  func.func @transform_1(%arg0: i32) -> (i32, i32) {
    %c0_i32 = arith.constant 0 : i32
    %c0_i32_0 = arith.constant 0 : i32
    %c0_i32_1 = arith.constant 0 : i32
    return %c0_i32, %c0_i32_0 : i32, i32
  }
  func.func @transform_2(%arg0: i32) -> (i32, i32) {
    %c0_i32 = arith.constant 0 : i32
    %c0_i32_0 = arith.constant 0 : i32
    %c0_i32_1 = arith.constant 0 : i32
    return %c0_i32, %c0_i32_0 : i32, i32
  }
  func.func @transform_3(%arg0: i32) -> (i32, i32) {
    %c0_i32 = arith.constant 0 : i32
    %c0_i32_0 = arith.constant 0 : i32
    return %arg0, %c0_i32 : i32, i32
  }
}

module attributes {stable_mosaic.version = 11 : i64} {
  func.func @_linear_kernel(%arg0: i32, %arg1: memref<16x16xf32, #tpu.memory_space<vmem>>, %arg2: memref<16x32xf32, #tpu.memory_space<vmem>>, %arg3: memref<1x32xf32, #tpu.memory_space<vmem>>, %arg4: memref<16x32xf32, #tpu.memory_space<vmem>>) attributes {dimension_semantics = [#tpu.dimension_semantics<parallel>], iteration_bounds = array<i64: 1>, scalar_prefetch = 0 : i64, scratch_operands = 0 : i64, tpu.core_type = #tpu.core_type<tc>, window_params = [{transform_indices = @transform_0, window_bounds = array<i64: 16, 16>}, {pipeline_mode = #tpu.pipeline_mode<synchronous>, transform_indices = @transform_1, window_bounds = array<i64: 16, 32>}, {pipeline_mode = #tpu.pipeline_mode<synchronous>, transform_indices = @transform_2, window_bounds = array<i64: 1, 32>}, {transform_indices = @transform_3, window_bounds = array<i64: 16, 32>}]} {
    %c0 = arith.constant 0 : index
    %c0_0 = arith.constant 0 : index
    %0 = vector.load %arg1[%c0, %c0_0] : memref<16x16xf32, #tpu.memory_space<vmem>>, vector<16x16xf32>
    %c0_1 = arith.constant 0 : index
    %c0_2 = arith.constant 0 : index
    %1 = vector.load %arg2[%c0_1, %c0_2] : memref<16x32xf32, #tpu.memory_space<vmem>>, vector<16x32xf32>
    %cst = arith.constant dense<0.000000e+00> : vector<16x32xf32>
    %2 = tpu.matmul %0, %1, %cst {dimension_numbers = #tpu.dot_dimension_numbers<[1], [0], [0], [1], [0, 0, 1, 1], [], []>} : vector<16x16xf32>, vector<16x32xf32>, vector<16x32xf32> -> vector<16x32xf32>
    %c0_3 = arith.constant 0 : index
    %c0_4 = arith.constant 0 : index
    %3 = vector.load %arg3[%c0_3, %c0_4] : memref<1x32xf32, #tpu.memory_space<vmem>>, vector<1x32xf32>
    %4 = vector.broadcast %3 : vector<1x32xf32> to vector<16x32xf32>
    %5 = arith.addf %2, %4 : vector<16x32xf32>
    %c0_5 = arith.constant 0 : index
    %c0_6 = arith.constant 0 : index
    %6 = vector.load %arg4[%c0_5, %c0_6] : memref<16x32xf32, #tpu.memory_space<vmem>>, vector<16x32xf32>
    tpu.vector_store %arg4[%c0_5, %c0_6], %5 {strides = array<i32>} : memref<16x32xf32, #tpu.memory_space<vmem>>, vector<16x32xf32>,
    return
  }
  func.func @transform_0(%arg0: i32) -> (i32, i32) {
    %c0_i32 = arith.constant 0 : i32
    %c0_i32_0 = arith.constant 0 : i32
    return %arg0, %c0_i32 : i32, i32
  }
  func.func @transform_1(%arg0: i32) -> (i32, i32) {
    %c0_i32 = arith.constant 0 : i32
    %c0_i32_0 = arith.constant 0 : i32
    %c0_i32_1 = arith.constant 0 : i32
    return %c0_i32, %c0_i32_0 : i32, i32
  }
  func.func @transform_2(%arg0: i32) -> (i32, i32) {
    %c0_i32 = arith.constant 0 : i32
    %c0_i32_0 = arith.constant 0 : i32
    %c0_i32_1 = arith.constant 0 : i32
    return %c0_i32, %c0_i32_0 : i32, i32
  }
  func.func @transform_3(%arg0: i32) -> (i32, i32) {
    %c0_i32 = arith.constant 0 : i32
    %c0_i32_0 = arith.constant 0 : i32
    return %arg0, %c0_i32 : i32, i32
  }
}

module attributes {stable_mosaic.version = 11 : i64} {
  func.func @kernel(%arg0: i32, %arg1: memref<1x8x32xf32, #tpu.memory_space<vmem>>, %arg2: memref<1x8x64xf32, #tpu.memory_space<vmem>>, %arg3: memref<1x8x32xf32, #tpu.memory_space<vmem>>) attributes {dimension_semantics = [#tpu.dimension_semantics<parallel>], iteration_bounds = array<i64: 2>, scalar_prefetch = 0 : i64, scratch_operands = 0 : i64, tpu.core_type = #tpu.core_type<tc>, window_params = [{transform_indices = @transform_0, window_bounds = array<i64: 1, 8, 32>}, {transform_indices = @transform_1, window_bounds = array<i64: 1, 8, 64>}, {transform_indices = @transform_2, window_bounds = array<i64: 1, 8, 32>}]} {
    %c0 = arith.constant 0 : index
    %c0_0 = arith.constant 0 : index
    %c0_1 = arith.constant 0 : index
    %0 = vector.load %arg2[%c0, %c0_0, %c0_1] : memref<1x8x64xf32, #tpu.memory_space<vmem>>, vector<1x8x64xf32>
    %1 = vector.shape_cast %0 : vector<1x8x64xf32> to vector<8x64xf32>
    %c0_2 = arith.constant 0 : index
    %c0_3 = arith.constant 0 : index
    %c0_4 = arith.constant 0 : index
    %2 = vector.load %arg1[%c0_2, %c0_3, %c0_4] : memref<1x8x32xf32, #tpu.memory_space<vmem>>, vector<1x8x32xf32>
    %3 = vector.shape_cast %2 : vector<1x8x32xf32> to vector<8x32xf32>
    %4 = vector.extract_strided_slice %1 {offsets = [0, 0], sizes = [8, 32], strides = [1, 1]} : vector<8x64xf32> to vector<8x32xf32>
    %5 = vector.extract_strided_slice %1 {offsets = [0, 32], sizes = [8, 32], strides = [1, 1]} : vector<8x64xf32> to vector<8x32xf32>
    %6 = vector.extract_strided_slice %3 {offsets = [0, 0], sizes = [8, 8], strides = [1, 1]} : vector<8x32xf32> to vector<8x8xf32>
    %7 = vector.extract_strided_slice %4 {offsets = [0, 0], sizes = [8, 8], strides = [1, 1]} : vector<8x32xf32> to vector<8x8xf32>
    %8 = vector.extract_strided_slice %5 {offsets = [0, 0], sizes = [8, 8], strides = [1, 1]} : vector<8x32xf32> to vector<8x8xf32>
    %cst = arith.constant dense<0.000000e+00> : vector<8x8xf32>
    %9 = tpu.matmul %6, %7, %cst {dimension_numbers = #tpu.dot_dimension_numbers<[1], [1], [0], [0], [0, 0, 1, 0], [], []>} : vector<8x8xf32>, vector<8x8xf32>, vector<8x8xf32> -> vector<8x8xf32>
    %cst_5 = arith.constant 0.353553385 : f32
    %10 = vector.broadcast %cst_5 : f32 to vector<8x8xf32>
    %11 = arith.mulf %9, %10 : vector<8x8xf32>
    %cst_6 = arith.constant dense<0xFF800000> : vector<8xf32>
    %12 = vector.multi_reduction <maximumf>, %11, %cst_6 [1] : vector<8x8xf32> to vector<8xf32>
    %13 = vector.shape_cast %12 : vector<8xf32> to vector<8x1xf32>
    %14 = vector.broadcast %13 : vector<8x1xf32> to vector<8x8xf32>
    %15 = arith.subf %11, %14 : vector<8x8xf32>
    %16 = math.exp %15 : vector<8x8xf32>
    %cst_7 = arith.constant dense<0.000000e+00> : vector<8xf32>
    %17 = vector.multi_reduction <add>, %16, %cst_7 [1] : vector<8x8xf32> to vector<8xf32>
    %18 = vector.shape_cast %17 : vector<8xf32> to vector<8x1xf32>
    %19 = tpu.reciprocal %18 {approx = true} : vector<8x1xf32> -> vector<8x1xf32>
    %20 = vector.broadcast %19 : vector<8x1xf32> to vector<8x8xf32>
    %21 = arith.mulf %16, %20 : vector<8x8xf32>
    %cst_8 = arith.constant dense<0.000000e+00> : vector<8x8xf32>
    %22 = tpu.matmul %21, %8, %cst_8 {dimension_numbers = #tpu.dot_dimension_numbers<[1], [0], [0], [1], [0, 0, 1, 1], [], []>} : vector<8x8xf32>, vector<8x8xf32>, vector<8x8xf32> -> vector<8x8xf32>
    %23 = vector.extract_strided_slice %3 {offsets = [0, 8], sizes = [8, 8], strides = [1, 1]} : vector<8x32xf32> to vector<8x8xf32>
    %24 = vector.extract_strided_slice %4 {offsets = [0, 8], sizes = [8, 8], strides = [1, 1]} : vector<8x32xf32> to vector<8x8xf32>
    %25 = vector.extract_strided_slice %5 {offsets = [0, 8], sizes = [8, 8], strides = [1, 1]} : vector<8x32xf32> to vector<8x8xf32>
    %cst_9 = arith.constant dense<0.000000e+00> : vector<8x8xf32>
    %26 = tpu.matmul %23, %24, %cst_9 {dimension_numbers = #tpu.dot_dimension_numbers<[1], [1], [0], [0], [0, 0, 1, 0], [], []>} : vector<8x8xf32>, vector<8x8xf32>, vector<8x8xf32> -> vector<8x8xf32>
    %cst_10 = arith.constant 0.353553385 : f32
    %27 = vector.broadcast %cst_10 : f32 to vector<8x8xf32>
    %28 = arith.mulf %26, %27 : vector<8x8xf32>
    %cst_11 = arith.constant dense<0xFF800000> : vector<8xf32>
    %29 = vector.multi_reduction <maximumf>, %28, %cst_11 [1] : vector<8x8xf32> to vector<8xf32>
    %30 = vector.shape_cast %29 : vector<8xf32> to vector<8x1xf32>
    %31 = vector.broadcast %30 : vector<8x1xf32> to vector<8x8xf32>
    %32 = arith.subf %28, %31 : vector<8x8xf32>
    %33 = math.exp %32 : vector<8x8xf32>
    %cst_12 = arith.constant dense<0.000000e+00> : vector<8xf32>
    %34 = vector.multi_reduction <add>, %33, %cst_12 [1] : vector<8x8xf32> to vector<8xf32>
    %35 = vector.shape_cast %34 : vector<8xf32> to vector<8x1xf32>
    %36 = tpu.reciprocal %35 {approx = true} : vector<8x1xf32> -> vector<8x1xf32>
    %37 = vector.broadcast %36 : vector<8x1xf32> to vector<8x8xf32>
    %38 = arith.mulf %33, %37 : vector<8x8xf32>
    %cst_13 = arith.constant dense<0.000000e+00> : vector<8x8xf32>
    %39 = tpu.matmul %38, %25, %cst_13 {dimension_numbers = #tpu.dot_dimension_numbers<[1], [0], [0], [1], [0, 0, 1, 1], [], []>} : vector<8x8xf32>, vector<8x8xf32>, vector<8x8xf32> -> vector<8x8xf32>
    %40 = vector.extract_strided_slice %3 {offsets = [0, 16], sizes = [8, 8], strides = [1, 1]} : vector<8x32xf32> to vector<8x8xf32>
    %41 = vector.extract_strided_slice %4 {offsets = [0, 16], sizes = [8, 8], strides = [1, 1]} : vector<8x32xf32> to vector<8x8xf32>
    %42 = vector.extract_strided_slice %5 {offsets = [0, 16], sizes = [8, 8], strides = [1, 1]} : vector<8x32xf32> to vector<8x8xf32>
    %cst_14 = arith.constant dense<0.000000e+00> : vector<8x8xf32>
    %43 = tpu.matmul %40, %41, %cst_14 {dimension_numbers = #tpu.dot_dimension_numbers<[1], [1], [0], [0], [0, 0, 1, 0], [], []>} : vector<8x8xf32>, vector<8x8xf32>, vector<8x8xf32> -> vector<8x8xf32>
    %cst_15 = arith.constant 0.353553385 : f32
    %44 = vector.broadcast %cst_15 : f32 to vector<8x8xf32>
    %45 = arith.mulf %43, %44 : vector<8x8xf32>
    %cst_16 = arith.constant dense<0xFF800000> : vector<8xf32>
    %46 = vector.multi_reduction <maximumf>, %45, %cst_16 [1] : vector<8x8xf32> to vector<8xf32>
    %47 = vector.shape_cast %46 : vector<8xf32> to vector<8x1xf32>
    %48 = vector.broadcast %47 : vector<8x1xf32> to vector<8x8xf32>
    %49 = arith.subf %45, %48 : vector<8x8xf32>
    %50 = math.exp %49 : vector<8x8xf32>
    %cst_17 = arith.constant dense<0.000000e+00> : vector<8xf32>
    %51 = vector.multi_reduction <add>, %50, %cst_17 [1] : vector<8x8xf32> to vector<8xf32>
    %52 = vector.shape_cast %51 : vector<8xf32> to vector<8x1xf32>
    %53 = tpu.reciprocal %52 {approx = true} : vector<8x1xf32> -> vector<8x1xf32>
    %54 = vector.broadcast %53 : vector<8x1xf32> to vector<8x8xf32>
    %55 = arith.mulf %50, %54 : vector<8x8xf32>
    %cst_18 = arith.constant dense<0.000000e+00> : vector<8x8xf32>
    %56 = tpu.matmul %55, %42, %cst_18 {dimension_numbers = #tpu.dot_dimension_numbers<[1], [0], [0], [1], [0, 0, 1, 1], [], []>} : vector<8x8xf32>, vector<8x8xf32>, vector<8x8xf32> -> vector<8x8xf32>
    %57 = vector.extract_strided_slice %3 {offsets = [0, 24], sizes = [8, 8], strides = [1, 1]} : vector<8x32xf32> to vector<8x8xf32>
    %58 = vector.extract_strided_slice %4 {offsets = [0, 24], sizes = [8, 8], strides = [1, 1]} : vector<8x32xf32> to vector<8x8xf32>
    %59 = vector.extract_strided_slice %5 {offsets = [0, 24], sizes = [8, 8], strides = [1, 1]} : vector<8x32xf32> to vector<8x8xf32>
    %cst_19 = arith.constant dense<0.000000e+00> : vector<8x8xf32>
    %60 = tpu.matmul %57, %58, %cst_19 {dimension_numbers = #tpu.dot_dimension_numbers<[1], [1], [0], [0], [0, 0, 1, 0], [], []>} : vector<8x8xf32>, vector<8x8xf32>, vector<8x8xf32> -> vector<8x8xf32>
    %cst_20 = arith.constant 0.353553385 : f32
    %61 = vector.broadcast %cst_20 : f32 to vector<8x8xf32>
    %62 = arith.mulf %60, %61 : vector<8x8xf32>
    %cst_21 = arith.constant dense<0xFF800000> : vector<8xf32>
    %63 = vector.multi_reduction <maximumf>, %62, %cst_21 [1] : vector<8x8xf32> to vector<8xf32>
    %64 = vector.shape_cast %63 : vector<8xf32> to vector<8x1xf32>
    %65 = vector.broadcast %64 : vector<8x1xf32> to vector<8x8xf32>
    %66 = arith.subf %62, %65 : vector<8x8xf32>
    %67 = math.exp %66 : vector<8x8xf32>
    %cst_22 = arith.constant dense<0.000000e+00> : vector<8xf32>
    %68 = vector.multi_reduction <add>, %67, %cst_22 [1] : vector<8x8xf32> to vector<8xf32>
    %69 = vector.shape_cast %68 : vector<8xf32> to vector<8x1xf32>
    %70 = tpu.reciprocal %69 {approx = true} : vector<8x1xf32> -> vector<8x1xf32>
    %71 = vector.broadcast %70 : vector<8x1xf32> to vector<8x8xf32>
    %72 = arith.mulf %67, %71 : vector<8x8xf32>
    %cst_23 = arith.constant dense<0.000000e+00> : vector<8x8xf32>
    %73 = tpu.matmul %72, %59, %cst_23 {dimension_numbers = #tpu.dot_dimension_numbers<[1], [0], [0], [1], [0, 0, 1, 1], [], []>} : vector<8x8xf32>, vector<8x8xf32>, vector<8x8xf32> -> vector<8x8xf32>
    %74 = tpu.concatenate %22, %39, %56, %73 in 1 : vector<8x8xf32>, vector<8x8xf32>, vector<8x8xf32>, vector<8x8xf32> -> vector<8x32xf32>
    %c0_24 = arith.constant 0 : index
    %c0_25 = arith.constant 0 : index
    %c0_26 = arith.constant 0 : index
    %75 = vector.load %arg3[%c0_24, %c0_25, %c0_26] : memref<1x8x32xf32, #tpu.memory_space<vmem>>, vector<1x8x32xf32>
    %76 = vector.shape_cast %75 : vector<1x8x32xf32> to vector<8x32xf32>
    %77 = vector.shape_cast %74 : vector<8x32xf32> to vector<1x8x32xf32>
    tpu.vector_store %arg3[%c0_24, %c0_25, %c0_26], %77 {strides = array<i32>} : memref<1x8x32xf32, #tpu.memory_space<vmem>>, vector<1x8x32xf32>,
    return
  }
  func.func @transform_0(%arg0: i32) -> (i32, i32, i32) {
    %c0_i32 = arith.constant 0 : i32
    %c0_i32_0 = arith.constant 0 : i32
    %c0_i32_1 = arith.constant 0 : i32
    return %arg0, %c0_i32, %c0_i32_0 : i32, i32, i32
  }
  func.func @transform_1(%arg0: i32) -> (i32, i32, i32) {
    %c0_i32 = arith.constant 0 : i32
    %c0_i32_0 = arith.constant 0 : i32
    %c0_i32_1 = arith.constant 0 : i32
    return %arg0, %c0_i32, %c0_i32_0 : i32, i32, i32
  }
  func.func @transform_2(%arg0: i32) -> (i32, i32, i32) {
    %c0_i32 = arith.constant 0 : i32
    %c0_i32_0 = arith.constant 0 : i32
    %c0_i32_1 = arith.constant 0 : i32
    return %arg0, %c0_i32, %c0_i32_0 : i32, i32, i32
  }
}

module attributes {stable_mosaic.version = 11 : i64} {
  func.func @_proj_add_ln_kernel(%arg0: i32, %arg1: memref<16x32xf32, #tpu.memory_space<vmem>>, %arg2: memref<16x32xf32, #tpu.memory_space<vmem>>, %arg3: memref<32x32xf32, #tpu.memory_space<vmem>>, %arg4: memref<1x32xf32, #tpu.memory_space<vmem>>, %arg5: memref<1x32xf32, #tpu.memory_space<vmem>>, %arg6: memref<1x32xf32, #tpu.memory_space<vmem>>, %arg7: memref<16x32xf32, #tpu.memory_space<vmem>>) attributes {dimension_semantics = [#tpu.dimension_semantics<parallel>], iteration_bounds = array<i64: 1>, scalar_prefetch = 0 : i64, scratch_operands = 0 : i64, tpu.core_type = #tpu.core_type<tc>, window_params = [{transform_indices = @transform_0, window_bounds = array<i64: 16, 32>}, {transform_indices = @transform_1, window_bounds = array<i64: 16, 32>}, {pipeline_mode = #tpu.pipeline_mode<synchronous>, transform_indices = @transform_2, window_bounds = array<i64: 32, 32>}, {pipeline_mode = #tpu.pipeline_mode<synchronous>, transform_indices = @transform_3, window_bounds = array<i64: 1, 32>}, {pipeline_mode = #tpu.pipeline_mode<synchronous>, transform_indices = @transform_4, window_bounds = array<i64: 1, 32>}, {pipeline_mode = #tpu.pipeline_mode<synchronous>, transform_indices = @transform_5, window_bounds = array<i64: 1, 32>}, {transform_indices = @transform_6, window_bounds = array<i64: 16, 32>}]} {
    %c0 = arith.constant 0 : index
    %c0_0 = arith.constant 0 : index
    %0 = vector.load %arg1[%c0, %c0_0] : memref<16x32xf32, #tpu.memory_space<vmem>>, vector<16x32xf32>
    %c0_1 = arith.constant 0 : index
    %c0_2 = arith.constant 0 : index
    %1 = vector.load %arg3[%c0_1, %c0_2] : memref<32x32xf32, #tpu.memory_space<vmem>>, vector<32x32xf32>
    %cst = arith.constant dense<0.000000e+00> : vector<16x32xf32>
    %2 = tpu.matmul %0, %1, %cst {dimension_numbers = #tpu.dot_dimension_numbers<[1], [0], [0], [1], [0, 0, 1, 1], [], []>} : vector<16x32xf32>, vector<32x32xf32>, vector<16x32xf32> -> vector<16x32xf32>
    %c0_3 = arith.constant 0 : index
    %c0_4 = arith.constant 0 : index
    %3 = vector.load %arg4[%c0_3, %c0_4] : memref<1x32xf32, #tpu.memory_space<vmem>>, vector<1x32xf32>
    %4 = vector.broadcast %3 : vector<1x32xf32> to vector<16x32xf32>
    %5 = arith.addf %2, %4 : vector<16x32xf32>
    %c0_5 = arith.constant 0 : index
    %c0_6 = arith.constant 0 : index
    %6 = vector.load %arg2[%c0_5, %c0_6] : memref<16x32xf32, #tpu.memory_space<vmem>>, vector<16x32xf32>
    %7 = arith.addf %5, %6 : vector<16x32xf32>
    %cst_7 = arith.constant dense<0.000000e+00> : vector<16xf32>
    %8 = vector.multi_reduction <add>, %7, %cst_7 [1] : vector<16x32xf32> to vector<16xf32>
    %9 = vector.shape_cast %8 : vector<16xf32> to vector<16x1xf32>
    %cst_8 = arith.constant 3.200000e+01 : f32
    %10 = vector.broadcast %cst_8 : f32 to vector<16x1xf32>
    %11 = arith.divf %9, %10 : vector<16x1xf32>
    %12 = vector.broadcast %11 : vector<16x1xf32> to vector<16x32xf32>
    %13 = arith.subf %7, %12 : vector<16x32xf32>
    %14 = arith.mulf %13, %13 : vector<16x32xf32>
    %cst_9 = arith.constant dense<0.000000e+00> : vector<16xf32>
    %15 = vector.multi_reduction <add>, %14, %cst_9 [1] : vector<16x32xf32> to vector<16xf32>
    %16 = vector.shape_cast %15 : vector<16xf32> to vector<16x1xf32>
    %cst_10 = arith.constant 3.200000e+01 : f32
    %17 = vector.broadcast %cst_10 : f32 to vector<16x1xf32>
    %18 = arith.divf %16, %17 : vector<16x1xf32>
    %19 = vector.broadcast %11 : vector<16x1xf32> to vector<16x32xf32>
    %20 = arith.subf %7, %19 : vector<16x32xf32>
    %cst_11 = arith.constant 9.99999974E-6 : f32
    %21 = vector.broadcast %cst_11 : f32 to vector<16x1xf32>
    %22 = arith.addf %18, %21 : vector<16x1xf32>
    %23 = math.rsqrt %22 : vector<16x1xf32>
    %24 = vector.broadcast %23 : vector<16x1xf32> to vector<16x32xf32>
    %25 = arith.mulf %20, %24 : vector<16x32xf32>
    %c0_12 = arith.constant 0 : index
    %c0_13 = arith.constant 0 : index
    %26 = vector.load %arg5[%c0_12, %c0_13] : memref<1x32xf32, #tpu.memory_space<vmem>>, vector<1x32xf32>
    %27 = vector.broadcast %26 : vector<1x32xf32> to vector<16x32xf32>
    %28 = arith.mulf %25, %27 : vector<16x32xf32>
    %c0_14 = arith.constant 0 : index
    %c0_15 = arith.constant 0 : index
    %29 = vector.load %arg6[%c0_14, %c0_15] : memref<1x32xf32, #tpu.memory_space<vmem>>, vector<1x32xf32>
    %30 = vector.broadcast %29 : vector<1x32xf32> to vector<16x32xf32>
    %31 = arith.addf %28, %30 : vector<16x32xf32>
    %c0_16 = arith.constant 0 : index
    %c0_17 = arith.constant 0 : index
    %32 = vector.load %arg7[%c0_16, %c0_17] : memref<16x32xf32, #tpu.memory_space<vmem>>, vector<16x32xf32>
    tpu.vector_store %arg7[%c0_16, %c0_17], %31 {strides = array<i32>} : memref<16x32xf32, #tpu.memory_space<vmem>>, vector<16x32xf32>,
    return
  }
  func.func @transform_0(%arg0: i32) -> (i32, i32) {
    %c0_i32 = arith.constant 0 : i32
    %c0_i32_0 = arith.constant 0 : i32
    return %arg0, %c0_i32 : i32, i32
  }
  func.func @transform_1(%arg0: i32) -> (i32, i32) {
    %c0_i32 = arith.constant 0 : i32
    %c0_i32_0 = arith.constant 0 : i32
    return %arg0, %c0_i32 : i32, i32
  }
  func.func @transform_2(%arg0: i32) -> (i32, i32) {
    %c0_i32 = arith.constant 0 : i32
    %c0_i32_0 = arith.constant 0 : i32
    %c0_i32_1 = arith.constant 0 : i32
    return %c0_i32, %c0_i32_0 : i32, i32
  }
  func.func @transform_3(%arg0: i32) -> (i32, i32) {
    %c0_i32 = arith.constant 0 : i32
    %c0_i32_0 = arith.constant 0 : i32
    %c0_i32_1 = arith.constant 0 : i32
    return %c0_i32, %c0_i32_0 : i32, i32
  }
  func.func @transform_4(%arg0: i32) -> (i32, i32) {
    %c0_i32 = arith.constant 0 : i32
    %c0_i32_0 = arith.constant 0 : i32
    %c0_i32_1 = arith.constant 0 : i32
    return %c0_i32, %c0_i32_0 : i32, i32
  }
  func.func @transform_5(%arg0: i32) -> (i32, i32) {
    %c0_i32 = arith.constant 0 : i32
    %c0_i32_0 = arith.constant 0 : i32
    %c0_i32_1 = arith.constant 0 : i32
    return %c0_i32, %c0_i32_0 : i32, i32
  }
  func.func @transform_6(%arg0: i32) -> (i32, i32) {
    %c0_i32 = arith.constant 0 : i32
    %c0_i32_0 = arith.constant 0 : i32
    return %arg0, %c0_i32 : i32, i32
  }
}

module attributes {stable_mosaic.version = 11 : i64} {
  func.func @_ffn_add_ln_kernel(%arg0: i32, %arg1: memref<16x32xf32, #tpu.memory_space<vmem>>, %arg2: memref<32x128xf32, #tpu.memory_space<vmem>>, %arg3: memref<1x128xf32, #tpu.memory_space<vmem>>, %arg4: memref<128x32xf32, #tpu.memory_space<vmem>>, %arg5: memref<1x32xf32, #tpu.memory_space<vmem>>, %arg6: memref<1x32xf32, #tpu.memory_space<vmem>>, %arg7: memref<1x32xf32, #tpu.memory_space<vmem>>, %arg8: memref<16x32xf32, #tpu.memory_space<vmem>>) attributes {dimension_semantics = [#tpu.dimension_semantics<parallel>], iteration_bounds = array<i64: 1>, scalar_prefetch = 0 : i64, scratch_operands = 0 : i64, tpu.core_type = #tpu.core_type<tc>, window_params = [{transform_indices = @transform_0, window_bounds = array<i64: 16, 32>}, {pipeline_mode = #tpu.pipeline_mode<synchronous>, transform_indices = @transform_1, window_bounds = array<i64: 32, 128>}, {pipeline_mode = #tpu.pipeline_mode<synchronous>, transform_indices = @transform_2, window_bounds = array<i64: 1, 128>}, {pipeline_mode = #tpu.pipeline_mode<synchronous>, transform_indices = @transform_3, window_bounds = array<i64: 128, 32>}, {pipeline_mode = #tpu.pipeline_mode<synchronous>, transform_indices = @transform_4, window_bounds = array<i64: 1, 32>}, {pipeline_mode = #tpu.pipeline_mode<synchronous>, transform_indices = @transform_5, window_bounds = array<i64: 1, 32>}, {pipeline_mode = #tpu.pipeline_mode<synchronous>, transform_indices = @transform_6, window_bounds = array<i64: 1, 32>}, {transform_indices = @transform_7, window_bounds = array<i64: 16, 32>}]} {
    %c0 = arith.constant 0 : index
    %c0_0 = arith.constant 0 : index
    %0 = vector.load %arg1[%c0, %c0_0] : memref<16x32xf32, #tpu.memory_space<vmem>>, vector<16x32xf32>
    %c0_1 = arith.constant 0 : index
    %c0_2 = arith.constant 0 : index
    %1 = vector.load %arg2[%c0_1, %c0_2] : memref<32x128xf32, #tpu.memory_space<vmem>>, vector<32x128xf32>
    %cst = arith.constant dense<0.000000e+00> : vector<16x128xf32>
    %2 = tpu.matmul %0, %1, %cst {dimension_numbers = #tpu.dot_dimension_numbers<[1], [0], [0], [1], [0, 0, 1, 1], [], []>} : vector<16x32xf32>, vector<32x128xf32>, vector<16x128xf32> -> vector<16x128xf32>
    %c0_3 = arith.constant 0 : index
    %c0_4 = arith.constant 0 : index
    %3 = vector.load %arg3[%c0_3, %c0_4] : memref<1x128xf32, #tpu.memory_space<vmem>>, vector<1x128xf32>
    %4 = vector.broadcast %3 : vector<1x128xf32> to vector<16x128xf32>
    %5 = arith.addf %2, %4 : vector<16x128xf32>
    %cst_5 = arith.constant 0.000000e+00 : f32
    %6 = vector.broadcast %cst_5 : f32 to vector<16x128xf32>
    %7 = arith.maximumf %5, %6 : vector<16x128xf32>
    %c0_6 = arith.constant 0 : index
    %c0_7 = arith.constant 0 : index
    %8 = vector.load %arg4[%c0_6, %c0_7] : memref<128x32xf32, #tpu.memory_space<vmem>>, vector<128x32xf32>
    %cst_8 = arith.constant dense<0.000000e+00> : vector<16x32xf32>
    %9 = tpu.matmul %7, %8, %cst_8 {dimension_numbers = #tpu.dot_dimension_numbers<[1], [0], [0], [1], [0, 0, 1, 1], [], []>} : vector<16x128xf32>, vector<128x32xf32>, vector<16x32xf32> -> vector<16x32xf32>
    %c0_9 = arith.constant 0 : index
    %c0_10 = arith.constant 0 : index
    %10 = vector.load %arg5[%c0_9, %c0_10] : memref<1x32xf32, #tpu.memory_space<vmem>>, vector<1x32xf32>
    %11 = vector.broadcast %10 : vector<1x32xf32> to vector<16x32xf32>
    %12 = arith.addf %9, %11 : vector<16x32xf32>
    %13 = arith.addf %12, %0 : vector<16x32xf32>
    %cst_11 = arith.constant dense<0.000000e+00> : vector<16xf32>
    %14 = vector.multi_reduction <add>, %13, %cst_11 [1] : vector<16x32xf32> to vector<16xf32>
    %15 = vector.shape_cast %14 : vector<16xf32> to vector<16x1xf32>
    %cst_12 = arith.constant 3.200000e+01 : f32
    %16 = vector.broadcast %cst_12 : f32 to vector<16x1xf32>
    %17 = arith.divf %15, %16 : vector<16x1xf32>
    %18 = vector.broadcast %17 : vector<16x1xf32> to vector<16x32xf32>
    %19 = arith.subf %13, %18 : vector<16x32xf32>
    %20 = arith.mulf %19, %19 : vector<16x32xf32>
    %cst_13 = arith.constant dense<0.000000e+00> : vector<16xf32>
    %21 = vector.multi_reduction <add>, %20, %cst_13 [1] : vector<16x32xf32> to vector<16xf32>
    %22 = vector.shape_cast %21 : vector<16xf32> to vector<16x1xf32>
    %cst_14 = arith.constant 3.200000e+01 : f32
    %23 = vector.broadcast %cst_14 : f32 to vector<16x1xf32>
    %24 = arith.divf %22, %23 : vector<16x1xf32>
    %25 = vector.broadcast %17 : vector<16x1xf32> to vector<16x32xf32>
    %26 = arith.subf %13, %25 : vector<16x32xf32>
    %cst_15 = arith.constant 9.99999974E-6 : f32
    %27 = vector.broadcast %cst_15 : f32 to vector<16x1xf32>
    %28 = arith.addf %24, %27 : vector<16x1xf32>
    %29 = math.rsqrt %28 : vector<16x1xf32>
    %30 = vector.broadcast %29 : vector<16x1xf32> to vector<16x32xf32>
    %31 = arith.mulf %26, %30 : vector<16x32xf32>
    %c0_16 = arith.constant 0 : index
    %c0_17 = arith.constant 0 : index
    %32 = vector.load %arg6[%c0_16, %c0_17] : memref<1x32xf32, #tpu.memory_space<vmem>>, vector<1x32xf32>
    %33 = vector.broadcast %32 : vector<1x32xf32> to vector<16x32xf32>
    %34 = arith.mulf %31, %33 : vector<16x32xf32>
    %c0_18 = arith.constant 0 : index
    %c0_19 = arith.constant 0 : index
    %35 = vector.load %arg7[%c0_18, %c0_19] : memref<1x32xf32, #tpu.memory_space<vmem>>, vector<1x32xf32>
    %36 = vector.broadcast %35 : vector<1x32xf32> to vector<16x32xf32>
    %37 = arith.addf %34, %36 : vector<16x32xf32>
    %c0_20 = arith.constant 0 : index
    %c0_21 = arith.constant 0 : index
    %38 = vector.load %arg8[%c0_20, %c0_21] : memref<16x32xf32, #tpu.memory_space<vmem>>, vector<16x32xf32>
    tpu.vector_store %arg8[%c0_20, %c0_21], %37 {strides = array<i32>} : memref<16x32xf32, #tpu.memory_space<vmem>>, vector<16x32xf32>,
    return
  }
  func.func @transform_0(%arg0: i32) -> (i32, i32) {
    %c0_i32 = arith.constant 0 : i32
    %c0_i32_0 = arith.constant 0 : i32
    return %arg0, %c0_i32 : i32, i32
  }
  func.func @transform_1(%arg0: i32) -> (i32, i32) {
    %c0_i32 = arith.constant 0 : i32
    %c0_i32_0 = arith.constant 0 : i32
    %c0_i32_1 = arith.constant 0 : i32
    return %c0_i32, %c0_i32_0 : i32, i32
  }
  func.func @transform_2(%arg0: i32) -> (i32, i32) {
    %c0_i32 = arith.constant 0 : i32
    %c0_i32_0 = arith.constant 0 : i32
    %c0_i32_1 = arith.constant 0 : i32
    return %c0_i32, %c0_i32_0 : i32, i32
  }
  func.func @transform_3(%arg0: i32) -> (i32, i32) {
    %c0_i32 = arith.constant 0 : i32
    %c0_i32_0 = arith.constant 0 : i32
    %c0_i32_1 = arith.constant 0 : i32
    return %c0_i32, %c0_i32_0 : i32, i32
  }
  func.func @transform_4(%arg0: i32) -> (i32, i32) {
    %c0_i32 = arith.constant 0 : i32
    %c0_i32_0 = arith.constant 0 : i32
    %c0_i32_1 = arith.constant 0 : i32
    return %c0_i32, %c0_i32_0 : i32, i32
  }
  func.func @transform_5(%arg0: i32) -> (i32, i32) {
    %c0_i32 = arith.constant 0 : i32
    %c0_i32_0 = arith.constant 0 : i32
    %c0_i32_1 = arith.constant 0 : i32
    return %c0_i32, %c0_i32_0 : i32, i32
  }
  func.func @transform_6(%arg0: i32) -> (i32, i32) {
    %c0_i32 = arith.constant 0 : i32
    %c0_i32_0 = arith.constant 0 : i32
    %c0_i32_1 = arith.constant 0 : i32
    return %c0_i32, %c0_i32_0 : i32, i32
  }
  func.func @transform_7(%arg0: i32) -> (i32, i32) {
    %c0_i32 = arith.constant 0 : i32
    %c0_i32_0 = arith.constant 0 : i32
    return %arg0, %c0_i32 : i32, i32
  }
}

module attributes {stable_mosaic.version = 11 : i64} {
  func.func @_linear_kernel(%arg0: i32, %arg1: memref<16x32xf32, #tpu.memory_space<vmem>>, %arg2: memref<32x32xf32, #tpu.memory_space<vmem>>, %arg3: memref<1x32xf32, #tpu.memory_space<vmem>>, %arg4: memref<16x32xf32, #tpu.memory_space<vmem>>) attributes {dimension_semantics = [#tpu.dimension_semantics<parallel>], iteration_bounds = array<i64: 1>, scalar_prefetch = 0 : i64, scratch_operands = 0 : i64, tpu.core_type = #tpu.core_type<tc>, window_params = [{transform_indices = @transform_0, window_bounds = array<i64: 16, 32>}, {pipeline_mode = #tpu.pipeline_mode<synchronous>, transform_indices = @transform_1, window_bounds = array<i64: 32, 32>}, {pipeline_mode = #tpu.pipeline_mode<synchronous>, transform_indices = @transform_2, window_bounds = array<i64: 1, 32>}, {transform_indices = @transform_3, window_bounds = array<i64: 16, 32>}]} {
    %c0 = arith.constant 0 : index
    %c0_0 = arith.constant 0 : index
    %0 = vector.load %arg1[%c0, %c0_0] : memref<16x32xf32, #tpu.memory_space<vmem>>, vector<16x32xf32>
    %c0_1 = arith.constant 0 : index
    %c0_2 = arith.constant 0 : index
    %1 = vector.load %arg2[%c0_1, %c0_2] : memref<32x32xf32, #tpu.memory_space<vmem>>, vector<32x32xf32>
    %cst = arith.constant dense<0.000000e+00> : vector<16x32xf32>
    %2 = tpu.matmul %0, %1, %cst {dimension_numbers = #tpu.dot_dimension_numbers<[1], [0], [0], [1], [0, 0, 1, 1], [], []>} : vector<16x32xf32>, vector<32x32xf32>, vector<16x32xf32> -> vector<16x32xf32>
    %c0_3 = arith.constant 0 : index
    %c0_4 = arith.constant 0 : index
    %3 = vector.load %arg3[%c0_3, %c0_4] : memref<1x32xf32, #tpu.memory_space<vmem>>, vector<1x32xf32>
    %4 = vector.broadcast %3 : vector<1x32xf32> to vector<16x32xf32>
    %5 = arith.addf %2, %4 : vector<16x32xf32>
    %c0_5 = arith.constant 0 : index
    %c0_6 = arith.constant 0 : index
    %6 = vector.load %arg4[%c0_5, %c0_6] : memref<16x32xf32, #tpu.memory_space<vmem>>, vector<16x32xf32>
    tpu.vector_store %arg4[%c0_5, %c0_6], %5 {strides = array<i32>} : memref<16x32xf32, #tpu.memory_space<vmem>>, vector<16x32xf32>,
    return
  }
  func.func @transform_0(%arg0: i32) -> (i32, i32) {
    %c0_i32 = arith.constant 0 : i32
    %c0_i32_0 = arith.constant 0 : i32
    return %arg0, %c0_i32 : i32, i32
  }
  func.func @transform_1(%arg0: i32) -> (i32, i32) {
    %c0_i32 = arith.constant 0 : i32
    %c0_i32_0 = arith.constant 0 : i32
    %c0_i32_1 = arith.constant 0 : i32
    return %c0_i32, %c0_i32_0 : i32, i32
  }
  func.func @transform_2(%arg0: i32) -> (i32, i32) {
    %c0_i32 = arith.constant 0 : i32
    %c0_i32_0 = arith.constant 0 : i32
    %c0_i32_1 = arith.constant 0 : i32
    return %c0_i32, %c0_i32_0 : i32, i32
  }
  func.func @transform_3(%arg0: i32) -> (i32, i32) {
    %c0_i32 = arith.constant 0 : i32
    %c0_i32_0 = arith.constant 0 : i32
    return %arg0, %c0_i32 : i32, i32
  }
}

module attributes {stable_mosaic.version = 11 : i64} {
  func.func @_linear_kernel(%arg0: i32, %arg1: memref<16x32xf32, #tpu.memory_space<vmem>>, %arg2: memref<32x64xf32, #tpu.memory_space<vmem>>, %arg3: memref<1x64xf32, #tpu.memory_space<vmem>>, %arg4: memref<16x64xf32, #tpu.memory_space<vmem>>) attributes {dimension_semantics = [#tpu.dimension_semantics<parallel>], iteration_bounds = array<i64: 1>, scalar_prefetch = 0 : i64, scratch_operands = 0 : i64, tpu.core_type = #tpu.core_type<tc>, window_params = [{transform_indices = @transform_0, window_bounds = array<i64: 16, 32>}, {pipeline_mode = #tpu.pipeline_mode<synchronous>, transform_indices = @transform_1, window_bounds = array<i64: 32, 64>}, {pipeline_mode = #tpu.pipeline_mode<synchronous>, transform_indices = @transform_2, window_bounds = array<i64: 1, 64>}, {transform_indices = @transform_3, window_bounds = array<i64: 16, 64>}]} {
    %c0 = arith.constant 0 : index
    %c0_0 = arith.constant 0 : index
    %0 = vector.load %arg1[%c0, %c0_0] : memref<16x32xf32, #tpu.memory_space<vmem>>, vector<16x32xf32>
    %c0_1 = arith.constant 0 : index
    %c0_2 = arith.constant 0 : index
    %1 = vector.load %arg2[%c0_1, %c0_2] : memref<32x64xf32, #tpu.memory_space<vmem>>, vector<32x64xf32>
    %cst = arith.constant dense<0.000000e+00> : vector<16x64xf32>
    %2 = tpu.matmul %0, %1, %cst {dimension_numbers = #tpu.dot_dimension_numbers<[1], [0], [0], [1], [0, 0, 1, 1], [], []>} : vector<16x32xf32>, vector<32x64xf32>, vector<16x64xf32> -> vector<16x64xf32>
    %c0_3 = arith.constant 0 : index
    %c0_4 = arith.constant 0 : index
    %3 = vector.load %arg3[%c0_3, %c0_4] : memref<1x64xf32, #tpu.memory_space<vmem>>, vector<1x64xf32>
    %4 = vector.broadcast %3 : vector<1x64xf32> to vector<16x64xf32>
    %5 = arith.addf %2, %4 : vector<16x64xf32>
    %c0_5 = arith.constant 0 : index
    %c0_6 = arith.constant 0 : index
    %6 = vector.load %arg4[%c0_5, %c0_6] : memref<16x64xf32, #tpu.memory_space<vmem>>, vector<16x64xf32>
    tpu.vector_store %arg4[%c0_5, %c0_6], %5 {strides = array<i32>} : memref<16x64xf32, #tpu.memory_space<vmem>>, vector<16x64xf32>,
    return
  }
  func.func @transform_0(%arg0: i32) -> (i32, i32) {
    %c0_i32 = arith.constant 0 : i32
    %c0_i32_0 = arith.constant 0 : i32
    return %arg0, %c0_i32 : i32, i32
  }
  func.func @transform_1(%arg0: i32) -> (i32, i32) {
    %c0_i32 = arith.constant 0 : i32
    %c0_i32_0 = arith.constant 0 : i32
    %c0_i32_1 = arith.constant 0 : i32
    return %c0_i32, %c0_i32_0 : i32, i32
  }
  func.func @transform_2(%arg0: i32) -> (i32, i32) {
    %c0_i32 = arith.constant 0 : i32
    %c0_i32_0 = arith.constant 0 : i32
    %c0_i32_1 = arith.constant 0 : i32
    return %c0_i32, %c0_i32_0 : i32, i32
  }
  func.func @transform_3(%arg0: i32) -> (i32, i32) {
    %c0_i32 = arith.constant 0 : i32
    %c0_i32_0 = arith.constant 0 : i32
    return %arg0, %c0_i32 : i32, i32
  }
}

module attributes {stable_mosaic.version = 11 : i64} {
  func.func @_proj_add_ln_kernel(%arg0: i32, %arg1: memref<16x32xf32, #tpu.memory_space<vmem>>, %arg2: memref<16x32xf32, #tpu.memory_space<vmem>>, %arg3: memref<32x32xf32, #tpu.memory_space<vmem>>, %arg4: memref<1x32xf32, #tpu.memory_space<vmem>>, %arg5: memref<1x32xf32, #tpu.memory_space<vmem>>, %arg6: memref<1x32xf32, #tpu.memory_space<vmem>>, %arg7: memref<16x32xf32, #tpu.memory_space<vmem>>) attributes {dimension_semantics = [#tpu.dimension_semantics<parallel>], iteration_bounds = array<i64: 1>, scalar_prefetch = 0 : i64, scratch_operands = 0 : i64, tpu.core_type = #tpu.core_type<tc>, window_params = [{transform_indices = @transform_0, window_bounds = array<i64: 16, 32>}, {transform_indices = @transform_1, window_bounds = array<i64: 16, 32>}, {pipeline_mode = #tpu.pipeline_mode<synchronous>, transform_indices = @transform_2, window_bounds = array<i64: 32, 32>}, {pipeline_mode = #tpu.pipeline_mode<synchronous>, transform_indices = @transform_3, window_bounds = array<i64: 1, 32>}, {pipeline_mode = #tpu.pipeline_mode<synchronous>, transform_indices = @transform_4, window_bounds = array<i64: 1, 32>}, {pipeline_mode = #tpu.pipeline_mode<synchronous>, transform_indices = @transform_5, window_bounds = array<i64: 1, 32>}, {transform_indices = @transform_6, window_bounds = array<i64: 16, 32>}]} {
    %c0 = arith.constant 0 : index
    %c0_0 = arith.constant 0 : index
    %0 = vector.load %arg1[%c0, %c0_0] : memref<16x32xf32, #tpu.memory_space<vmem>>, vector<16x32xf32>
    %c0_1 = arith.constant 0 : index
    %c0_2 = arith.constant 0 : index
    %1 = vector.load %arg3[%c0_1, %c0_2] : memref<32x32xf32, #tpu.memory_space<vmem>>, vector<32x32xf32>
    %cst = arith.constant dense<0.000000e+00> : vector<16x32xf32>
    %2 = tpu.matmul %0, %1, %cst {dimension_numbers = #tpu.dot_dimension_numbers<[1], [0], [0], [1], [0, 0, 1, 1], [], []>} : vector<16x32xf32>, vector<32x32xf32>, vector<16x32xf32> -> vector<16x32xf32>
    %c0_3 = arith.constant 0 : index
    %c0_4 = arith.constant 0 : index
    %3 = vector.load %arg4[%c0_3, %c0_4] : memref<1x32xf32, #tpu.memory_space<vmem>>, vector<1x32xf32>
    %4 = vector.broadcast %3 : vector<1x32xf32> to vector<16x32xf32>
    %5 = arith.addf %2, %4 : vector<16x32xf32>
    %c0_5 = arith.constant 0 : index
    %c0_6 = arith.constant 0 : index
    %6 = vector.load %arg2[%c0_5, %c0_6] : memref<16x32xf32, #tpu.memory_space<vmem>>, vector<16x32xf32>
    %7 = arith.addf %5, %6 : vector<16x32xf32>
    %cst_7 = arith.constant dense<0.000000e+00> : vector<16xf32>
    %8 = vector.multi_reduction <add>, %7, %cst_7 [1] : vector<16x32xf32> to vector<16xf32>
    %9 = vector.shape_cast %8 : vector<16xf32> to vector<16x1xf32>
    %cst_8 = arith.constant 3.200000e+01 : f32
    %10 = vector.broadcast %cst_8 : f32 to vector<16x1xf32>
    %11 = arith.divf %9, %10 : vector<16x1xf32>
    %12 = vector.broadcast %11 : vector<16x1xf32> to vector<16x32xf32>
    %13 = arith.subf %7, %12 : vector<16x32xf32>
    %14 = arith.mulf %13, %13 : vector<16x32xf32>
    %cst_9 = arith.constant dense<0.000000e+00> : vector<16xf32>
    %15 = vector.multi_reduction <add>, %14, %cst_9 [1] : vector<16x32xf32> to vector<16xf32>
    %16 = vector.shape_cast %15 : vector<16xf32> to vector<16x1xf32>
    %cst_10 = arith.constant 3.200000e+01 : f32
    %17 = vector.broadcast %cst_10 : f32 to vector<16x1xf32>
    %18 = arith.divf %16, %17 : vector<16x1xf32>
    %19 = vector.broadcast %11 : vector<16x1xf32> to vector<16x32xf32>
    %20 = arith.subf %7, %19 : vector<16x32xf32>
    %cst_11 = arith.constant 9.99999974E-6 : f32
    %21 = vector.broadcast %cst_11 : f32 to vector<16x1xf32>
    %22 = arith.addf %18, %21 : vector<16x1xf32>
    %23 = math.rsqrt %22 : vector<16x1xf32>
    %24 = vector.broadcast %23 : vector<16x1xf32> to vector<16x32xf32>
    %25 = arith.mulf %20, %24 : vector<16x32xf32>
    %c0_12 = arith.constant 0 : index
    %c0_13 = arith.constant 0 : index
    %26 = vector.load %arg5[%c0_12, %c0_13] : memref<1x32xf32, #tpu.memory_space<vmem>>, vector<1x32xf32>
    %27 = vector.broadcast %26 : vector<1x32xf32> to vector<16x32xf32>
    %28 = arith.mulf %25, %27 : vector<16x32xf32>
    %c0_14 = arith.constant 0 : index
    %c0_15 = arith.constant 0 : index
    %29 = vector.load %arg6[%c0_14, %c0_15] : memref<1x32xf32, #tpu.memory_space<vmem>>, vector<1x32xf32>
    %30 = vector.broadcast %29 : vector<1x32xf32> to vector<16x32xf32>
    %31 = arith.addf %28, %30 : vector<16x32xf32>
    %c0_16 = arith.constant 0 : index
    %c0_17 = arith.constant 0 : index
    %32 = vector.load %arg7[%c0_16, %c0_17] : memref<16x32xf32, #tpu.memory_space<vmem>>, vector<16x32xf32>
    tpu.vector_store %arg7[%c0_16, %c0_17], %31 {strides = array<i32>} : memref<16x32xf32, #tpu.memory_space<vmem>>, vector<16x32xf32>,
    return
  }
  func.func @transform_0(%arg0: i32) -> (i32, i32) {
    %c0_i32 = arith.constant 0 : i32
    %c0_i32_0 = arith.constant 0 : i32
    return %arg0, %c0_i32 : i32, i32
  }
  func.func @transform_1(%arg0: i32) -> (i32, i32) {
    %c0_i32 = arith.constant 0 : i32
    %c0_i32_0 = arith.constant 0 : i32
    return %arg0, %c0_i32 : i32, i32
  }
  func.func @transform_2(%arg0: i32) -> (i32, i32) {
    %c0_i32 = arith.constant 0 : i32
    %c0_i32_0 = arith.constant 0 : i32
    %c0_i32_1 = arith.constant 0 : i32
    return %c0_i32, %c0_i32_0 : i32, i32
  }
  func.func @transform_3(%arg0: i32) -> (i32, i32) {
    %c0_i32 = arith.constant 0 : i32
    %c0_i32_0 = arith.constant 0 : i32
    %c0_i32_1 = arith.constant 0 : i32
    return %c0_i32, %c0_i32_0 : i32, i32
  }
  func.func @transform_4(%arg0: i32) -> (i32, i32) {
    %c0_i32 = arith.constant 0 : i32
    %c0_i32_0 = arith.constant 0 : i32
    %c0_i32_1 = arith.constant 0 : i32
    return %c0_i32, %c0_i32_0 : i32, i32
  }
  func.func @transform_5(%arg0: i32) -> (i32, i32) {
    %c0_i32 = arith.constant 0 : i32
    %c0_i32_0 = arith.constant 0 : i32
    %c0_i32_1 = arith.constant 0 : i32
    return %c0_i32, %c0_i32_0 : i32, i32
  }
  func.func @transform_6(%arg0: i32) -> (i32, i32) {
    %c0_i32 = arith.constant 0 : i32
    %c0_i32_0 = arith.constant 0 : i32
    return %arg0, %c0_i32 : i32, i32
  }
}

module attributes {stable_mosaic.version = 11 : i64} {
  func.func @_linear_kernel(%arg0: i32, %arg1: memref<16x32xf32, #tpu.memory_space<vmem>>, %arg2: memref<32x128xf32, #tpu.memory_space<vmem>>, %arg3: memref<1x128xf32, #tpu.memory_space<vmem>>, %arg4: memref<16x128xf32, #tpu.memory_space<vmem>>) attributes {dimension_semantics = [#tpu.dimension_semantics<parallel>], iteration_bounds = array<i64: 1>, scalar_prefetch = 0 : i64, scratch_operands = 0 : i64, tpu.core_type = #tpu.core_type<tc>, window_params = [{transform_indices = @transform_0, window_bounds = array<i64: 16, 32>}, {pipeline_mode = #tpu.pipeline_mode<synchronous>, transform_indices = @transform_1, window_bounds = array<i64: 32, 128>}, {pipeline_mode = #tpu.pipeline_mode<synchronous>, transform_indices = @transform_2, window_bounds = array<i64: 1, 128>}, {transform_indices = @transform_3, window_bounds = array<i64: 16, 128>}]} {
    %c0 = arith.constant 0 : index
    %c0_0 = arith.constant 0 : index
    %0 = vector.load %arg1[%c0, %c0_0] : memref<16x32xf32, #tpu.memory_space<vmem>>, vector<16x32xf32>
    %c0_1 = arith.constant 0 : index
    %c0_2 = arith.constant 0 : index
    %1 = vector.load %arg2[%c0_1, %c0_2] : memref<32x128xf32, #tpu.memory_space<vmem>>, vector<32x128xf32>
    %cst = arith.constant dense<0.000000e+00> : vector<16x128xf32>
    %2 = tpu.matmul %0, %1, %cst {dimension_numbers = #tpu.dot_dimension_numbers<[1], [0], [0], [1], [0, 0, 1, 1], [], []>} : vector<16x32xf32>, vector<32x128xf32>, vector<16x128xf32> -> vector<16x128xf32>
    %c0_3 = arith.constant 0 : index
    %c0_4 = arith.constant 0 : index
    %3 = vector.load %arg3[%c0_3, %c0_4] : memref<1x128xf32, #tpu.memory_space<vmem>>, vector<1x128xf32>
    %4 = vector.broadcast %3 : vector<1x128xf32> to vector<16x128xf32>
    %5 = arith.addf %2, %4 : vector<16x128xf32>
    %c0_5 = arith.constant 0 : index
    %c0_6 = arith.constant 0 : index
    %6 = vector.load %arg4[%c0_5, %c0_6] : memref<16x128xf32, #tpu.memory_space<vmem>>, vector<16x128xf32>
    tpu.vector_store %arg4[%c0_5, %c0_6], %5 {strides = array<i32>} : memref<16x128xf32, #tpu.memory_space<vmem>>, vector<16x128xf32>,
    return
  }
  func.func @transform_0(%arg0: i32) -> (i32, i32) {
    %c0_i32 = arith.constant 0 : i32
    %c0_i32_0 = arith.constant 0 : i32
    return %arg0, %c0_i32 : i32, i32
  }
  func.func @transform_1(%arg0: i32) -> (i32, i32) {
    %c0_i32 = arith.constant 0 : i32
    %c0_i32_0 = arith.constant 0 : i32
    %c0_i32_1 = arith.constant 0 : i32
    return %c0_i32, %c0_i32_0 : i32, i32
  }
  func.func @transform_2(%arg0: i32) -> (i32, i32) {
    %c0_i32 = arith.constant 0 : i32
    %c0_i32_0 = arith.constant 0 : i32
    %c0_i32_1 = arith.constant 0 : i32
    return %c0_i32, %c0_i32_0 : i32, i32
  }
  func.func @transform_3(%arg0: i32) -> (i32, i32) {
    %c0_i32 = arith.constant 0 : i32
    %c0_i32_0 = arith.constant 0 : i32
    return %arg0, %c0_i32 : i32, i32
  }
}

</mosaic_0001>

<bundles_post_ra>
// kernel: jammer_transformer_decoder.21
= control target key start
LH: loop header
LB: loop body
LE: loop exit
PB: predicated region body
PF: predicated region fallthrough
CT: control target
= control target key end

     0   :  { %vm24_vm0 = vcmask 261120   ;;  %vm54_vm1 = vcmask 785408   ;;  %s115_s1 = inlined_call_operand.vmem [shape: f32[32,96], index: 1, kind: input, shape index: {}]   ;;  %s116_s2 = inlined_call_operand.vmem [shape: f32[1,96], index: 2, kind: input, shape index: {}]   ;;  %s117_s0 = inlined_call_operand.vmem [shape: f32[16,32], index: 0, kind: input, shape index: {}]   ;;  %s118_s3 = inlined_call_operand.vmem [shape: f32[16,96], index: 3, kind: output, shape index: {}]  }
   0x1   :  { %v19_v0 = vld [vmem:[%s115_s1 + $0x18] sm:$0xff]  ;;  %v18_v1 = vld [vmem:[%s115_s1 + $0x10] sm:$0xff]  ;;  %v17_v2 = vld [vmem:[%s115_s1 + $0x8] sm:$0xff] }
   0x2   :  { %43 = vmatpush.msra.mxu0 %v19_v0  ;;  %63 = vmatpush.msra.mxu1 %v19_v0  ;;  %v16_v3 = vld [vmem:[%s115_s1] sm:$0xff]  ;;  %v15_v5 = vld [vmem:[%s117_s0 + $0x8] sm:$0xff] }
   0x3   :  { %v14_v4 = vld [vmem:[%s117_s0] sm:$0xff] }
   0x4   :  { %44 = vmatpush.msra.mxu0 %v18_v1  ;;  %64 = vmatpush.msra.mxu1 %v18_v1  ;;  %v67_v6 = vld [vmem:[%s116_s2] ss:$0 sm:$0xff] }
   0x6   :  { %45 = vmatpush.msra.mxu0 %v17_v2  ;;  %65 = vmatpush.msra.mxu1 %v17_v2 }
   0x8   :  { %46 = vmatpush.msra.mxu0 %v16_v3  ;;  %66 = vmatpush.msra.mxu1 %v16_v3 }
   0x9   :  { %61 = vmatmul.msk.f32.vlgmr.msra.gmra.mxu0 %vm24_vm0, %v14_v4  ;;  %62 = vmatmul.msk.f32.vlgmr.msra.gmra.mxu1 %vm24_vm0, %v15_v5 }
  0x86   :  { %v48_v7 = vpop.f32.mrf.mxu0  ;;  %v51_v8 = vpop.f32.mrf.mxu1 }
  0x87   :  { %v49_v9 = vadd.f32 %v67_v6, %v48_v7  ;;  %v52_v10 = vadd.f32 %v67_v6, %v51_v8 }
  0x89   :  { %55 = vst.msk [vmem:[%s118_s3] sm:$0xff] %vm54_vm1, %v49_v9 }
  0x8a   :  { %56 = vst.msk [vmem:[%s118_s3 + $0x8] sm:$0xff] %vm54_vm1, %v52_v10 }

// kernel: jammer_transformer_decoder.19
= control target key start
LH: loop header
LB: loop body
LE: loop exit
PB: predicated region body
PF: predicated region fallthrough
CT: control target
= control target key end

     0   :  { %vm28_vm0 = vcmask 1045504   ;;  %vm21_vm1 = vcmask 48128   ;;  %vm55_vm2 = vcmask 261120   ;;  %s105_s1 = inlined_call_operand.vmem [shape: f32[6,32], index: 1, kind: input, shape index: {}]   ;;  %s106_s0 = inlined_call_operand.vmem [shape: f32[16,6], index: 0, kind: input, shape index: {}]   ;;  %s107_s2 = inlined_call_operand.vmem [shape: f32[1,32], index: 2, kind: input, shape index: {}]   ;;  %s108_s3 = inlined_call_operand.vmem [shape: f32[16,32], index: 3, kind: output, shape index: {}]  }
   0x1   :  { %v16_v0 = vld [vmem:[%s105_s1] sm:$0x3f]  ;;  %v15_v2 = vld [vmem:[%s106_s0 + $0x8] sm:$0xff] }
   0x2   :  { %v14_v1 = vld [vmem:[%s106_s0] sm:$0xff]  ;;  %62 = vmatpush.msk.msra.mxu0 %vm28_vm0, %v16_v0  ;;  %65 = vmatpush.msk.msra.mxu1 %vm28_vm0, %v16_v0 }
   0x3   :  { %63 = vmatmul.msk.f32.vlgmr.msra.gmra.mxu0 %vm21_vm1, %v14_v1  ;;  %64 = vmatmul.msk.f32.vlgmr.msra.gmra.mxu1 %vm21_vm1, %v15_v2  ;;  %v66_v3 = vld [vmem:[%s107_s2] ss:$0 sm:$0xff] }
  0x80   :  { %v49_v4 = vpop.f32.mrf.mxu0  ;;  %v52_v5 = vpop.f32.mrf.mxu1 }
  0x81   :  { %v50_v6 = vadd.f32 %v66_v3, %v49_v4  ;;  %v53_v7 = vadd.f32 %v66_v3, %v52_v5 }
  0x83   :  { %56 = vst.msk [vmem:[%s108_s3] sm:$0xff] %vm55_vm2, %v50_v6 }
  0x84   :  { %57 = vst.msk [vmem:[%s108_s3 + $0x8] sm:$0xff] %vm55_vm2, %v53_v7 }

// kernel: jammer_transformer_decoder.22
= control target key start
LH: loop header
LB: loop body
LE: loop exit
PB: predicated region body
PF: predicated region fallthrough
CT: control target
= control target key end

     0   :  { %s577_s9 = smov 0   ;;  %s642_s0 = inlined_call_operand.vmem [shape: f32[2,8,96], index: 0, kind: input, shape index: {}]   ;;  %s643_s1 = inlined_call_operand.vmem [shape: f32[8,8], index: 1, kind: input, shape index: {}]   ;;  %s644_s2 = inlined_call_operand.vmem [shape: f32[2,8,32], index: 2, kind: output, shape index: {}]  }
   0x1 LB: > { %s481_s10 = sadd.s32 4294967295, %s546_s9   ;;  %p485_p0 = scmp.ge.s32.totalorder %s546_s9, 1  ;;  %s546_s9 = sphi %s577_s9, %s12_s9  }
   0x2   : > { %p111_p1 = scmp.lt.s32.totalorder %s546_s9, 3 }
   0x4   : > { %p112_p2 = pnand %p485_p0, %p111_p1 }
   0x5   : > { %p131_p3 = scmp.lt.s32.totalorder (!%p112_p2), %s481_s10, 1  ;;  %s548_s15 = smov (!%p112_p2), 96  }
   0x6   : > { %115 = sbr.rel (%p112_p2) target bundleno = 1178 (0x49a), region = 28  ;;  %s549_s16 = smov (!%p112_p2), 88  }
   0x7   : > { %s550_s17 = smov (!%p112_p2), 120   ;;  %s551_s20 = smov (!%p112_p2), 64  }
   0x8   : > { %s552_s21 = smov (!%p112_p2), 80   ;;  %s553_s22 = smov (!%p112_p2), 72  }
   0x9   : > { %s554_s23 = smov (!%p112_p2), 112   ;;  %s555_s24 = smov (!%p112_p2), 104  }
   0xa   : > { %s556_s25 = smov (!%p112_p2), 48   ;;  %s557_s26 = smov (!%p112_p2), 56  }
   0xb   : > { %s646_s10 = smov (!%p131_p3, %s481_s10), 1  ;;  %vm144_vm0 = vcmask 64512   ;;  %v140_v5 = vld [vmem:[%s643_s1] sm:$0xff]  ;;  %s558_s27 = smov 40   ;;  %vm422_vm1 = vcmask 130048   ;;  %vm424_vm2 = vcmask 195584  }
   0xc   : > { %s486_s11 = sshll.u32 %s646_s10, 3  ;;  %s559_s28 = smov 24   ;;  %vm426_vm3 = vcmask 261120  }
   0xd   : > { %s134_s14 = scalar_lea.vmem %s642_s0, %s486_s11  ;;  %s560_s29 = smov 8  }
   0xe   : > { %v593_v0 = vld [vmem:[%s134_s14] sm:$0xff]  ;;  %s561_s30 = smov 16   ;;  %s138_s5 = scalar_lea.vmem %s644_s2, %s486_s11 }
   0xf   : > { %142 = vrot.lane.b32.xlu0 %v593_v0, %s548_s15  ;;  %210 = vrot.lane.b32.xlu1 %v593_v0, %s549_s16 }
  0x10   : > { %208 = vrot.lane.b32.xlu2 %v593_v0, %s550_s17 }
  0x18   : > { %182 = vrot.lane.b32.xlu2 %v593_v0, %s551_s20 }
  0x20   : > { %277 = vrot.lane.b32.xlu2 %v593_v0, %s552_s21 }
  0x28   : > { %344 = vrot.lane.b32.xlu2 %v593_v0, %s553_s22 }
  0x30   : > { %275 = vrot.lane.b32.xlu2 %v593_v0, %s554_s23 }
  0x6a   : > { %v209_v3 = vpop.permute.xlu2 %208 }
  0x72   : > { %v183_v12 = vpop.permute.xlu2 %182 }
  0x73   : > { %203 = vmatpush.msra.mxu1 %v183_v12 }
  0x7a   : > { %v278_v17 = vpop.permute.xlu2 %277 }
  0x7b   : > { %494 = vmatpush.xpose.msk.msrb.mxu1 %vm144_vm0, %v278_v17 }
  0x81   : > { %v143_v1 = vpop.permute.xlu0 %142  ;;  %v211_v2 = vpop.permute.xlu1 %210 }
  0x82   : > { %488 = vmatpush.xpose.msk.msra.mxu0 %vm144_vm0, %v143_v1  ;;  %491 = vmatpush.xpose.msk.msra.mxu2 %vm144_vm0, %v211_v2  ;;  %v345_v20 = vpop.permute.xlu2 %344 }
  0x85   : > { %489 = vmatmul.msk.f32.vlgmr.msra.gmra.mxu0 %vm144_vm0, %v593_v0  ;;  %492 = vmatmul.msk.f32.vlgmr.msra.gmra.mxu2 %vm144_vm0, %v209_v3 }
  0x86   : > { %497 = vmatpush.xpose.msk.msrb.mxu0 %vm144_vm0, %v345_v20 }
  0x8a   : > { %v276_v24 = vpop.permute.xlu2 %275 }
 0x102   : > { %v166_v4 = vpop.f32.mrf.mxu0 }
 0x103   : > { %v169_v6 = vmul.f32 0.35355338, %v166_v4 }
 0x105   : > { %v170_v7 = vadd.f32 %v169_v6, %v140_v5 }
 0x107   : > { %v171_v8 = vsel %vm144_vm0, %v170_v7, -inf }
 0x108   : > { %172 = vmax.xlane.f32.xlu0 %v171_v8  ;;  %v233_v15 = vpop.f32.mrf.mxu2 }
 0x109   : > { %v236_v16 = vmul.f32 0.35355338, %v233_v15 }
 0x10b   : > { %v237_v18 = vadd.f32 %v236_v16, %v140_v5 }
 0x10d   : > { %v238_v19 = vsel %vm144_vm0, %v237_v18, -inf }
 0x10e   : > { %239 = vmax.xlane.f32.xlu2 %v238_v19 }
 0x17b   : > { %v173_v9 = vpop.xlane.xlu0 %172 }
 0x17c   : > { %v174_v10 = vsub.f32 %v170_v7, %v173_v9 }
 0x17e   : > { %v175_v11 = vmul.f32 1.442695, %v174_v10 }
 0x180   : > { %524 = vpow2.f32 %v175_v11 }
 0x181   : > { %v240_v27 = vpop.xlane.xlu2 %239 }
 0x182   : > { %v241_v30 = vsub.f32 %v237_v18, %v240_v27 }
 0x184   : > { %v242_v33 = vmul.f32 1.442695, %v241_v30 }
 0x186   : > { %v525_v13 = vpop.eup %524 }
 0x187   : > { %v177_v14 = vsel %vm144_vm0, %v525_v13, 0.0 }
 0x188   : > { %178 = vadd.xlane.f32.xlu1 %v177_v14 }
 0x1a1   : > { %342 = vrot.lane.b32.xlu1 %v593_v0, %s555_s24 }
 0x1fb   : > { %v179_v21 = vpop.xlane.xlu1 %178 }
 0x1fc   : > { %526 = vrcp.f32 %v179_v21 }
 0x1fd   : > { %528 = vpow2.f32 %v242_v33 }
 0x202   : > { %v527_v22 = vpop.eup %526 }
 0x203   : > { %v181_v23 = vmul.f32 %v527_v22, %v525_v13  ;;  %v529_v38 = vpop.eup %528 }
 0x204   : > { %v244_v39 = vsel %vm144_vm0, %v529_v38, 0.0 }
 0x205   : > { %490 = vmatmul.msk.f32.vlgmr.msra.gmra.mxu1 %vm144_vm0, %v181_v23 }
 0x20d   : > { %495 = vmatmul.msk.f32.vlgmr.msrb.gmra.mxu1 %vm144_vm0, %v276_v24 }
 0x213   : > { %v343_v25 = vpop.permute.xlu1 %342 }
 0x214   : > { %498 = vmatmul.msk.f32.vlgmr.msrb.gmra.mxu0 %vm144_vm0, %v343_v25 }
 0x282   : > { %v619_v26 = vpop.f32.mrf.mxu1 }
 0x28a   : > { %v300_v28 = vpop.f32.mrf.mxu1 }
 0x28b   : > { %v303_v29 = vmul.f32 0.35355338, %v300_v28 }
 0x28d   : > { %v304_v31 = vadd.f32 %v303_v29, %v140_v5 }
 0x28f   : > { %v305_v32 = vsel %vm144_vm0, %v304_v31, -inf }
 0x290   : > { %306 = vmax.xlane.f32.xlu1 %v305_v32 }
 0x291   : > { %v367_v34 = vpop.f32.mrf.mxu0 }
 0x292   : > { %v370_v35 = vmul.f32 0.35355338, %v367_v34 }
 0x294   : > { %v371_v36 = vadd.f32 %v370_v35, %v140_v5 }
 0x296   : > { %v372_v37 = vsel %vm144_vm0, %v371_v36, -inf }
 0x297   : > { %373 = vmax.xlane.f32.xlu0 %v372_v37 }
 0x29f   : > { %245 = vadd.xlane.f32.xlu0 %v244_v39 }
 0x2a9   : > { %316 = vrot.lane.b32.xlu1 %v593_v0, %s556_s25 }
 0x303   : > { %v307_v40 = vpop.xlane.xlu1 %306 }
 0x304   : > { %v308_v41 = vsub.f32 %v304_v31, %v307_v40 }
 0x306   : > { %v309_v42 = vmul.f32 1.442695, %v308_v41 }
 0x308   : > { %530 = vpow2.f32 %v309_v42 }
 0x30a   : > { %v374_v43 = vpop.xlane.xlu0 %373 }
 0x30b   : > { %v375_v44 = vsub.f32 %v371_v36, %v374_v43 }
 0x30d   : > { %v376_v45 = vmul.f32 1.442695, %v375_v44 }
 0x30e   : > { %v531_v46 = vpop.eup %530 }
 0x30f   : > { %532 = vpow2.f32 %v376_v45  ;;  %v311_v47 = vsel %vm144_vm0, %v531_v46, 0.0 }
 0x310   : > { %312 = vadd.xlane.f32.xlu0 %v311_v47 }
 0x312   : > { %v246_v50 = vpop.xlane.xlu0 %245 }
 0x315   : > { %v533_v48 = vpop.eup %532 }
 0x316   : > { %v378_v49 = vsel %vm144_vm0, %v533_v48, 0.0 }
 0x317   : > { %379 = vadd.xlane.f32.xlu2 %v378_v49 }
 0x31b   : > { %v317_v58 = vpop.permute.xlu1 %316 }
 0x324   : > { %249 = vrot.lane.b32.xlu0 %v593_v0, %s557_s26 }
 0x32f   : > { %383 = vrot.lane.b32.xlu2 %v593_v0, %s558_s27 }
 0x383   : > { %v313_v52 = vpop.xlane.xlu0 %312 }
 0x38a   : > { %v380_v51 = vpop.xlane.xlu2 %379 }
 0x38b   : > { %534 = vrcp.f32 %v380_v51 }
 0x38c   : > { %536 = vrcp.f32 %v246_v50 }
 0x38d   : > { %538 = vrcp.f32 %v313_v52 }
 0x391   : > { %v535_v53 = vpop.eup %534 }
 0x392   : > { %v384_v54 = vpop.permute.xlu2 %383  ;;  %v382_v55 = vmul.f32 %v535_v53, %v533_v48  ;;  %v537_v56 = vpop.eup %536 }
 0x393   : > { %404 = vmatpush.msrb.mxu2 %v384_v54  ;;  %v248_v59 = vmul.f32 %v537_v56, %v529_v38  ;;  %v539_v60 = vpop.eup %538 }
 0x394   : > { %499 = vmatmul.msk.f32.vlgmr.msrb.gmra.mxu2 %vm144_vm0, %v382_v55  ;;  %v315_v61 = vmul.f32 %v539_v60, %v531_v46 }
 0x396   : > { %v250_v57 = vpop.permute.xlu0 %249 }
 0x397   : > { %270 = vmatpush.msra.mxu3 %v250_v57 }
 0x398   : > { %493 = vmatmul.msk.f32.vlgmr.msra.gmra.mxu3 %vm144_vm0, %v248_v59 }
 0x399   : > { %337 = vmatpush.msrb.mxu3 %v317_v58 }
 0x3a0   : > { %496 = vmatmul.msk.f32.vlgmr.msrb.gmra.mxu3 %vm144_vm0, %v315_v61 }
 0x417   : > { %v406_v62 = vpop.f32.mrf.mxu2 }
 0x418   : > { %418 = vrot.lane.b32.xlu1 %v406_v62, %s559_s28 }
 0x41b   : > { %v272_v63 = vpop.f32.mrf.mxu3 }
 0x41c   : > { %410 = vrot.lane.b32.xlu0 %v272_v63, %s560_s29 }
 0x423   : > { %v339_v0 = vpop.f32.mrf.mxu3 }
 0x424   : > { %414 = vrot.lane.b32.xlu0 %v339_v0, %s561_s30 }
 0x48a   : > { %v419_v4 = vpop.permute.xlu1 %418 }
 0x48e   : > { %v411_v1 = vpop.permute.xlu0 %410 }
 0x48f   : > { %v421_v2 = vsel %vm144_vm0, %v619_v26, %v411_v1 }
 0x496   : > { %v415_v3 = vpop.permute.xlu0 %414 }
 0x497   : > { %v423_v5 = vsel %vm422_vm1, %v421_v2, %v415_v3 }
 0x498   : > { %v425_v6 = vsel %vm424_vm2, %v423_v5, %v419_v4 }
 0x499   : > { %427 = vst.msk [vmem:[%s138_s5] sm:$0xff] %vm426_vm3, %v425_v6 }
 0x49a PF: > { %s12_s9 = sadd.s32 1, %s546_s9  }
 0x49b   : > { %p9_p4 = scmp.ge.s32.totalorder %s12_s9, 4  }
 0x49d   :  { %11 = sbr.rel (!%p9_p4) target bundleno = 1 (0x1), region = 58 }

// kernel: jammer_transformer_decoder.23
= control target key start
LH: loop header
LB: loop body
LE: loop exit
PB: predicated region body
PF: predicated region fallthrough
CT: control target
= control target key end

     0   :  { %vm33_vm0 = vcmask 261120   ;;  %v152_v17 = vmov 32.0   ;;  %s235_s2 = inlined_call_operand.vmem [shape: f32[32,32], index: 2, kind: input, shape index: {}]   ;;  %s236_s3 = inlined_call_operand.vmem [shape: f32[1,32], index: 3, kind: input, shape index: {}]   ;;  %s237_s0 = inlined_call_operand.vmem [shape: f32[16,32], index: 0, kind: input, shape index: {}]   ;;  %s238_s1 = inlined_call_operand.vmem [shape: f32[16,32], index: 1, kind: input, shape index: {}]   ;;  %s239_s4 = inlined_call_operand.vmem [shape: f32[1,32], index: 4, kind: input, shape index: {}]   ;;  %s240_s5 = inlined_call_operand.vmem [shape: f32[1,32], index: 5, kind: input, shape index: {}]   ;;  %s241_s6 = inlined_call_operand.vmem [shape: f32[16,32], index: 6, kind: output, shape index: {}]  }
   0x1   :  { %v28_v0 = vld [vmem:[%s235_s2 + $0x18] sm:$0xff]  ;;  %v27_v1 = vld [vmem:[%s235_s2 + $0x10] sm:$0xff]  ;;  %v26_v2 = vld [vmem:[%s235_s2 + $0x8] sm:$0xff]  ;;  %146 = vrcp.f32 %v152_v17 }
   0x2   :  { %52 = vmatpush.msra.mxu0 %v28_v0  ;;  %138 = vmatpush.msra.mxu1 %v28_v0  ;;  %v25_v3 = vld [vmem:[%s235_s2] sm:$0xff]  ;;  %v24_v5 = vld [vmem:[%s237_s0 + $0x8] sm:$0xff] }
   0x3   :  { %v23_v4 = vld [vmem:[%s237_s0] sm:$0xff]  ;;  %v64_v13 = vld [vmem:[%s238_s1 + $0x8] sm:$0xff] }
   0x4   :  { %53 = vmatpush.msra.mxu0 %v27_v1  ;;  %139 = vmatpush.msra.mxu1 %v27_v1  ;;  %v143_v6 = vld [vmem:[%s236_s3] ss:$0 sm:$0xff] }
   0x5   :  { %v63_v8 = vld [vmem:[%s238_s1] sm:$0xff] }
   0x6   :  { %54 = vmatpush.msra.mxu0 %v26_v2  ;;  %140 = vmatpush.msra.mxu1 %v26_v2  ;;  %v144_v48 = vld [vmem:[%s239_s4] ss:$0 sm:$0xff] }
   0x7   :  { %v147_v18 = vpop.eup %146  ;;  %v145_v51 = vld [vmem:[%s240_s5] ss:$0 sm:$0xff] }
   0x8   :  { %55 = vmatpush.msra.mxu0 %v25_v3  ;;  %141 = vmatpush.msra.mxu1 %v25_v3  ;;  %v74_v19 = vmul.f32 32.0, %v147_v18  ;;  %vm78_vm1 = vweird.f32 %v147_v18 }
   0x9   :  { %136 = vmatmul.msk.f32.vlgmr.msra.gmra.mxu0 %vm33_vm0, %v23_v4  ;;  %137 = vmatmul.msk.f32.vlgmr.msra.gmra.mxu1 %vm33_vm0, %v24_v5 }
   0xa   :  { %v75_v20 = vsub.f32 1.0, %v74_v19 }
   0xc   :  { %v76_v21 = vmul.f32 %v147_v18, %v75_v20 }
   0xe   :  { %v77_v22 = vadd.f32 %v147_v18, %v76_v21 }
  0x10   :  { %v79_v23 = vsel %vm78_vm1, %v147_v18, %v77_v22 }
  0x86   :  { %v57_v7 = vpop.f32.mrf.mxu0  ;;  %v60_v9 = vpop.f32.mrf.mxu1 }
  0x87   :  { %v58_v10 = vadd.f32 %v143_v6, %v57_v7  ;;  %v61_v12 = vadd.f32 %v143_v6, %v60_v9 }
  0x89   :  { %v65_v11 = vadd.f32 %v63_v8, %v58_v10  ;;  %v66_v15 = vadd.f32 %v64_v13, %v61_v12 }
  0x8b   :  { %v67_v14 = vsel %vm33_vm0, %v65_v11, 0.0  ;;  %v70_v16 = vsel %vm33_vm0, %v66_v15, 0.0 }
  0x8c   :  { %68 = vadd.xlane.f32.xlu0 %v67_v14 }
  0x94   :  { %71 = vadd.xlane.f32.xlu0 %v70_v16 }
  0xff   :  { %v69_v24 = vpop.xlane.xlu0 %68 }
 0x100   :  { %v80_v25 = vmul.f32 %v79_v23, %v69_v24 }
 0x102   :  { %v82_v26 = vsub.f32 %v65_v11, %v80_v25 }
 0x104   :  { %v84_v27 = vmul.f32 %v82_v26, %v82_v26 }
 0x106   :  { %v86_v28 = vsel %vm33_vm0, %v84_v27, 0.0 }
 0x107   :  { %87 = vadd.xlane.f32.xlu1 %v86_v28  ;;  %v72_v29 = vpop.xlane.xlu0 %71 }
 0x108   :  { %v81_v30 = vmul.f32 %v79_v23, %v72_v29 }
 0x10a   :  { %v83_v31 = vsub.f32 %v66_v15, %v81_v30 }
 0x10c   :  { %v85_v32 = vmul.f32 %v83_v31, %v83_v31 }
 0x10e   :  { %v89_v33 = vsel %vm33_vm0, %v85_v32, 0.0 }
 0x10f   :  { %90 = vadd.xlane.f32.xlu1 %v89_v33 }
 0x17a   :  { %v88_v34 = vpop.xlane.xlu1 %87 }
 0x17b   :  { %v92_v35 = vmul.f32 %v88_v34, %v79_v23 }
 0x17d   :  { %v94_v36 = vadd.f32 1e-05, %v92_v35 }
 0x17f   :  { %148 = vrsqrt.f32 %v94_v36  ;;  %vm102_vm3 = vweird.f32 %v94_v36 }
 0x182   :  { %v91_v37 = vpop.xlane.xlu1 %90 }
 0x183   :  { %v93_v38 = vmul.f32 %v91_v37, %v79_v23 }
 0x185   :  { %v149_v39 = vpop.eup %148  ;;  %v95_v40 = vadd.f32 1e-05, %v93_v38 }
 0x186   :  { %v97_v41 = vmul.f32 %v149_v39, %v94_v36  ;;  %vm103_vm2 = vweird.f32 %v149_v39 }
 0x187   :  { %150 = vrsqrt.f32 %v95_v40  ;;  %vm104_vm4 = vmor %vm102_vm3, %vm103_vm2  ;;  %vm112_vm6 = vweird.f32 %v95_v40 }
 0x188   :  { %v98_v42 = vmul.f32 %v149_v39, %v97_v41 }
 0x18a   :  { %v99_v43 = vmul.f32 0.5, %v98_v42 }
 0x18c   :  { %v100_v44 = vsub.f32 1.5, %v99_v43 }
 0x18d   :  { %v151_v45 = vpop.eup %150 }
 0x18e   :  { %v101_v46 = vmul.f32 %v149_v39, %v100_v44  ;;  %v107_v47 = vmul.f32 %v151_v45, %v95_v40  ;;  %vm113_vm5 = vweird.f32 %v151_v45 }
 0x18f   :  { %vm114_vm7 = vmor %vm112_vm6, %vm113_vm5 }
 0x190   :  { %v105_v49 = vsel %vm104_vm4, %v149_v39, %v101_v46  ;;  %v108_v50 = vmul.f32 %v151_v45, %v107_v47 }
 0x191   :  { %v116_v52 = vmul.f32 %v105_v49, %v82_v26 }
 0x192   :  { %v109_v53 = vmul.f32 0.5, %v108_v50 }
 0x193   :  { %v122_v54 = vmul.f32 %v144_v48, %v116_v52 }
 0x194   :  { %v110_v55 = vsub.f32 1.5, %v109_v53 }
 0x195   :  { %v128_v56 = vadd.f32 %v145_v51, %v122_v54 }
 0x196   :  { %v111_v57 = vmul.f32 %v151_v45, %v110_v55 }
 0x197   :  { %130 = vst.msk [vmem:[%s241_s6] sm:$0xff] %vm33_vm0, %v128_v56 }
 0x198   :  { %v115_v58 = vsel %vm114_vm7, %v151_v45, %v111_v57 }
 0x199   :  { %v117_v59 = vmul.f32 %v115_v58, %v83_v31 }
 0x19b   :  { %v123_v60 = vmul.f32 %v144_v48, %v117_v59 }
 0x19d   :  { %v129_v61 = vadd.f32 %v145_v51, %v123_v60 }
 0x19f   :  { %131 = vst.msk [vmem:[%s241_s6 + $0x8] sm:$0xff] %vm33_vm0, %v129_v61 }

// kernel: jammer_transformer_decoder.24
= control target key start
LH: loop header
LB: loop body
LE: loop exit
PB: predicated region body
PF: predicated region fallthrough
CT: control target
= control target key end

     0   :  { %8 = vsyncpa [#allocation3], 0  ;;  %s109_s15 = smov [#allocation2]   ;;  %s157_s0 = inlined_call_operand.vmem [shape: f32[16,32], index: 0, kind: input, shape index: {}]   ;;  %s158_s1 = inlined_call_operand.vmem [shape: f32[32,32], index: 1, kind: input, shape index: {}]   ;;  %s159_s2 = inlined_call_operand.hbm [shape: f32[1,32], index: 2, kind: input, shape index: {}]   ;;  %s160_s3 = inlined_call_operand.vmem [shape: f32[16,32], index: 3, kind: output, shape index: {}]  }
   0x1   :  { %s18_s14 = sshll.u32 %s159_s2, 4  ;;  %s20_s16 = sshll.u32 %s109_s15, 4  ;;  %s19_s14 = int_to_ptr.hbm [resolvable:$true] %s18_s14  ;;  %s21_s16 = int_to_ptr.vmem [resolvable:$true] %s20_s16 }
   0x2   :  { %23 = dma.hbm_to_vmem [thread:$0]  %s19_s14, 16, %s21_s16, [#allocation3]  }
   0x3   :  { %107 = dma.done.wait [#allocation3], 16  }
   0x4   :  { %108 = vsyncadd [#allocation3], 4294967280  ;;  %v33_v0 = vld [vmem:[%s158_s1 + $0x18] sm:$0xff]  ;;  %v32_v1 = vld [vmem:[%s158_s1 + $0x10] sm:$0xff]  ;;  %vm38_vm0 = vcmask 261120  }
   0x5   :  { %57 = vmatpush.msra.mxu0 %v33_v0  ;;  %77 = vmatpush.msra.mxu1 %v33_v0  ;;  %v31_v2 = vld [vmem:[%s158_s1 + $0x8] sm:$0xff]  ;;  %v30_v3 = vld [vmem:[%s158_s1] sm:$0xff] }
   0x6   :  { %v28_v4 = vld [vmem:[%s157_s0] sm:$0xff]  ;;  %v29_v5 = vld [vmem:[%s157_s0 + $0x8] sm:$0xff] }
   0x7   :  { %58 = vmatpush.msra.mxu0 %v32_v1  ;;  %78 = vmatpush.msra.mxu1 %v32_v1  ;;  %v82_v6 = vld [vmem:[#allocation2] ss:$0 sm:$0xff] }
   0x9   :  { %59 = vmatpush.msra.mxu0 %v31_v2  ;;  %79 = vmatpush.msra.mxu1 %v31_v2 }
   0xb   :  { %60 = vmatpush.msra.mxu0 %v30_v3  ;;  %80 = vmatpush.msra.mxu1 %v30_v3 }
   0xc   :  { %75 = vmatmul.msk.f32.vlgmr.msra.gmra.mxu0 %vm38_vm0, %v28_v4  ;;  %76 = vmatmul.msk.f32.vlgmr.msra.gmra.mxu1 %vm38_vm0, %v29_v5 }
  0x89   :  { %v62_v7 = vpop.f32.mrf.mxu0  ;;  %v65_v8 = vpop.f32.mrf.mxu1 }
  0x8a   :  { %v63_v9 = vadd.f32 %v82_v6, %v62_v7  ;;  %v66_v10 = vadd.f32 %v82_v6, %v65_v8 }
  0x8c   :  { %68 = vst.msk [vmem:[%s160_s3] sm:$0xff] %vm38_vm0, %v63_v9 }
  0x8d   :  { %69 = vst.msk [vmem:[%s160_s3 + $0x8] sm:$0xff] %vm38_vm0, %v66_v10 }
  0x8e   :  { %74 = vsyncpa [#allocation3], 1 }

// kernel: jammer_transformer_decoder.25
= control target key start
LH: loop header
LB: loop body
LE: loop exit
PB: predicated region body
PF: predicated region fallthrough
CT: control target
= control target key end

     0   :  { %8 = vsyncpa [#allocation3], 0  ;;  %s110_s15 = smov [#allocation2]   ;;  %s158_s0 = inlined_call_operand.vmem [shape: f32[16,32], index: 0, kind: input, shape index: {}]   ;;  %s159_s1 = inlined_call_operand.vmem [shape: f32[32,64], index: 1, kind: input, shape index: {}]   ;;  %s160_s2 = inlined_call_operand.hbm [shape: f32[1,64], index: 2, kind: input, shape index: {}]   ;;  %s161_s3 = inlined_call_operand.vmem [shape: f32[16,64], index: 3, kind: output, shape index: {}]  }
   0x1   :  { %s18_s14 = sshll.u32 %s160_s2, 4  ;;  %s20_s16 = sshll.u32 %s110_s15, 4  ;;  %s19_s14 = int_to_ptr.hbm [resolvable:$true] %s18_s14  ;;  %s21_s16 = int_to_ptr.vmem [resolvable:$true] %s20_s16 }
   0x2   :  { %23 = dma.hbm_to_vmem [thread:$0]  %s19_s14, 16, %s21_s16, [#allocation3]  }
   0x3   :  { %108 = dma.done.wait [#allocation3], 16  }
   0x4   :  { %109 = vsyncadd [#allocation3], 4294967280  ;;  %v33_v0 = vld [vmem:[%s159_s1 + $0x18] sm:$0xff]  ;;  %v32_v1 = vld [vmem:[%s159_s1 + $0x10] sm:$0xff]  ;;  %vm38_vm0 = vcmask 261120   ;;  %vm68_vm1 = vcmask 523264  }
   0x5   :  { %57 = vmatpush.msra.mxu0 %v33_v0  ;;  %78 = vmatpush.msra.mxu1 %v33_v0  ;;  %v31_v2 = vld [vmem:[%s159_s1 + $0x8] sm:$0xff]  ;;  %v30_v3 = vld [vmem:[%s159_s1] sm:$0xff] }
   0x6   :  { %v28_v4 = vld [vmem:[%s158_s0] sm:$0xff]  ;;  %v29_v5 = vld [vmem:[%s158_s0 + $0x8] sm:$0xff] }
   0x7   :  { %58 = vmatpush.msra.mxu0 %v32_v1  ;;  %79 = vmatpush.msra.mxu1 %v32_v1  ;;  %v83_v6 = vld [vmem:[#allocation2] ss:$0 sm:$0xff] }
   0x9   :  { %59 = vmatpush.msra.mxu0 %v31_v2  ;;  %80 = vmatpush.msra.mxu1 %v31_v2 }
   0xb   :  { %60 = vmatpush.msra.mxu0 %v30_v3  ;;  %81 = vmatpush.msra.mxu1 %v30_v3 }
   0xc   :  { %76 = vmatmul.msk.f32.vlgmr.msra.gmra.mxu0 %vm38_vm0, %v28_v4  ;;  %77 = vmatmul.msk.f32.vlgmr.msra.gmra.mxu1 %vm38_vm0, %v29_v5 }
  0x89   :  { %v62_v7 = vpop.f32.mrf.mxu0  ;;  %v65_v8 = vpop.f32.mrf.mxu1 }
  0x8a   :  { %v63_v9 = vadd.f32 %v83_v6, %v62_v7  ;;  %v66_v10 = vadd.f32 %v83_v6, %v65_v8 }
  0x8c   :  { %69 = vst.msk [vmem:[%s161_s3] sm:$0xff] %vm68_vm1, %v63_v9 }
  0x8d   :  { %70 = vst.msk [vmem:[%s161_s3 + $0x8] sm:$0xff] %vm68_vm1, %v66_v10 }
  0x8e   :  { %75 = vsyncpa [#allocation3], 1 }

// kernel: jammer_transformer_decoder.20
= control target key start
LH: loop header
LB: loop body
LE: loop exit
PB: predicated region body
PF: predicated region fallthrough
CT: control target
= control target key end

     0   :  { %8 = vsyncpa [#allocation3], 0  ;;  %s106_s15 = smov [#allocation2]   ;;  %s148_s0 = inlined_call_operand.vmem [shape: f32[16,16], index: 0, kind: input, shape index: {}]   ;;  %s149_s1 = inlined_call_operand.vmem [shape: f32[16,32], index: 1, kind: input, shape index: {}]   ;;  %s150_s2 = inlined_call_operand.hbm [shape: f32[1,32], index: 2, kind: input, shape index: {}]   ;;  %s151_s3 = inlined_call_operand.vmem [shape: f32[16,32], index: 3, kind: output, shape index: {}]  }
   0x1   :  { %s18_s14 = sshll.u32 %s150_s2, 4  ;;  %s20_s16 = sshll.u32 %s106_s15, 4  ;;  %s19_s14 = int_to_ptr.hbm [resolvable:$true] %s18_s14  ;;  %s21_s16 = int_to_ptr.vmem [resolvable:$true] %s20_s16 }
   0x2   :  { %23 = dma.hbm_to_vmem [thread:$0]  %s19_s14, 16, %s21_s16, [#allocation3]  }
   0x3   :  { %104 = dma.done.wait [#allocation3], 16  }
   0x4   :  { %105 = vsyncadd [#allocation3], 4294967280  ;;  %v31_v0 = vld [vmem:[%s149_s1 + $0x8] sm:$0xff]  ;;  %v30_v1 = vld [vmem:[%s149_s1] sm:$0xff]  ;;  %vm36_vm0 = vcmask 130048   ;;  %vm66_vm1 = vcmask 261120  }
   0x5   :  { %57 = vmatpush.msra.mxu0 %v31_v0  ;;  %76 = vmatpush.msra.mxu1 %v31_v0  ;;  %v28_v2 = vld [vmem:[%s148_s0] sm:$0xff]  ;;  %v29_v3 = vld [vmem:[%s148_s0 + $0x8] sm:$0xff] }
   0x6   :  { %v79_v4 = vld [vmem:[#allocation2] ss:$0 sm:$0xff] }
   0x7   :  { %58 = vmatpush.msra.mxu0 %v30_v1  ;;  %77 = vmatpush.msra.mxu1 %v30_v1 }
   0x8   :  { %74 = vmatmul.msk.f32.vlgmr.msra.gmra.mxu0 %vm36_vm0, %v28_v2  ;;  %75 = vmatmul.msk.f32.vlgmr.msra.gmra.mxu1 %vm36_vm0, %v29_v3 }
  0x85   :  { %v60_v5 = vpop.f32.mrf.mxu0  ;;  %v63_v6 = vpop.f32.mrf.mxu1 }
  0x86   :  { %v61_v7 = vadd.f32 %v79_v4, %v60_v5  ;;  %v64_v8 = vadd.f32 %v79_v4, %v63_v6 }
  0x88   :  { %67 = vst.msk [vmem:[%s151_s3] sm:$0xff] %vm66_vm1, %v61_v7 }
  0x89   :  { %68 = vst.msk [vmem:[%s151_s3 + $0x8] sm:$0xff] %vm66_vm1, %v64_v8 }
  0x8a   :  { %73 = vsyncpa [#allocation3], 1 }

// kernel: jammer_transformer_decoder.26
= control target key start
LH: loop header
LB: loop body
LE: loop exit
PB: predicated region body
PF: predicated region fallthrough
CT: control target
= control target key end

     0   :  { %s594_s9 = smov 0   ;;  %s653_s0 = inlined_call_operand.vmem [shape: f32[2,8,32], index: 0, kind: input, shape index: {}]   ;;  %s654_s1 = inlined_call_operand.vmem [shape: f32[2,8,64], index: 1, kind: input, shape index: {}]   ;;  %s655_s2 = inlined_call_operand.vmem [shape: f32[2,8,32], index: 2, kind: output, shape index: {}]  }
   0x1 LB: > { %s505_s10 = sadd.s32 4294967295, %s567_s9   ;;  %p509_p0 = scmp.ge.s32.totalorder %s567_s9, 1  ;;  %s567_s9 = sphi %s594_s9, %s12_s9  }
   0x2   : > { %p120_p1 = scmp.lt.s32.totalorder %s567_s9, 3 }
   0x4   : > { %p121_p2 = pnand %p509_p0, %p120_p1 }
   0x5   : > { %p144_p3 = scmp.lt.s32.totalorder (!%p121_p2), %s505_s10, 1  ;;  %s569_s18 = smov (!%p121_p2), 120  }
   0x6   : > { %124 = sbr.rel (%p121_p2) target bundleno = 1053 (0x41d), region = 28  ;;  %s570_s19 = smov (!%p121_p2), 112  }
   0x7   : > { %s571_s20 = smov (!%p121_p2), 96   ;;  %s572_s21 = smov (!%p121_p2), 104  }
   0x8   : > { %s573_s22 = smov (!%p121_p2), 80   ;;  %s574_s23 = smov (!%p121_p2), 88  }
   0x9   : > { %s575_s24 = smov (!%p121_p2), 72   ;;  %s576_s25 = smov (!%p121_p2), 8  }
   0xa   : > { %s577_s26 = smov (!%p121_p2), 16   ;;  %s578_s27 = smov (!%p121_p2), 24  }
   0xb   : > { %s657_s10 = smov (!%p144_p3, %s505_s10), 1  ;;  %vm158_vm0 = vcmask 64512   ;;  %vm434_vm1 = vcmask 130048   ;;  %vm436_vm2 = vcmask 195584   ;;  %vm438_vm3 = vcmask 261120  }
   0xc   : > { %s602_s11 = sshll.u32 %s657_s10, 3 }
   0xd   : > { %s151_s14 = scalar_lea.vmem %s654_s1, %s602_s11  ;;  %s147_s17 = scalar_lea.vmem %s653_s0, %s602_s11 }
   0xe   : > { %v612_v0 = vld [vmem:[%s151_s14] sm:$0xff]  ;;  %s155_s30 = scalar_lea.vmem %s655_s2, %s602_s11 }
   0xf   : > { %513 = vmatpush.xpose.msk.msra.mxu0 %vm158_vm0, %v612_v0  ;;  %v157_v1 = vld [vmem:[%s147_s17] sm:$0xff]  ;;  %225 = vrot.lane.b32.xlu1 %v612_v0, %s569_s18 }
  0x10   : > { %197 = vrot.lane.b32.xlu2 %v612_v0, %s571_s20 }
  0x12   : > { %514 = vmatmul.msk.f32.vlgmr.msra.gmra.mxu0 %vm158_vm0, %v157_v1 }
  0x17   : > { %223 = vrot.lane.b32.xlu1 %v157_v1, %s569_s18 }
  0x18   : > { %291 = vrot.lane.b32.xlu2 %v612_v0, %s570_s19 }
  0x1f   : > { %289 = vrot.lane.b32.xlu1 %v157_v1, %s570_s19 }
  0x20   : > { %355 = vrot.lane.b32.xlu2 %v157_v1, %s572_s21 }
  0x6a   : > { %v198_v12 = vpop.permute.xlu2 %197 }
  0x6b   : > { %218 = vmatpush.msra.mxu1 %v198_v12 }
  0x72   : > { %v292_v13 = vpop.permute.xlu2 %291 }
  0x73   : > { %519 = vmatpush.xpose.msk.msrb.mxu1 %vm158_vm0, %v292_v13 }
  0x7a   : > { %v356_v22 = vpop.permute.xlu2 %355 }
  0x81   : > { %v226_v5 = vpop.permute.xlu1 %225 }
  0x82   : > { %516 = vmatpush.xpose.msk.msra.mxu2 %vm158_vm0, %v226_v5 }
  0x89   : > { %v224_v6 = vpop.permute.xlu1 %223 }
  0x8a   : > { %517 = vmatmul.msk.f32.vlgmr.msra.gmra.mxu2 %vm158_vm0, %v224_v6 }
  0x8f   : > { %v182_v2 = vpop.f32.mrf.mxu0 }
  0x90   : > { %v185_v3 = vmul.f32 0.35355338, %v182_v2 }
  0x91   : > { %v290_v20 = vpop.permute.xlu1 %289 }
  0x92   : > { %v186_v4 = vsel %vm158_vm0, %v185_v3, -inf }
  0x93   : > { %187 = vmax.xlane.f32.xlu0 %v186_v4 }
 0x106   : > { %v188_v7 = vpop.xlane.xlu0 %187 }
 0x107   : > { %v189_v8 = vsub.f32 %v185_v3, %v188_v7 }
 0x109   : > { %v190_v9 = vmul.f32 1.442695, %v189_v8 }
 0x10b   : > { %545 = vpow2.f32 %v190_v9 }
 0x10d   : > { %v248_v14 = vpop.f32.mrf.mxu2 }
 0x10e   : > { %v251_v15 = vmul.f32 0.35355338, %v248_v14 }
 0x110   : > { %v252_v16 = vsel %vm158_vm0, %v251_v15, -inf }
 0x111   : > { %v546_v10 = vpop.eup %545  ;;  %253 = vmax.xlane.f32.xlu1 %v252_v16 }
 0x112   : > { %v192_v11 = vsel %vm158_vm0, %v546_v10, 0.0 }
 0x113   : > { %193 = vadd.xlane.f32.xlu0 %v192_v11 }
 0x127   : > { %357 = vrot.lane.b32.xlu0 %v612_v0, %s572_s21 }
 0x184   : > { %v254_v23 = vpop.xlane.xlu1 %253 }
 0x185   : > { %v255_v25 = vsub.f32 %v251_v15, %v254_v23 }
 0x186   : > { %v194_v17 = vpop.xlane.xlu0 %193 }
 0x187   : > { %547 = vrcp.f32 %v194_v17  ;;  %v256_v26 = vmul.f32 1.442695, %v255_v25 }
 0x189   : > { %549 = vpow2.f32 %v256_v26 }
 0x18d   : > { %v548_v18 = vpop.eup %547 }
 0x18e   : > { %v196_v19 = vmul.f32 %v548_v18, %v546_v10 }
 0x18f   : > { %v550_v31 = vpop.eup %549 }
 0x190   : > { %515 = vmatmul.msk.f32.vlgmr.msra.gmra.mxu1 %vm158_vm0, %v196_v19  ;;  %v258_v34 = vsel %vm158_vm0, %v550_v31, 0.0 }
 0x198   : > { %520 = vmatmul.msk.f32.vlgmr.msrb.gmra.mxu1 %vm158_vm0, %v290_v20 }
 0x199   : > { %v358_v21 = vpop.permute.xlu0 %357 }
 0x19a   : > { %522 = vmatpush.xpose.msk.msrb.mxu0 %vm158_vm0, %v358_v21 }
 0x19d   : > { %523 = vmatmul.msk.f32.vlgmr.msrb.gmra.mxu0 %vm158_vm0, %v356_v22 }
 0x20d   : > { %v631_v24 = vpop.f32.mrf.mxu1 }
 0x215   : > { %v314_v27 = vpop.f32.mrf.mxu1 }
 0x216   : > { %v317_v28 = vmul.f32 0.35355338, %v314_v27 }
 0x218   : > { %v318_v29 = vsel %vm158_vm0, %v317_v28, -inf }
 0x219   : > { %319 = vmax.xlane.f32.xlu2 %v318_v29 }
 0x21a   : > { %v380_v30 = vpop.f32.mrf.mxu0 }
 0x21b   : > { %v383_v32 = vmul.f32 0.35355338, %v380_v30 }
 0x21d   : > { %v384_v33 = vsel %vm158_vm0, %v383_v32, -inf }
 0x21e   : > { %385 = vmax.xlane.f32.xlu0 %v384_v33 }
 0x221   : > { %259 = vadd.xlane.f32.xlu2 %v258_v34 }
 0x232   : > { %329 = vrot.lane.b32.xlu0 %v612_v0, %s573_s22 }
 0x239   : > { %263 = vrot.lane.b32.xlu2 %v612_v0, %s574_s23 }
 0x28c   : > { %v320_v35 = vpop.xlane.xlu2 %319 }
 0x28d   : > { %v321_v38 = vsub.f32 %v317_v28, %v320_v35 }
 0x28f   : > { %v322_v41 = vmul.f32 1.442695, %v321_v38 }
 0x291   : > { %v386_v36 = vpop.xlane.xlu0 %385 }
 0x292   : > { %v387_v37 = vsub.f32 %v383_v32, %v386_v36 }
 0x294   : > { %v388_v39 = vmul.f32 1.442695, %v387_v37  ;;  %v260_v40 = vpop.xlane.xlu2 %259 }
 0x295   : > { %551 = vrcp.f32 %v260_v40 }
 0x296   : > { %553 = vpow2.f32 %v388_v39 }
 0x297   : > { %555 = vpow2.f32 %v322_v41 }
 0x29b   : > { %v552_v42 = vpop.eup %551 }
 0x29c   : > { %v554_v43 = vpop.eup %553  ;;  %v264_v44 = vpop.permute.xlu2 %263  ;;  %v262_v45 = vmul.f32 %v552_v42, %v550_v31 }
 0x29d   : > { %284 = vmatpush.msra.mxu3 %v264_v44  ;;  %v390_v46 = vsel %vm158_vm0, %v554_v43, 0.0  ;;  %v556_v47 = vpop.eup %555 }
 0x29e   : > { %518 = vmatmul.msk.f32.vlgmr.msra.gmra.mxu3 %vm158_vm0, %v262_v45  ;;  %391 = vadd.xlane.f32.xlu1 %v390_v46  ;;  %v324_v48 = vsel %vm158_vm0, %v556_v47, 0.0 }
 0x2a4   : > { %v330_v49 = vpop.permute.xlu0 %329 }
 0x2a5   : > { %350 = vmatpush.msrb.mxu3 %v330_v49 }
 0x2a6   : > { %325 = vadd.xlane.f32.xlu1 %v324_v48 }
 0x2bf   : > { %395 = vrot.lane.b32.xlu1 %v612_v0, %s575_s24 }
 0x311   : > { %v392_v50 = vpop.xlane.xlu1 %391 }
 0x319   : > { %v326_v51 = vpop.xlane.xlu1 %325 }
 0x31a   : > { %557 = vrcp.f32 %v326_v51 }
 0x31b   : > { %559 = vrcp.f32 %v392_v50 }
 0x320   : > { %v558_v52 = vpop.eup %557 }
 0x321   : > { %v286_v53 = vpop.f32.mrf.mxu3  ;;  %v328_v54 = vmul.f32 %v558_v52, %v556_v47  ;;  %v560_v55 = vpop.eup %559 }
 0x322   : > { %422 = vrot.lane.b32.xlu2 %v286_v53, %s576_s25  ;;  %v394_v57 = vmul.f32 %v560_v55, %v554_v43 }
 0x323   : > { %521 = vmatmul.msk.f32.vlgmr.msrb.gmra.mxu3 %vm158_vm0, %v328_v54 }
 0x331   : > { %v396_v56 = vpop.permute.xlu1 %395 }
 0x332   : > { %416 = vmatpush.msrb.mxu2 %v396_v56 }
 0x333   : > { %524 = vmatmul.msk.f32.vlgmr.msrb.gmra.mxu2 %vm158_vm0, %v394_v57 }
 0x37c   : > { %v423_v60 = vpop.permute.xlu2 %422 }
 0x37d   : > { %v433_v61 = vsel %vm158_vm0, %v631_v24, %v423_v60 }
 0x3a6   : > { %v352_v58 = vpop.f32.mrf.mxu3 }
 0x3a7   : > { %426 = vrot.lane.b32.xlu0 %v352_v58, %s577_s26 }
 0x3b6   : > { %v418_v59 = vpop.f32.mrf.mxu2 }
 0x3b7   : > { %430 = vrot.lane.b32.xlu2 %v418_v59, %s578_s27 }
 0x411   : > { %v431_v63 = vpop.permute.xlu2 %430 }
 0x419   : > { %v427_v62 = vpop.permute.xlu0 %426 }
 0x41a   : > { %v435_v0 = vsel %vm434_vm1, %v433_v61, %v427_v62 }
 0x41b   : > { %v437_v1 = vsel %vm436_vm2, %v435_v0, %v431_v63 }
 0x41c   : > { %439 = vst.msk [vmem:[%s155_s30] sm:$0xff] %vm438_vm3, %v437_v1 }
 0x41d PF: > { %s12_s9 = sadd.s32 1, %s567_s9  }
 0x41e   : > { %p9_p4 = scmp.ge.s32.totalorder %s12_s9, 4  }
 0x420   :  { %11 = sbr.rel (!%p9_p4) target bundleno = 1 (0x1), region = 61 }

// kernel: jammer_transformer_decoder.27
= control target key start
LH: loop header
LB: loop body
LE: loop exit
PB: predicated region body
PF: predicated region fallthrough
CT: control target
= control target key end

     0   :  { %11 = vsyncpa [#allocation3], 0  ;;  %s360_s0 = inlined_call_operand.vmem [shape: f32[16,32], index: 0, kind: input, shape index: {}]   ;;  %s361_s1 = inlined_call_operand.vmem [shape: f32[16,32], index: 1, kind: input, shape index: {}]   ;;  %s362_s2 = inlined_call_operand.vmem [shape: f32[32,32], index: 2, kind: input, shape index: {}]   ;;  %s363_s3 = inlined_call_operand.hbm [shape: f32[1,32], index: 3, kind: input, shape index: {}]   ;;  %s364_s4 = inlined_call_operand.hbm [shape: f32[1,32], index: 4, kind: input, shape index: {}]   ;;  %s365_s5 = inlined_call_operand.hbm [shape: f32[1,32], index: 5, kind: input, shape index: {}]   ;;  %s366_s6 = inlined_call_operand.vmem [shape: f32[16,32], index: 6, kind: output, shape index: {}]  }
   0x1   :  { %12 = vsyncpa [#allocation5], 0  ;;  %s35_s23 = sshll.u32 %s364_s4, 4  ;;  %s274_s24 = smov [#allocation4]   ;;  %s36_s23 = int_to_ptr.hbm [resolvable:$true] %s35_s23 }
   0x2   :  { %s37_s25 = sshll.u32 %s274_s24, 4  ;;  %s24_s28 = sshll.u32 %s363_s3, 4  ;;  %s38_s25 = int_to_ptr.vmem [resolvable:$true] %s37_s25  ;;  %s25_s28 = int_to_ptr.hbm [resolvable:$true] %s24_s28 }
   0x3   :  { %40 = dma.hbm_to_vmem [thread:$0]  %s36_s23, 16, %s38_s25, [#allocation5]  }
   0x4   :  { %s275_s29 = smov [#allocation2]   ;;  %s46_s9 = sshll.u32 %s365_s5, 4  ;;  %s47_s9 = int_to_ptr.hbm [resolvable:$true] %s46_s9 }
   0x5   :  { %s26_s30 = sshll.u32 %s275_s29, 4  ;;  %s276_s4 = smov [#allocation6]   ;;  %s27_s30 = int_to_ptr.vmem [resolvable:$true] %s26_s30 }
   0x6   :  { %29 = dma.hbm_to_vmem [thread:$0]  %s25_s28, 16, %s27_s30, [#allocation3]  }
   0x7   :  { %s48_s10 = sshll.u32 %s276_s4, 4  ;;  %s49_s10 = int_to_ptr.vmem [resolvable:$true] %s48_s10 }
   0x8   :  { %51 = dma.hbm_to_vmem [thread:$0]  %s47_s9, 16, %s49_s10, [#allocation5]  }
   0x9   :  { %270 = dma.done.wait [#allocation3], 16  }
   0xa   :  { %271 = vsyncadd [#allocation3], 4294967280 }
   0xb   :  { %272 = dma.done.wait [#allocation5], 32  }
   0xc   :  { %273 = vsyncadd [#allocation5], 4294967264  ;;  %v69_v0 = vld [vmem:[%s362_s2 + $0x18] sm:$0xff]  ;;  %v68_v1 = vld [vmem:[%s362_s2 + $0x10] sm:$0xff]  ;;  %vm74_vm0 = vcmask 261120   ;;  %v277_v17 = vmov 32.0  }
   0xd   :  { %93 = vmatpush.msra.mxu0 %v69_v0  ;;  %181 = vmatpush.msra.mxu1 %v69_v0  ;;  %v67_v2 = vld [vmem:[%s362_s2 + $0x8] sm:$0xff]  ;;  %v66_v3 = vld [vmem:[%s362_s2] sm:$0xff]  ;;  %192 = vrcp.f32 %v277_v17 }
   0xe   :  { %v64_v4 = vld [vmem:[%s360_s0] sm:$0xff]  ;;  %v65_v5 = vld [vmem:[%s360_s0 + $0x8] sm:$0xff] }
   0xf   :  { %94 = vmatpush.msra.mxu0 %v68_v1  ;;  %182 = vmatpush.msra.mxu1 %v68_v1  ;;  %v189_v6 = vld [vmem:[#allocation2] ss:$0 sm:$0xff]  ;;  %v105_v13 = vld [vmem:[%s361_s1 + $0x8] sm:$0xff]  ;;  %v190_v48 = vld [vmem:[#allocation4] ss:$0 sm:$0xff] }
  0x10   :  { %v104_v8 = vld [vmem:[%s361_s1] sm:$0xff] }
  0x11   :  { %95 = vmatpush.msra.mxu0 %v67_v2  ;;  %183 = vmatpush.msra.mxu1 %v67_v2  ;;  %v191_v51 = vld [vmem:[#allocation6] ss:$0 sm:$0xff] }
  0x13   :  { %96 = vmatpush.msra.mxu0 %v66_v3  ;;  %184 = vmatpush.msra.mxu1 %v66_v3  ;;  %v193_v18 = vpop.eup %192 }
  0x14   :  { %179 = vmatmul.msk.f32.vlgmr.msra.gmra.mxu0 %vm74_vm0, %v64_v4  ;;  %180 = vmatmul.msk.f32.vlgmr.msra.gmra.mxu1 %vm74_vm0, %v65_v5  ;;  %v115_v19 = vmul.f32 32.0, %v193_v18  ;;  %vm119_vm1 = vweird.f32 %v193_v18 }
  0x16   :  { %v116_v20 = vsub.f32 1.0, %v115_v19 }
  0x18   :  { %v117_v21 = vmul.f32 %v193_v18, %v116_v20 }
  0x1a   :  { %v118_v22 = vadd.f32 %v193_v18, %v117_v21 }
  0x1c   :  { %v120_v23 = vsel %vm119_vm1, %v193_v18, %v118_v22 }
  0x91   :  { %v98_v7 = vpop.f32.mrf.mxu0  ;;  %v101_v9 = vpop.f32.mrf.mxu1 }
  0x92   :  { %v99_v10 = vadd.f32 %v189_v6, %v98_v7  ;;  %v102_v12 = vadd.f32 %v189_v6, %v101_v9 }
  0x94   :  { %v106_v11 = vadd.f32 %v104_v8, %v99_v10  ;;  %v107_v15 = vadd.f32 %v105_v13, %v102_v12 }
  0x96   :  { %v108_v14 = vsel %vm74_vm0, %v106_v11, 0.0  ;;  %v111_v16 = vsel %vm74_vm0, %v107_v15, 0.0 }
  0x97   :  { %109 = vadd.xlane.f32.xlu0 %v108_v14 }
  0x9f   :  { %112 = vadd.xlane.f32.xlu0 %v111_v16 }
 0x10a   :  { %v110_v24 = vpop.xlane.xlu0 %109 }
 0x10b   :  { %v121_v25 = vmul.f32 %v120_v23, %v110_v24 }
 0x10d   :  { %v123_v26 = vsub.f32 %v106_v11, %v121_v25 }
 0x10f   :  { %v125_v27 = vmul.f32 %v123_v26, %v123_v26 }
 0x111   :  { %v127_v28 = vsel %vm74_vm0, %v125_v27, 0.0 }
 0x112   :  { %128 = vadd.xlane.f32.xlu1 %v127_v28  ;;  %v113_v29 = vpop.xlane.xlu0 %112 }
 0x113   :  { %v122_v30 = vmul.f32 %v120_v23, %v113_v29 }
 0x115   :  { %v124_v31 = vsub.f32 %v107_v15, %v122_v30 }
 0x117   :  { %v126_v32 = vmul.f32 %v124_v31, %v124_v31 }
 0x119   :  { %v130_v33 = vsel %vm74_vm0, %v126_v32, 0.0 }
 0x11a   :  { %131 = vadd.xlane.f32.xlu1 %v130_v33 }
 0x185   :  { %v129_v34 = vpop.xlane.xlu1 %128 }
 0x186   :  { %v133_v35 = vmul.f32 %v129_v34, %v120_v23 }
 0x188   :  { %v135_v36 = vadd.f32 1e-05, %v133_v35 }
 0x18a   :  { %194 = vrsqrt.f32 %v135_v36  ;;  %vm143_vm3 = vweird.f32 %v135_v36 }
 0x18d   :  { %v132_v37 = vpop.xlane.xlu1 %131 }
 0x18e   :  { %v134_v38 = vmul.f32 %v132_v37, %v120_v23 }
 0x190   :  { %v195_v39 = vpop.eup %194  ;;  %v136_v40 = vadd.f32 1e-05, %v134_v38 }
 0x191   :  { %v138_v41 = vmul.f32 %v195_v39, %v135_v36  ;;  %vm144_vm2 = vweird.f32 %v195_v39 }
 0x192   :  { %196 = vrsqrt.f32 %v136_v40  ;;  %vm145_vm4 = vmor %vm143_vm3, %vm144_vm2  ;;  %vm153_vm6 = vweird.f32 %v136_v40 }
 0x193   :  { %v139_v42 = vmul.f32 %v195_v39, %v138_v41 }
 0x195   :  { %v140_v43 = vmul.f32 0.5, %v139_v42 }
 0x197   :  { %v141_v44 = vsub.f32 1.5, %v140_v43 }
 0x198   :  { %v197_v45 = vpop.eup %196 }
 0x199   :  { %v142_v46 = vmul.f32 %v195_v39, %v141_v44  ;;  %v148_v47 = vmul.f32 %v197_v45, %v136_v40  ;;  %vm154_vm5 = vweird.f32 %v197_v45 }
 0x19a   :  { %vm155_vm7 = vmor %vm153_vm6, %vm154_vm5 }
 0x19b   :  { %v146_v49 = vsel %vm145_vm4, %v195_v39, %v142_v46  ;;  %v149_v50 = vmul.f32 %v197_v45, %v148_v47 }
 0x19c   :  { %v157_v52 = vmul.f32 %v146_v49, %v123_v26 }
 0x19d   :  { %v150_v53 = vmul.f32 0.5, %v149_v50 }
 0x19e   :  { %v163_v54 = vmul.f32 %v190_v48, %v157_v52 }
 0x19f   :  { %v151_v55 = vsub.f32 1.5, %v150_v53 }
 0x1a0   :  { %v169_v56 = vadd.f32 %v191_v51, %v163_v54 }
 0x1a1   :  { %v152_v57 = vmul.f32 %v197_v45, %v151_v55 }
 0x1a2   :  { %171 = vst.msk [vmem:[%s366_s6] sm:$0xff] %vm74_vm0, %v169_v56 }
 0x1a3   :  { %v156_v58 = vsel %vm155_vm7, %v197_v45, %v152_v57 }
 0x1a4   :  { %v158_v59 = vmul.f32 %v156_v58, %v124_v31 }
 0x1a6   :  { %v164_v60 = vmul.f32 %v190_v48, %v158_v59 }
 0x1a8   :  { %v170_v61 = vadd.f32 %v191_v51, %v164_v60 }
 0x1aa   :  { %172 = vst.msk [vmem:[%s366_s6 + $0x8] sm:$0xff] %vm74_vm0, %v170_v61 }
 0x1ab   :  { %177 = vsyncpa [#allocation3], 1 }
 0x1ac   :  { %178 = vsyncpa [#allocation5], 1 }

// kernel: jammer_transformer_decoder.32
= control target key start
LH: loop header
LB: loop body
LE: loop exit
PB: predicated region body
PF: predicated region fallthrough
CT: control target
= control target key end

     0   :  { %vm24_vm0 = vcmask 261120   ;;  %s114_s1 = inlined_call_operand.vmem [shape: f32[32,32], index: 1, kind: input, shape index: {}]   ;;  %s115_s2 = inlined_call_operand.vmem [shape: f32[1,32], index: 2, kind: input, shape index: {}]   ;;  %s116_s0 = inlined_call_operand.vmem [shape: f32[16,32], index: 0, kind: input, shape index: {}]   ;;  %s117_s3 = inlined_call_operand.vmem [shape: f32[16,32], index: 3, kind: output, shape index: {}]  }
   0x1   :  { %v19_v0 = vld [vmem:[%s114_s1 + $0x18] sm:$0xff]  ;;  %v18_v1 = vld [vmem:[%s114_s1 + $0x10] sm:$0xff]  ;;  %v17_v2 = vld [vmem:[%s114_s1 + $0x8] sm:$0xff] }
   0x2   :  { %43 = vmatpush.msra.mxu0 %v19_v0  ;;  %62 = vmatpush.msra.mxu1 %v19_v0  ;;  %v16_v3 = vld [vmem:[%s114_s1] sm:$0xff]  ;;  %v15_v5 = vld [vmem:[%s116_s0 + $0x8] sm:$0xff] }
   0x3   :  { %v14_v4 = vld [vmem:[%s116_s0] sm:$0xff] }
   0x4   :  { %44 = vmatpush.msra.mxu0 %v18_v1  ;;  %63 = vmatpush.msra.mxu1 %v18_v1  ;;  %v66_v6 = vld [vmem:[%s115_s2] ss:$0 sm:$0xff] }
   0x6   :  { %45 = vmatpush.msra.mxu0 %v17_v2  ;;  %64 = vmatpush.msra.mxu1 %v17_v2 }
   0x8   :  { %46 = vmatpush.msra.mxu0 %v16_v3  ;;  %65 = vmatpush.msra.mxu1 %v16_v3 }
   0x9   :  { %60 = vmatmul.msk.f32.vlgmr.msra.gmra.mxu0 %vm24_vm0, %v14_v4  ;;  %61 = vmatmul.msk.f32.vlgmr.msra.gmra.mxu1 %vm24_vm0, %v15_v5 }
  0x86   :  { %v48_v7 = vpop.f32.mrf.mxu0  ;;  %v51_v8 = vpop.f32.mrf.mxu1 }
  0x87   :  { %v49_v9 = vadd.f32 %v66_v6, %v48_v7  ;;  %v52_v10 = vadd.f32 %v66_v6, %v51_v8 }
  0x89   :  { %54 = vst.msk [vmem:[%s117_s3] sm:$0xff] %vm24_vm0, %v49_v9 }
  0x8a   :  { %55 = vst.msk [vmem:[%s117_s3 + $0x8] sm:$0xff] %vm24_vm0, %v52_v10 }

// kernel: jammer_transformer_decoder.28
= control target key start
LH: loop header
LB: loop body
LE: loop exit
PB: predicated region body
PF: predicated region fallthrough
CT: control target
= control target key end

     0   :  { %vm36_vm0 = vcmask 261120   ;;  %v211_v38 = vmov 32.0   ;;  %s348_s1 = inlined_call_operand.vmem [shape: f32[32,128], index: 1, kind: input, shape index: {}]   ;;  %s349_s3 = inlined_call_operand.vmem [shape: f32[128,32], index: 3, kind: input, shape index: {}]   ;;  %s350_s0 = inlined_call_operand.vmem [shape: f32[16,32], index: 0, kind: input, shape index: {}]   ;;  %s351_s2 = inlined_call_operand.vmem [shape: f32[1,128], index: 2, kind: input, shape index: {}]   ;;  %s352_s4 = inlined_call_operand.vmem [shape: f32[1,32], index: 4, kind: input, shape index: {}]   ;;  %s353_s5 = inlined_call_operand.vmem [shape: f32[1,32], index: 5, kind: input, shape index: {}]   ;;  %s354_s6 = inlined_call_operand.vmem [shape: f32[1,32], index: 6, kind: input, shape index: {}]   ;;  %s355_s7 = inlined_call_operand.vmem [shape: f32[16,32], index: 7, kind: output, shape index: {}]  }
   0x1   :  { %v31_v0 = vld [vmem:[%s348_s1 + $0x18] sm:$0xff]  ;;  %v30_v1 = vld [vmem:[%s348_s1 + $0x10] sm:$0xff]  ;;  %v29_v2 = vld [vmem:[%s348_s1 + $0x8] sm:$0xff]  ;;  %205 = vrcp.f32 %v211_v38 }
   0x2   :  { %55 = vmatpush.msra.mxu0 %v31_v0  ;;  %v83_v3 = vld [vmem:[%s349_s3 + $0x78] sm:$0xff]  ;;  %v82_v4 = vld [vmem:[%s349_s3 + $0x70] sm:$0xff]  ;;  %v28_v5 = vld [vmem:[%s348_s1] sm:$0xff] }
   0x3   :  { %88 = vmatpush.msra.mxu1 %v83_v3  ;;  %v81_v6 = vld [vmem:[%s349_s3 + $0x68] sm:$0xff]  ;;  %184 = vmatpush.msra.mxu2 %v83_v3  ;;  %v276_v7 = vld [vmem:[%s350_s0] sm:$0xff]  ;;  %v79_v9 = vld [vmem:[%s349_s3 + $0x58] sm:$0xff] }
   0x4   :  { %56 = vmatpush.msra.mxu0 %v30_v1  ;;  %v80_v8 = vld [vmem:[%s349_s3 + $0x60] sm:$0xff]  ;;  %v78_v10 = vld [vmem:[%s349_s3 + $0x50] sm:$0xff]  ;;  %v77_v11 = vld [vmem:[%s349_s3 + $0x48] sm:$0xff] }
   0x5   :  { %89 = vmatpush.msra.mxu1 %v82_v4  ;;  %185 = vmatpush.msra.mxu2 %v82_v4  ;;  %v27_v12 = vld [vmem:[%s350_s0 + $0x8] sm:$0xff]  ;;  %v76_v13 = vld [vmem:[%s349_s3 + $0x40] sm:$0xff]  ;;  %v75_v14 = vld [vmem:[%s349_s3 + $0x38] sm:$0xff] }
   0x6   :  { %57 = vmatpush.msra.mxu0 %v29_v2  ;;  %v74_v15 = vld [vmem:[%s349_s3 + $0x30] sm:$0xff]  ;;  %v73_v16 = vld [vmem:[%s349_s3 + $0x28] sm:$0xff]  ;;  %v72_v17 = vld [vmem:[%s349_s3 + $0x20] sm:$0xff] }
   0x7   :  { %90 = vmatpush.msra.mxu1 %v81_v6  ;;  %186 = vmatpush.msra.mxu2 %v81_v6  ;;  %v71_v18 = vld [vmem:[%s349_s3 + $0x18] sm:$0xff]  ;;  %v70_v19 = vld [vmem:[%s349_s3 + $0x10] sm:$0xff]  ;;  %v69_v20 = vld [vmem:[%s349_s3 + $0x8] sm:$0xff]  ;;  %v206_v39 = vpop.eup %205 }
   0x8   :  { %58 = vmatpush.msra.mxu0 %v28_v5  ;;  %v68_v21 = vld [vmem:[%s349_s3] sm:$0xff]  ;;  %v120_v40 = vmul.f32 32.0, %v206_v39  ;;  %vm124_vm1 = vweird.f32 %v206_v39 }
   0x9   :  { %182 = vmatmul.msk.f32.vlgmr.msra.gmra.mxu0 %vm36_vm0, %v276_v7  ;;  %91 = vmatpush.msra.mxu1 %v80_v8  ;;  %v201_v22 = vld [vmem:[%s351_s2] ss:$0 sm:$0xff] }
   0xa   :  { %187 = vmatpush.msra.mxu2 %v80_v8  ;;  %v202_v29 = vld [vmem:[%s352_s4] ss:$0 sm:$0xff]  ;;  %v121_v41 = vsub.f32 1.0, %v120_v40 }
   0xb   :  { %92 = vmatpush.msra.mxu1 %v79_v9  ;;  %v203_v3 = vld [vmem:[%s353_s5] ss:$0 sm:$0xff] }
   0xc   :  { %188 = vmatpush.msra.mxu2 %v79_v9  ;;  %v122_v42 = vmul.f32 %v206_v39, %v121_v41  ;;  %v204_v5 = vld [vmem:[%s354_s6] ss:$0 sm:$0xff] }
   0xd   :  { %93 = vmatpush.msra.mxu1 %v78_v10 }
   0xe   :  { %189 = vmatpush.msra.mxu2 %v78_v10  ;;  %v123_v43 = vadd.f32 %v206_v39, %v122_v42 }
   0xf   :  { %94 = vmatpush.msra.mxu1 %v77_v11 }
  0x10   :  { %190 = vmatpush.msra.mxu2 %v77_v11  ;;  %v125_v44 = vsel %vm124_vm1, %v206_v39, %v123_v43 }
  0x11   :  { %183 = vmatmul.msk.f32.gmra.mxu0 %vm36_vm0, %v27_v12  ;;  %95 = vmatpush.msra.mxu1 %v76_v13 }
  0x12   :  { %191 = vmatpush.msra.mxu2 %v76_v13 }
  0x13   :  { %96 = vmatpush.msra.mxu1 %v75_v14 }
  0x14   :  { %192 = vmatpush.msra.mxu2 %v75_v14 }
  0x15   :  { %97 = vmatpush.msra.mxu1 %v74_v15 }
  0x16   :  { %193 = vmatpush.msra.mxu2 %v74_v15 }
  0x17   :  { %98 = vmatpush.msra.mxu1 %v73_v16 }
  0x18   :  { %194 = vmatpush.msra.mxu2 %v73_v16 }
  0x19   :  { %99 = vmatpush.msra.mxu1 %v72_v17 }
  0x1a   :  { %195 = vmatpush.msra.mxu2 %v72_v17 }
  0x1b   :  { %100 = vmatpush.msra.mxu1 %v71_v18 }
  0x1c   :  { %196 = vmatpush.msra.mxu2 %v71_v18 }
  0x1d   :  { %101 = vmatpush.msra.mxu1 %v70_v19 }
  0x1e   :  { %197 = vmatpush.msra.mxu2 %v70_v19 }
  0x1f   :  { %102 = vmatpush.msra.mxu1 %v69_v20 }
  0x20   :  { %198 = vmatpush.msra.mxu2 %v69_v20 }
  0x21   :  { %103 = vmatpush.msra.mxu1 %v68_v21 }
  0x22   :  { %199 = vmatpush.msra.mxu2 %v68_v21 }
  0x86   :  { %v60_v23 = vpop.f32.mrf.mxu0 }
  0x87   :  { %v61_v24 = vadd.f32 %v201_v22, %v60_v23 }
  0x89   :  { %v66_v25 = vmax.f32 %v61_v24, 0.0 }
  0x8b   :  { %104 = vmatmul.f32.vlgmr.msra.gmra.mxu1 %v66_v25 }
  0x8e   :  { %v63_v26 = vpop.f32.mrf.mxu0 }
  0x8f   :  { %v64_v27 = vadd.f32 %v201_v22, %v63_v26 }
  0x91   :  { %v67_v28 = vmax.f32 %v64_v27, 0.0 }
  0x93   :  { %107 = vmatmul.f32.vlgmr.msra.gmra.mxu2 %v67_v28 }
 0x108   :  { %v105_v30 = vpop.f32.mrf.mxu1 }
 0x109   :  { %v106_v31 = vadd.f32 %v202_v29, %v105_v30 }
 0x10b   :  { %v111_v32 = vadd.f32 %v106_v31, %v276_v7 }
 0x10d   :  { %v113_v33 = vsel %vm36_vm0, %v111_v32, 0.0 }
 0x10e   :  { %114 = vadd.xlane.f32.xlu0 %v113_v33 }
 0x116   :  { %v108_v34 = vpop.f32.mrf.mxu2 }
 0x117   :  { %v109_v35 = vadd.f32 %v202_v29, %v108_v34 }
 0x119   :  { %v112_v36 = vadd.f32 %v109_v35, %v27_v12 }
 0x11b   :  { %v116_v37 = vsel %vm36_vm0, %v112_v36, 0.0 }
 0x11c   :  { %117 = vadd.xlane.f32.xlu0 %v116_v37 }
 0x181   :  { %v115_v45 = vpop.xlane.xlu0 %114 }
 0x182   :  { %v126_v46 = vmul.f32 %v125_v44, %v115_v45 }
 0x184   :  { %v128_v47 = vsub.f32 %v111_v32, %v126_v46 }
 0x186   :  { %v130_v48 = vmul.f32 %v128_v47, %v128_v47 }
 0x188   :  { %v132_v49 = vsel %vm36_vm0, %v130_v48, 0.0 }
 0x189   :  { %133 = vadd.xlane.f32.xlu1 %v132_v49 }
 0x18f   :  { %v118_v50 = vpop.xlane.xlu0 %117 }
 0x190   :  { %v127_v51 = vmul.f32 %v125_v44, %v118_v50 }
 0x192   :  { %v129_v52 = vsub.f32 %v112_v36, %v127_v51 }
 0x194   :  { %v131_v53 = vmul.f32 %v129_v52, %v129_v52 }
 0x196   :  { %v135_v54 = vsel %vm36_vm0, %v131_v53, 0.0 }
 0x197   :  { %136 = vadd.xlane.f32.xlu1 %v135_v54 }
 0x1fc   :  { %v134_v55 = vpop.xlane.xlu1 %133 }
 0x1fd   :  { %v138_v56 = vmul.f32 %v134_v55, %v125_v44 }
 0x1ff   :  { %v140_v57 = vadd.f32 1e-05, %v138_v56 }
 0x201   :  { %207 = vrsqrt.f32 %v140_v57  ;;  %vm148_vm3 = vweird.f32 %v140_v57 }
 0x207   :  { %v208_v58 = vpop.eup %207 }
 0x208   :  { %v143_v59 = vmul.f32 %v208_v58, %v140_v57  ;;  %vm149_vm2 = vweird.f32 %v208_v58 }
 0x209   :  { %vm150_vm4 = vmor %vm148_vm3, %vm149_vm2 }
 0x20a   :  { %v144_v60 = vmul.f32 %v208_v58, %v143_v59  ;;  %v137_v61 = vpop.xlane.xlu1 %136 }
 0x20b   :  { %v139_v62 = vmul.f32 %v137_v61, %v125_v44 }
 0x20c   :  { %v145_v63 = vmul.f32 0.5, %v144_v60 }
 0x20d   :  { %v141_v0 = vadd.f32 1e-05, %v139_v62 }
 0x20e   :  { %v146_v1 = vsub.f32 1.5, %v145_v63 }
 0x20f   :  { %209 = vrsqrt.f32 %v141_v0  ;;  %vm158_vm6 = vweird.f32 %v141_v0 }
 0x210   :  { %v147_v2 = vmul.f32 %v208_v58, %v146_v1 }
 0x212   :  { %v151_v4 = vsel %vm150_vm4, %v208_v58, %v147_v2 }
 0x213   :  { %v162_v6 = vmul.f32 %v151_v4, %v128_v47 }
 0x215   :  { %v210_v7 = vpop.eup %209  ;;  %v168_v8 = vmul.f32 %v203_v3, %v162_v6 }
 0x216   :  { %v153_v9 = vmul.f32 %v210_v7, %v141_v0  ;;  %vm159_vm5 = vweird.f32 %v210_v7 }
 0x217   :  { %v174_v10 = vadd.f32 %v204_v5, %v168_v8  ;;  %vm160_vm7 = vmor %vm158_vm6, %vm159_vm5 }
 0x218   :  { %v154_v11 = vmul.f32 %v210_v7, %v153_v9 }
 0x219   :  { %176 = vst.msk [vmem:[%s355_s7] sm:$0xff] %vm36_vm0, %v174_v10 }
 0x21a   :  { %v155_v12 = vmul.f32 0.5, %v154_v11 }
 0x21c   :  { %v156_v13 = vsub.f32 1.5, %v155_v12 }
 0x21e   :  { %v157_v14 = vmul.f32 %v210_v7, %v156_v13 }
 0x220   :  { %v161_v15 = vsel %vm160_vm7, %v210_v7, %v157_v14 }
 0x221   :  { %v163_v16 = vmul.f32 %v161_v15, %v129_v52 }
 0x223   :  { %v169_v17 = vmul.f32 %v203_v3, %v163_v16 }
 0x225   :  { %v175_v18 = vadd.f32 %v204_v5, %v169_v17 }
 0x227   :  { %177 = vst.msk [vmem:[%s355_s7 + $0x8] sm:$0xff] %vm36_vm0, %v175_v18 }

// kernel: jammer_transformer_decoder.33
= control target key start
LH: loop header
LB: loop body
LE: loop exit
PB: predicated region body
PF: predicated region fallthrough
CT: control target
= control target key end

     0   :  { %8 = vsyncpa [#allocation3], 0  ;;  %s114_s15 = smov [#allocation2]   ;;  %s115_s17 = smov 128   ;;  %s155_s0 = inlined_call_operand.vmem [shape: f32[16,32], index: 0, kind: input, shape index: {}]   ;;  %s156_s1 = inlined_call_operand.hbm [shape: f32[32,64], index: 1, kind: input, shape index: {}]   ;;  %s157_s2 = inlined_call_operand.vmem [shape: f32[1,64], index: 2, kind: input, shape index: {}]   ;;  %s158_s3 = inlined_call_operand.vmem [shape: f32[16,64], index: 3, kind: output, shape index: {}]  }
   0x1   :  { %s15_s14 = sshll.u32 %s156_s1, 4  ;;  %s17_s16 = sshll.u32 %s114_s15, 4  ;;  %s16_s14 = int_to_ptr.hbm [resolvable:$true] %s15_s14  ;;  %s18_s16 = int_to_ptr.vmem [resolvable:$true] %s17_s16 }
   0x2   :  { %s116_s18 = smov 8  }
   0x3   :  { %23 = dma.hbm_to_vmem [thread:$0]  %s16_s14, 512, %s18_s16, [#allocation3], %s115_s17, %s115_s17, %s116_s18  }
   0x4   :  { %112 = dma.done.wait [#allocation3], 512  }
   0x5   :  { %113 = vsyncadd [#allocation3], 4294966784  ;;  %v35_v0 = vld [vmem:[#allocation2 + $0x18] sm:$0xff]  ;;  %v34_v1 = vld [vmem:[#allocation2 + $0x10] sm:$0xff]  ;;  %vm40_vm0 = vcmask 261120   ;;  %vm70_vm1 = vcmask 523264  }
   0x6   :  { %59 = vmatpush.msra.mxu0 %v35_v0  ;;  %80 = vmatpush.msra.mxu1 %v35_v0  ;;  %v33_v2 = vld [vmem:[#allocation2 + $0x8] sm:$0xff]  ;;  %v32_v3 = vld [vmem:[#allocation2] sm:$0xff] }
   0x7   :  { %v30_v4 = vld [vmem:[%s155_s0] sm:$0xff]  ;;  %v31_v5 = vld [vmem:[%s155_s0 + $0x8] sm:$0xff] }
   0x8   :  { %60 = vmatpush.msra.mxu0 %v34_v1  ;;  %81 = vmatpush.msra.mxu1 %v34_v1  ;;  %v87_v6 = vld [vmem:[%s157_s2] ss:$0 sm:$0xff] }
   0xa   :  { %61 = vmatpush.msra.mxu0 %v33_v2  ;;  %82 = vmatpush.msra.mxu1 %v33_v2 }
   0xc   :  { %62 = vmatpush.msra.mxu0 %v32_v3  ;;  %83 = vmatpush.msra.mxu1 %v32_v3 }
   0xd   :  { %78 = vmatmul.msk.f32.vlgmr.msra.gmra.mxu0 %vm40_vm0, %v30_v4  ;;  %79 = vmatmul.msk.f32.vlgmr.msra.gmra.mxu1 %vm40_vm0, %v31_v5 }
  0x8a   :  { %v64_v7 = vpop.f32.mrf.mxu0  ;;  %v67_v8 = vpop.f32.mrf.mxu1 }
  0x8b   :  { %v65_v9 = vadd.f32 %v87_v6, %v64_v7  ;;  %v68_v10 = vadd.f32 %v87_v6, %v67_v8 }
  0x8d   :  { %71 = vst.msk [vmem:[%s158_s3] sm:$0xff] %vm70_vm1, %v65_v9 }
  0x8e   :  { %72 = vst.msk [vmem:[%s158_s3 + $0x8] sm:$0xff] %vm70_vm1, %v68_v10 }
  0x8f   :  { %77 = vsyncpa [#allocation3], 1 }

// kernel: jammer_transformer_decoder.35
= control target key start
LH: loop header
LB: loop body
LE: loop exit
PB: predicated region body
PF: predicated region fallthrough
CT: control target
= control target key end

     0   :  { %11 = vsyncpa [#allocation3], 0  ;;  %s198_s24 = smov [#allocation2]   ;;  %s199_s26 = smov 128   ;;  %s275_s0 = inlined_call_operand.vmem [shape: f32[16,32], index: 0, kind: input, shape index: {}]   ;;  %s276_s1 = inlined_call_operand.vmem [shape: f32[16,32], index: 1, kind: input, shape index: {}]   ;;  %s277_s2 = inlined_call_operand.hbm [shape: f32[32,32], index: 2, kind: input, shape index: {}]   ;;  %s278_s3 = inlined_call_operand.vmem [shape: f32[1,32], index: 3, kind: input, shape index: {}]   ;;  %s279_s4 = inlined_call_operand.vmem [shape: f32[1,32], index: 4, kind: input, shape index: {}]   ;;  %s280_s5 = inlined_call_operand.vmem [shape: f32[1,32], index: 5, kind: input, shape index: {}]   ;;  %s281_s6 = inlined_call_operand.vmem [shape: f32[16,32], index: 6, kind: output, shape index: {}]  }
   0x1   :  { %s20_s23 = sshll.u32 %s277_s2, 4  ;;  %s22_s25 = sshll.u32 %s198_s24, 4  ;;  %s21_s23 = int_to_ptr.hbm [resolvable:$true] %s20_s23  ;;  %s23_s25 = int_to_ptr.vmem [resolvable:$true] %s22_s25 }
   0x2   :  { %s200_s27 = smov 8  }
   0x3   :  { %28 = dma.hbm_to_vmem [thread:$0]  %s21_s23, 512, %s23_s25, [#allocation3], %s199_s26, %s199_s26, %s200_s27  }
   0x4   :  { %196 = dma.done.wait [#allocation3], 512  }
   0x5   :  { %197 = vsyncadd [#allocation3], 4294966784  ;;  %v44_v0 = vld [vmem:[#allocation2 + $0x18] sm:$0xff]  ;;  %v43_v1 = vld [vmem:[#allocation2 + $0x10] sm:$0xff]  ;;  %vm49_vm0 = vcmask 261120   ;;  %v201_v17 = vmov 32.0  }
   0x6   :  { %68 = vmatpush.msra.mxu0 %v44_v0  ;;  %155 = vmatpush.msra.mxu1 %v44_v0  ;;  %v42_v2 = vld [vmem:[#allocation2 + $0x8] sm:$0xff]  ;;  %v41_v3 = vld [vmem:[#allocation2] sm:$0xff]  ;;  %166 = vrcp.f32 %v201_v17 }
   0x7   :  { %v39_v4 = vld [vmem:[%s275_s0] sm:$0xff]  ;;  %v40_v5 = vld [vmem:[%s275_s0 + $0x8] sm:$0xff] }
   0x8   :  { %69 = vmatpush.msra.mxu0 %v43_v1  ;;  %156 = vmatpush.msra.mxu1 %v43_v1  ;;  %v163_v6 = vld [vmem:[%s278_s3] ss:$0 sm:$0xff]  ;;  %v80_v13 = vld [vmem:[%s276_s1 + $0x8] sm:$0xff] }
   0x9   :  { %v79_v8 = vld [vmem:[%s276_s1] sm:$0xff] }
   0xa   :  { %70 = vmatpush.msra.mxu0 %v42_v2  ;;  %157 = vmatpush.msra.mxu1 %v42_v2  ;;  %v164_v48 = vld [vmem:[%s279_s4] ss:$0 sm:$0xff] }
   0xb   :  { %v165_v51 = vld [vmem:[%s280_s5] ss:$0 sm:$0xff] }
   0xc   :  { %71 = vmatpush.msra.mxu0 %v41_v3  ;;  %158 = vmatpush.msra.mxu1 %v41_v3  ;;  %v167_v18 = vpop.eup %166 }
   0xd   :  { %153 = vmatmul.msk.f32.vlgmr.msra.gmra.mxu0 %vm49_vm0, %v39_v4  ;;  %154 = vmatmul.msk.f32.vlgmr.msra.gmra.mxu1 %vm49_vm0, %v40_v5  ;;  %v90_v19 = vmul.f32 32.0, %v167_v18  ;;  %vm94_vm1 = vweird.f32 %v167_v18 }
   0xf   :  { %v91_v20 = vsub.f32 1.0, %v90_v19 }
  0x11   :  { %v92_v21 = vmul.f32 %v167_v18, %v91_v20 }
  0x13   :  { %v93_v22 = vadd.f32 %v167_v18, %v92_v21 }
  0x15   :  { %v95_v23 = vsel %vm94_vm1, %v167_v18, %v93_v22 }
  0x8a   :  { %v73_v7 = vpop.f32.mrf.mxu0  ;;  %v76_v9 = vpop.f32.mrf.mxu1 }
  0x8b   :  { %v74_v10 = vadd.f32 %v163_v6, %v73_v7  ;;  %v77_v12 = vadd.f32 %v163_v6, %v76_v9 }
  0x8d   :  { %v81_v11 = vadd.f32 %v79_v8, %v74_v10  ;;  %v82_v15 = vadd.f32 %v80_v13, %v77_v12 }
  0x8f   :  { %v83_v14 = vsel %vm49_vm0, %v81_v11, 0.0  ;;  %v86_v16 = vsel %vm49_vm0, %v82_v15, 0.0 }
  0x90   :  { %84 = vadd.xlane.f32.xlu0 %v83_v14 }
  0x98   :  { %87 = vadd.xlane.f32.xlu0 %v86_v16 }
 0x103   :  { %v85_v24 = vpop.xlane.xlu0 %84 }
 0x104   :  { %v96_v25 = vmul.f32 %v95_v23, %v85_v24 }
 0x106   :  { %v98_v26 = vsub.f32 %v81_v11, %v96_v25 }
 0x108   :  { %v100_v27 = vmul.f32 %v98_v26, %v98_v26 }
 0x10a   :  { %v102_v28 = vsel %vm49_vm0, %v100_v27, 0.0 }
 0x10b   :  { %103 = vadd.xlane.f32.xlu1 %v102_v28  ;;  %v88_v29 = vpop.xlane.xlu0 %87 }
 0x10c   :  { %v97_v30 = vmul.f32 %v95_v23, %v88_v29 }
 0x10e   :  { %v99_v31 = vsub.f32 %v82_v15, %v97_v30 }
 0x110   :  { %v101_v32 = vmul.f32 %v99_v31, %v99_v31 }
 0x112   :  { %v105_v33 = vsel %vm49_vm0, %v101_v32, 0.0 }
 0x113   :  { %106 = vadd.xlane.f32.xlu1 %v105_v33 }
 0x17e   :  { %v104_v34 = vpop.xlane.xlu1 %103 }
 0x17f   :  { %v108_v35 = vmul.f32 %v104_v34, %v95_v23 }
 0x181   :  { %v110_v36 = vadd.f32 1e-05, %v108_v35 }
 0x183   :  { %168 = vrsqrt.f32 %v110_v36  ;;  %vm118_vm3 = vweird.f32 %v110_v36 }
 0x186   :  { %v107_v37 = vpop.xlane.xlu1 %106 }
 0x187   :  { %v109_v38 = vmul.f32 %v107_v37, %v95_v23 }
 0x189   :  { %v169_v39 = vpop.eup %168  ;;  %v111_v40 = vadd.f32 1e-05, %v109_v38 }
 0x18a   :  { %v113_v41 = vmul.f32 %v169_v39, %v110_v36  ;;  %vm119_vm2 = vweird.f32 %v169_v39 }
 0x18b   :  { %170 = vrsqrt.f32 %v111_v40  ;;  %vm120_vm4 = vmor %vm118_vm3, %vm119_vm2  ;;  %vm128_vm6 = vweird.f32 %v111_v40 }
 0x18c   :  { %v114_v42 = vmul.f32 %v169_v39, %v113_v41 }
 0x18e   :  { %v115_v43 = vmul.f32 0.5, %v114_v42 }
 0x190   :  { %v116_v44 = vsub.f32 1.5, %v115_v43 }
 0x191   :  { %v171_v45 = vpop.eup %170 }
 0x192   :  { %v117_v46 = vmul.f32 %v169_v39, %v116_v44  ;;  %v123_v47 = vmul.f32 %v171_v45, %v111_v40  ;;  %vm129_vm5 = vweird.f32 %v171_v45 }
 0x193   :  { %vm130_vm7 = vmor %vm128_vm6, %vm129_vm5 }
 0x194   :  { %v121_v49 = vsel %vm120_vm4, %v169_v39, %v117_v46  ;;  %v124_v50 = vmul.f32 %v171_v45, %v123_v47 }
 0x195   :  { %v132_v52 = vmul.f32 %v121_v49, %v98_v26 }
 0x196   :  { %v125_v53 = vmul.f32 0.5, %v124_v50 }
 0x197   :  { %v138_v54 = vmul.f32 %v164_v48, %v132_v52 }
 0x198   :  { %v126_v55 = vsub.f32 1.5, %v125_v53 }
 0x199   :  { %v144_v56 = vadd.f32 %v165_v51, %v138_v54 }
 0x19a   :  { %v127_v57 = vmul.f32 %v171_v45, %v126_v55 }
 0x19b   :  { %146 = vst.msk [vmem:[%s281_s6] sm:$0xff] %vm49_vm0, %v144_v56 }
 0x19c   :  { %v131_v58 = vsel %vm130_vm7, %v171_v45, %v127_v57 }
 0x19d   :  { %v133_v59 = vmul.f32 %v131_v58, %v99_v31 }
 0x19f   :  { %v139_v60 = vmul.f32 %v164_v48, %v133_v59 }
 0x1a1   :  { %v145_v61 = vadd.f32 %v165_v51, %v139_v60 }
 0x1a3   :  { %147 = vst.msk [vmem:[%s281_s6 + $0x8] sm:$0xff] %vm49_vm0, %v145_v61 }
 0x1a4   :  { %152 = vsyncpa [#allocation3], 1 }

// kernel: jammer_transformer_decoder.37
= control target key start
LH: loop header
LB: loop body
LE: loop exit
PB: predicated region body
PF: predicated region fallthrough
CT: control target
= control target key end

     0   :  { %vm24_vm0 = vcmask 261120   ;;  %s114_s1 = inlined_call_operand.vmem [shape: f32[32,128], index: 1, kind: input, shape index: {}]   ;;  %s115_s2 = inlined_call_operand.vmem [shape: f32[1,128], index: 2, kind: input, shape index: {}]   ;;  %s116_s0 = inlined_call_operand.vmem [shape: f32[16,32], index: 0, kind: input, shape index: {}]   ;;  %s117_s3 = inlined_call_operand.vmem [shape: f32[16,128], index: 3, kind: output, shape index: {}]  }
   0x1   :  { %v19_v0 = vld [vmem:[%s114_s1 + $0x18] sm:$0xff]  ;;  %v18_v1 = vld [vmem:[%s114_s1 + $0x10] sm:$0xff]  ;;  %v17_v2 = vld [vmem:[%s114_s1 + $0x8] sm:$0xff] }
   0x2   :  { %43 = vmatpush.msra.mxu0 %v19_v0  ;;  %62 = vmatpush.msra.mxu1 %v19_v0  ;;  %v16_v3 = vld [vmem:[%s114_s1] sm:$0xff]  ;;  %v15_v5 = vld [vmem:[%s116_s0 + $0x8] sm:$0xff] }
   0x3   :  { %v14_v4 = vld [vmem:[%s116_s0] sm:$0xff] }
   0x4   :  { %44 = vmatpush.msra.mxu0 %v18_v1  ;;  %63 = vmatpush.msra.mxu1 %v18_v1  ;;  %v66_v6 = vld [vmem:[%s115_s2] ss:$0 sm:$0xff] }
   0x6   :  { %45 = vmatpush.msra.mxu0 %v17_v2  ;;  %64 = vmatpush.msra.mxu1 %v17_v2 }
   0x8   :  { %46 = vmatpush.msra.mxu0 %v16_v3  ;;  %65 = vmatpush.msra.mxu1 %v16_v3 }
   0x9   :  { %60 = vmatmul.msk.f32.vlgmr.msra.gmra.mxu0 %vm24_vm0, %v14_v4  ;;  %61 = vmatmul.msk.f32.vlgmr.msra.gmra.mxu1 %vm24_vm0, %v15_v5 }
  0x86   :  { %v48_v7 = vpop.f32.mrf.mxu0  ;;  %v51_v8 = vpop.f32.mrf.mxu1 }
  0x87   :  { %v49_v9 = vadd.f32 %v66_v6, %v48_v7  ;;  %v52_v10 = vadd.f32 %v66_v6, %v51_v8 }
  0x89   :  { %54 = vst [vmem:[%s117_s3] sm:$0xff] %v49_v9 }
  0x8a   :  { %55 = vst [vmem:[%s117_s3 + $0x8] sm:$0xff] %v52_v10 }

</bundles_post_ra>
